<compile_context>
chip_gen: v6e
topology: v6e:2x2x1
jax: 0.10.0
libtpu: 0.0.40
codegen_flags: <defaults>
</compile_context>

<pallas_src>
import jax
import jax.numpy as jnp
from jax.experimental import pallas as pl
from jax.experimental.pallas import tpu as pltpu


# ----------------------------------------------------------------------------
# Pallas kernel: fused 3-block encoder  (3x [matmul + bias + ReLU])
# ----------------------------------------------------------------------------
def _fused_encoder_kernel(x_ref, w1_ref, w2_ref, w3_ref,
                          b1_ref, b2_ref, b3_ref,
                          o1_ref, o2_ref, o3_ref):
    # x_ref : (tile_m, K1)   flat NCHW input rows (f32)
    # wK_ref: (K_k, L_k)     dense conv-as-matmul weights (bf16 default / f32)
    # bK_ref: (1, L_k)       f32 bias broadcast over spatial positions
    # oK_ref: (tile_m, L_k)  f32 flat NCHW skip outputs (block k)
    mxu_dtype = w1_ref.dtype

    a1 = jnp.dot(x_ref[...].astype(mxu_dtype), w1_ref[...],
                 preferred_element_type=jnp.float32)
    a1 = jnp.maximum(a1 + b1_ref[...], 0.0)
    o1_ref[...] = a1.astype(o1_ref.dtype)

    a2 = jnp.dot(a1.astype(mxu_dtype), w2_ref[...],
                 preferred_element_type=jnp.float32)
    a2 = jnp.maximum(a2 + b2_ref[...], 0.0)
    o2_ref[...] = a2.astype(o2_ref.dtype)

    a3 = jnp.dot(a2.astype(mxu_dtype), w3_ref[...],
                 preferred_element_type=jnp.float32)
    a3 = jnp.maximum(a3 + b3_ref[...], 0.0)
    o3_ref[...] = a3.astype(o3_ref.dtype)


_ACT_VMEM_BUDGET_BYTES = 24 << 20   # activation+output tiles (double-buffered)
_VMEM_LIMIT_CEILING = 56 << 20      # keep headroom below v7x's 64 MiB physical


def _pick_batch_tile(n, k1, l1, l2, l3, act_itemsize=4, n_buffers=2):
    """VMEM-budgeted batch tile.

    per-row bytes = f32 x-row (k1) + the three f32 output rows (l1+l2+l3),
    times n_buffers for double buffering.  Small batches stay a single block
    (no 2-step grids that would duplicate weight DMA across v7x cores); large
    batches are split into 8-aligned tiles that divide n exactly.
    """
    per_row = act_itemsize * (k1 + l1 + l2 + l3) * n_buffers
    cap = max(8, (_ACT_VMEM_BUDGET_BYTES // per_row) // 8 * 8)
    if n <= cap:
        return n
    for t in range(min(cap, n), 7, -1):
        if n % t == 0 and t % 8 == 0:
            return t
    # No clean 8-aligned divisor below the cap: run as one full-extent block
    # (full-dim block shapes always satisfy the (8,128) constraint).
    return n


def _build_specs(k1, l1, l2, l3, tile_m, single_buffer_consts):
    def const_spec(shape):
        if single_buffer_consts:
            # Constant index_map -> the block never changes across grid steps;
            # a single VMEM buffer is enough (frees ~1x the weight footprint).
            return pl.BlockSpec(shape, lambda i: (0, 0),
                                pipeline_mode=pl.Buffered(1))
        return pl.BlockSpec(shape, lambda i: (0, 0))

    in_specs = [
        pl.BlockSpec((tile_m, k1), lambda i: (i, 0)),   # activations: tiled on batch
        const_spec((k1, l1)),                           # weights: VMEM-resident
        const_spec((l1, l2)),
        const_spec((l2, l3)),
        const_spec((1, l1)),                            # biases
        const_spec((1, l2)),
        const_spec((1, l3)),
    ]
    out_specs = (
        pl.BlockSpec((tile_m, l1), lambda i: (i, 0)),
        pl.BlockSpec((tile_m, l2), lambda i: (i, 0)),
        pl.BlockSpec((tile_m, l3), lambda i: (i, 0)),
    )
    return in_specs, out_specs


def _fused_encoder(x_flat, w_mats, b_flats):
    n, k1 = x_flat.shape
    l1 = w_mats[0].shape[1]
    l2 = w_mats[1].shape[1]
    l3 = w_mats[2].shape[1]

    tile_m = _pick_batch_tile(n, k1, l1, l2, l3)
    grid_steps = n // tile_m

    # Only ask for megacore sharding when there are enough steps to amortize
    # the per-core weight fetch (v7x); otherwise a plain sequential grid.
    dim_sem = ("parallel",) if grid_steps >= 4 else ("arbitrary",)

    weight_bytes = sum(int(w.size) * w.dtype.itemsize for w in w_mats)
    bias_bytes = sum(int(b.size) * b.dtype.itemsize for b in b_flats)
    act_tile_bytes = tile_m * (k1 + l1 + l2 + l3) * 4
    vmem_limit = int(min(
        max(32 << 20, 2 * (weight_bytes + bias_bytes + act_tile_bytes) + (4 << 20)),
        _VMEM_LIMIT_CEILING))

    cost = pl.CostEstimate(
        flops=int(2 * n * (k1 * l1 + l1 * l2 + l2 * l3)),
        transcendentals=0,
        bytes_accessed=int(x_flat.size * 4 + weight_bytes + bias_bytes
                           + n * (l1 + l2 + l3) * 4),
    )

    out_shape = (
        jax.ShapeDtypeStruct((n, l1), jnp.float32),
        jax.ShapeDtypeStruct((n, l2), jnp.float32),
        jax.ShapeDtypeStruct((n, l3), jnp.float32),
    )

    def run(single_buffer_consts):
        in_specs, out_specs = _build_specs(k1, l1, l2, l3, tile_m,
                                           single_buffer_consts)
        return pl.pallas_call(
            _fused_encoder_kernel,
            out_shape=out_shape,
            grid=(grid_steps,),
            in_specs=in_specs,
            out_specs=out_specs,
            compiler_params=pltpu.CompilerParams(
                dimension_semantics=dim_sem,
                vmem_limit_bytes=vmem_limit,
            ),
            cost_estimate=cost,
        )(x_flat, w_mats[0], w_mats[1], w_mats[2],
          b_flats[0], b_flats[1], b_flats[2])

    try:
        return run(single_buffer_consts=True)
    except Exception:
        # Fallback if this jax build rejects pipeline_mode=pl.Buffered(1);
        # double-buffered constant blocks still fit comfortably in VMEM here.
        return run(single_buffer_consts=False)


# ----------------------------------------------------------------------------
# Init-time precompute: Conv2d(k=3, s=2, p=1) as a dense NCHW-flat matrix
# ----------------------------------------------------------------------------
def _conv_as_dense_matrix(w_oihw, H, W, stride=2, pad=1, chunk=512):
    """Dense M of shape (Cin*H*W, Cout*Ho*Wo) s.t. for NCHW-flattened x:
         flat_nchw(conv2d(x, w)) == flat_nchw(x) @ M
    (padding and stride are folded into M).  Built once at __init__, in
    chunks so peak memory stays bounded, and guarded because it is O(K^2)."""
    Cout, Cin, KH, KW = w_oihw.shape
    Ho = (H + 2 * pad - KH) // stride + 1
    Wo = (W + 2 * pad - KW) // stride + 1
    K = Cin * H * W
    if K > 8192:
        # TODO(synk): switch to a per-tap / banded conv formulation here; the
        # dense Toeplitz precompute is O(K^2) and only meant for small inputs.
        raise NotImplementedError(
            "dense conv-as-matmul precompute is O(K^2); input too large")
    cols = jnp.arange(K)
    pieces = []
    for s in range(0, K, chunk):
        rows = jnp.arange(s, min(s + chunk, K))
        basis = (rows[:, None] == cols[None, :]).astype(jnp.float32)
        basis = basis.reshape(-1, Cin, H, W)                      # NCHW basis imgs
        resp = jax.lax.conv_general_dilated(
            basis, w_oihw, window_strides=(stride, stride),
            padding=((pad, pad), (pad, pad)),
            dimension_numbers=("NCHW", "OIHW", "NCHW"))           # (chunk,Cout,Ho,Wo)
        pieces.append(resp.reshape(-1, Cout * Ho * Wo))
    mat = pieces[0] if len(pieces) == 1 else jnp.concatenate(pieces, axis=0)
    return mat, Ho, Wo


# ----------------------------------------------------------------------------
# BasicEncoder forward (PyTorch NCHW in / NCHW out semantics)
# ----------------------------------------------------------------------------
class BasicEncoderPallas:
    def __init__(self, input_channels, classification_output, encoder_filters,
                 spatial_hw, key, mxu_dtype=jnp.bfloat16):
        self.input_channels = input_channels
        self.classification_output = classification_output
        self.in_hw = tuple(spatial_hw)
        self.mxu_dtype = mxu_dtype

        # Synthetic Conv2d parameters in PyTorch (Cout, Cin, KH, KW) layout.
        self.conv_params = []
        c_in = input_channels
        for idx, c_out in enumerate(encoder_filters):
            kw_, kb_ = jax.random.split(jax.random.fold_in(key, idx))
            w = jax.random.normal(kw_, (c_out, c_in, 3, 3), jnp.float32) * 0.1
            b = jax.random.normal(kb_, (c_out,), jnp.float32) * 0.1
            self.conv_params.append((w, b))
            c_in = c_out

        # Hoisted out of forward: dense conv matrices (cast to the MXU dtype,
        # bf16 by default -> halves the dominant weight-DMA bytes) and
        # spatially-tiled f32 biases, in NCHW-flat ordering on both sides.
        self.w_mats = []
        self.b_flats = []
        self.block_dims = []   # (Cout, Ho, Wo) per block
        H, W = self.in_hw
        for (w, b) in self.conv_params:
            mat, Ho, Wo = _conv_as_dense_matrix(w, H, W)
            Cout = w.shape[0]
            self.w_mats.append(mat.astype(self.mxu_dtype))
            self.b_flats.append(
                jnp.repeat(b, Ho * Wo).reshape(1, Cout * Ho * Wo).astype(jnp.float32))
            self.block_dims.append((Cout, Ho, Wo))
            H, W = Ho, Wo

    def __call__(self, x_nchw):
        N, C, H, W = x_nchw.shape
        assert C == self.input_channels and (H, W) == self.in_hw, \
            "encoder was specialized for a different input shape"

        # NCHW-flat; no layout transpose needed (ordering folded into w_mats).
        x_flat = x_nchw.reshape(N, C * H * W)

        outs_flat = _fused_encoder(x_flat, self.w_mats, self.b_flats)

        skip_connections = []
        for o_flat, (Cout, Ho, Wo) in zip(outs_flat, self.block_dims):
            skip_connections.insert(0, o_flat.reshape(N, Cout, Ho, Wo))
        if self.classification_output:
            return skip_connections.pop(0)
        return skip_connections.pop(0), skip_connections


# ----------------------------------------------------------------------------
# Pure-JAX reference for verification
# ----------------------------------------------------------------------------
def _ref_block(x_nchw, w, b):
    out = jax.lax.conv_general_dilated(
        x_nchw, w, window_strides=(2, 2), padding=((1, 1), (1, 1)),
        dimension_numbers=("NCHW", "OIHW", "NCHW"),
    )
    return jnp.maximum(out + b[None, :, None, None], 0.0)


if __name__ == "__main__":
    key = jax.random.PRNGKey(0)
    k_x, k_w = jax.random.split(key)

    N, C, H, W = 2, 4, 16, 16
    x = jax.random.normal(k_x, (N, C, H, W), jnp.float32)
    encoder_filters = [8, 16, 32]

    # Optimized default path: bf16 weights / bf16 MXU inputs, f32 accumulate.
    model_bf16 = BasicEncoderPallas(
        input_channels=C, classification_output=False,
        encoder_filters=encoder_filters, spatial_hw=(H, W), key=k_w,
        mxu_dtype=jnp.bfloat16)
    deepest_bf16, skips_bf16 = model_bf16(x)
    deepest_bf16 = jax.block_until_ready(deepest_bf16)
    skips_bf16 = [jax.block_until_ready(s) for s in skips_bf16]

    # Exact-parity path (same synthetic conv params, f32 MXU).
    model_f32 = BasicEncoderPallas(
        input_channels=C, classification_output=False,
        encoder_filters=encoder_filters, spatial_hw=(H, W), key=k_w,
        mxu_dtype=jnp.float32)
    deepest_f32, skips_f32 = model_f32(x)
    deepest_f32 = jax.block_until_ready(deepest_f32)
    skips_f32 = [jax.block_until_ready(s) for s in skips_f32]

    # Reference: direct conv chain on the original 3x3 weights.
    ref_val = x
    ref_skips = []
    for (w, b) in model_f32.conv_params:
        ref_skips.insert(0, _ref_block(ref_val, w, b))
        ref_val = ref_skips[0]
    ref_deepest = ref_skips.pop(0)

    assert deepest_f32.shape == (N, 32, 2, 2), deepest_f32.shape
    assert [s.shape for s in skips_f32] == [(N, 16, 4, 4), (N, 8, 8, 8)]
    assert deepest_bf16.shape == (N, 32, 2, 2), deepest_bf16.shape
    assert [s.shape for s in skips_bf16] == [(N, 16, 4, 4), (N, 8, 8, 8)]

    # f32 path: exact parity.
    assert jnp.allclose(deepest_f32, ref_deepest, atol=1e-4, rtol=1e-4)
    for got, want in zip(skips_f32, ref_skips):
        assert jnp.allclose(got, want, atol=1e-4, rtol=1e-4)

    # bf16 path: bf16-appropriate tolerance (3-layer compounding).
    assert jnp.allclose(deepest_bf16, ref_deepest, atol=5e-2, rtol=5e-2)
    for got, want in zip(skips_bf16, ref_skips):
        assert jnp.allclose(got, want, atol=5e-2, rtol=5e-2)

    print("KERNEL_OK")
</pallas_src>

<mosaic_0001>
module attributes {stable_mosaic.version = 11 : i64} {
  func.func @_fused_encoder_kernel(%arg0: i32, %arg1: memref<2x1024xf32, #tpu.memory_space<vmem>>, %arg2: memref<1024x512xbf16, #tpu.memory_space<vmem>>, %arg3: memref<512x256xbf16, #tpu.memory_space<vmem>>, %arg4: memref<256x128xbf16, #tpu.memory_space<vmem>>, %arg5: memref<1x512xf32, #tpu.memory_space<vmem>>, %arg6: memref<1x256xf32, #tpu.memory_space<vmem>>, %arg7: memref<1x128xf32, #tpu.memory_space<vmem>>, %arg8: memref<2x512xf32, #tpu.memory_space<vmem>>, %arg9: memref<2x256xf32, #tpu.memory_space<vmem>>, %arg10: memref<2x128xf32, #tpu.memory_space<vmem>>) attributes {dimension_semantics = [#tpu.dimension_semantics<arbitrary>], iteration_bounds = array<i64: 1>, scalar_prefetch = 0 : i64, scratch_operands = 0 : i64, tpu.core_type = #tpu.core_type<tc>, window_params = [{transform_indices = @transform_0, window_bounds = array<i64: 2, 1024>}, {pipeline_mode = #tpu.pipeline_mode<synchronous>, transform_indices = @transform_1, window_bounds = array<i64: 1024, 512>}, {pipeline_mode = #tpu.pipeline_mode<synchronous>, transform_indices = @transform_2, window_bounds = array<i64: 512, 256>}, {pipeline_mode = #tpu.pipeline_mode<synchronous>, transform_indices = @transform_3, window_bounds = array<i64: 256, 128>}, {pipeline_mode = #tpu.pipeline_mode<synchronous>, transform_indices = @transform_4, window_bounds = array<i64: 1, 512>}, {pipeline_mode = #tpu.pipeline_mode<synchronous>, transform_indices = @transform_5, window_bounds = array<i64: 1, 256>}, {pipeline_mode = #tpu.pipeline_mode<synchronous>, transform_indices = @transform_6, window_bounds = array<i64: 1, 128>}, {transform_indices = @transform_7, window_bounds = array<i64: 2, 512>}, {transform_indices = @transform_8, window_bounds = array<i64: 2, 256>}, {transform_indices = @transform_9, window_bounds = array<i64: 2, 128>}]} {
    %c0 = arith.constant 0 : index
    %c0_0 = arith.constant 0 : index
    %0 = vector.load %arg1[%c0, %c0_0] : memref<2x1024xf32, #tpu.memory_space<vmem>>, vector<2x1024xf32>
    %1 = arith.truncf %0 : vector<2x1024xf32> to vector<2x1024xbf16>
    %c0_1 = arith.constant 0 : index
    %c0_2 = arith.constant 0 : index
    %2 = vector.load %arg2[%c0_1, %c0_2] : memref<1024x512xbf16, #tpu.memory_space<vmem>>, vector<1024x512xbf16>
    %cst = arith.constant dense<0.000000e+00> : vector<2x512xf32>
    %3 = tpu.matmul %1, %2, %cst {dimension_numbers = #tpu.dot_dimension_numbers<[1], [0], [0], [1], [0, 0, 1, 1], [], []>} : vector<2x1024xbf16>, vector<1024x512xbf16>, vector<2x512xf32> -> vector<2x512xf32>
    %c0_3 = arith.constant 0 : index
    %c0_4 = arith.constant 0 : index
    %4 = vector.load %arg5[%c0_3, %c0_4] : memref<1x512xf32, #tpu.memory_space<vmem>>, vector<1x512xf32>
    %5 = vector.broadcast %4 : vector<1x512xf32> to vector<2x512xf32>
    %6 = arith.addf %3, %5 : vector<2x512xf32>
    %cst_5 = arith.constant 0.000000e+00 : f32
    %7 = vector.broadcast %cst_5 : f32 to vector<2x512xf32>
    %8 = arith.maximumf %6, %7 : vector<2x512xf32>
    %c0_6 = arith.constant 0 : index
    %c0_7 = arith.constant 0 : index
    %9 = vector.load %arg8[%c0_6, %c0_7] : memref<2x512xf32, #tpu.memory_space<vmem>>, vector<2x512xf32>
    tpu.vector_store %arg8[%c0_6, %c0_7], %8 {strides = array<i32>} : memref<2x512xf32, #tpu.memory_space<vmem>>, vector<2x512xf32>,
    %10 = arith.truncf %8 : vector<2x512xf32> to vector<2x512xbf16>
    %c0_8 = arith.constant 0 : index
    %c0_9 = arith.constant 0 : index
    %11 = vector.load %arg3[%c0_8, %c0_9] : memref<512x256xbf16, #tpu.memory_space<vmem>>, vector<512x256xbf16>
    %cst_10 = arith.constant dense<0.000000e+00> : vector<2x256xf32>
    %12 = tpu.matmul %10, %11, %cst_10 {dimension_numbers = #tpu.dot_dimension_numbers<[1], [0], [0], [1], [0, 0, 1, 1], [], []>} : vector<2x512xbf16>, vector<512x256xbf16>, vector<2x256xf32> -> vector<2x256xf32>
    %c0_11 = arith.constant 0 : index
    %c0_12 = arith.constant 0 : index
    %13 = vector.load %arg6[%c0_11, %c0_12] : memref<1x256xf32, #tpu.memory_space<vmem>>, vector<1x256xf32>
    %14 = vector.broadcast %13 : vector<1x256xf32> to vector<2x256xf32>
    %15 = arith.addf %12, %14 : vector<2x256xf32>
    %cst_13 = arith.constant 0.000000e+00 : f32
    %16 = vector.broadcast %cst_13 : f32 to vector<2x256xf32>
    %17 = arith.maximumf %15, %16 : vector<2x256xf32>
    %c0_14 = arith.constant 0 : index
    %c0_15 = arith.constant 0 : index
    %18 = vector.load %arg9[%c0_14, %c0_15] : memref<2x256xf32, #tpu.memory_space<vmem>>, vector<2x256xf32>
    tpu.vector_store %arg9[%c0_14, %c0_15], %17 {strides = array<i32>} : memref<2x256xf32, #tpu.memory_space<vmem>>, vector<2x256xf32>,
    %19 = arith.truncf %17 : vector<2x256xf32> to vector<2x256xbf16>
    %c0_16 = arith.constant 0 : index
    %c0_17 = arith.constant 0 : index
    %20 = vector.load %arg4[%c0_16, %c0_17] : memref<256x128xbf16, #tpu.memory_space<vmem>>, vector<256x128xbf16>
    %cst_18 = arith.constant dense<0.000000e+00> : vector<2x128xf32>
    %21 = tpu.matmul %19, %20, %cst_18 {dimension_numbers = #tpu.dot_dimension_numbers<[1], [0], [0], [1], [0, 0, 1, 1], [], []>} : vector<2x256xbf16>, vector<256x128xbf16>, vector<2x128xf32> -> vector<2x128xf32>
    %c0_19 = arith.constant 0 : index
    %c0_20 = arith.constant 0 : index
    %22 = vector.load %arg7[%c0_19, %c0_20] : memref<1x128xf32, #tpu.memory_space<vmem>>, vector<1x128xf32>
    %23 = vector.broadcast %22 : vector<1x128xf32> to vector<2x128xf32>
    %24 = arith.addf %21, %23 : vector<2x128xf32>
    %cst_21 = arith.constant 0.000000e+00 : f32
    %25 = vector.broadcast %cst_21 : f32 to vector<2x128xf32>
    %26 = arith.maximumf %24, %25 : vector<2x128xf32>
    %c0_22 = arith.constant 0 : index
    %c0_23 = arith.constant 0 : index
    %27 = vector.load %arg10[%c0_22, %c0_23] : memref<2x128xf32, #tpu.memory_space<vmem>>, vector<2x128xf32>
    tpu.vector_store %arg10[%c0_22, %c0_23], %26 {strides = array<i32>} : memref<2x128xf32, #tpu.memory_space<vmem>>, vector<2x128xf32>,
    return
  }
  func.func @transform_0(%arg0: i32) -> (i32, i32) {
    %c0_i32 = arith.constant 0 : i32
    %c0_i32_0 = arith.constant 0 : i32
    return %arg0, %c0_i32 : i32, i32
  }
  func.func @transform_1(%arg0: i32) -> (i32, i32) {
    %c0_i32 = arith.constant 0 : i32
    %c0_i32_0 = arith.constant 0 : i32
    %c0_i32_1 = arith.constant 0 : i32
    return %c0_i32, %c0_i32_0 : i32, i32
  }
  func.func @transform_2(%arg0: i32) -> (i32, i32) {
    %c0_i32 = arith.constant 0 : i32
    %c0_i32_0 = arith.constant 0 : i32
    %c0_i32_1 = arith.constant 0 : i32
    return %c0_i32, %c0_i32_0 : i32, i32
  }
  func.func @transform_3(%arg0: i32) -> (i32, i32) {
    %c0_i32 = arith.constant 0 : i32
    %c0_i32_0 = arith.constant 0 : i32
    %c0_i32_1 = arith.constant 0 : i32
    return %c0_i32, %c0_i32_0 : i32, i32
  }
  func.func @transform_4(%arg0: i32) -> (i32, i32) {
    %c0_i32 = arith.constant 0 : i32
    %c0_i32_0 = arith.constant 0 : i32
    %c0_i32_1 = arith.constant 0 : i32
    return %c0_i32, %c0_i32_0 : i32, i32
  }
  func.func @transform_5(%arg0: i32) -> (i32, i32) {
    %c0_i32 = arith.constant 0 : i32
    %c0_i32_0 = arith.constant 0 : i32
    %c0_i32_1 = arith.constant 0 : i32
    return %c0_i32, %c0_i32_0 : i32, i32
  }
  func.func @transform_6(%arg0: i32) -> (i32, i32) {
    %c0_i32 = arith.constant 0 : i32
    %c0_i32_0 = arith.constant 0 : i32
    %c0_i32_1 = arith.constant 0 : i32
    return %c0_i32, %c0_i32_0 : i32, i32
  }
  func.func @transform_7(%arg0: i32) -> (i32, i32) {
    %c0_i32 = arith.constant 0 : i32
    %c0_i32_0 = arith.constant 0 : i32
    return %arg0, %c0_i32 : i32, i32
  }
  func.func @transform_8(%arg0: i32) -> (i32, i32) {
    %c0_i32 = arith.constant 0 : i32
    %c0_i32_0 = arith.constant 0 : i32
    return %arg0, %c0_i32 : i32, i32
  }
  func.func @transform_9(%arg0: i32) -> (i32, i32) {
    %c0_i32 = arith.constant 0 : i32
    %c0_i32_0 = arith.constant 0 : i32
    return %arg0, %c0_i32 : i32, i32
  }
}

module attributes {stable_mosaic.version = 11 : i64} {
  func.func @_fused_encoder_kernel(%arg0: i32, %arg1: memref<2x1024xf32, #tpu.memory_space<vmem>>, %arg2: memref<1024x512xbf16, #tpu.memory_space<vmem>>, %arg3: memref<512x256xbf16, #tpu.memory_space<vmem>>, %arg4: memref<256x128xbf16, #tpu.memory_space<vmem>>, %arg5: memref<1x512xf32, #tpu.memory_space<vmem>>, %arg6: memref<1x256xf32, #tpu.memory_space<vmem>>, %arg7: memref<1x128xf32, #tpu.memory_space<vmem>>, %arg8: memref<2x512xf32, #tpu.memory_space<vmem>>, %arg9: memref<2x256xf32, #tpu.memory_space<vmem>>, %arg10: memref<2x128xf32, #tpu.memory_space<vmem>>) attributes {dimension_semantics = [#tpu.dimension_semantics<arbitrary>], iteration_bounds = array<i64: 1>, scalar_prefetch = 0 : i64, scratch_operands = 0 : i64, tpu.core_type = #tpu.core_type<tc>, window_params = [{transform_indices = @transform_0, window_bounds = array<i64: 2, 1024>}, {pipeline_mode = #tpu.pipeline_mode<synchronous>, transform_indices = @transform_1, window_bounds = array<i64: 1024, 512>}, {pipeline_mode = #tpu.pipeline_mode<synchronous>, transform_indices = @transform_2, window_bounds = array<i64: 512, 256>}, {pipeline_mode = #tpu.pipeline_mode<synchronous>, transform_indices = @transform_3, window_bounds = array<i64: 256, 128>}, {pipeline_mode = #tpu.pipeline_mode<synchronous>, transform_indices = @transform_4, window_bounds = array<i64: 1, 512>}, {pipeline_mode = #tpu.pipeline_mode<synchronous>, transform_indices = @transform_5, window_bounds = array<i64: 1, 256>}, {pipeline_mode = #tpu.pipeline_mode<synchronous>, transform_indices = @transform_6, window_bounds = array<i64: 1, 128>}, {transform_indices = @transform_7, window_bounds = array<i64: 2, 512>}, {transform_indices = @transform_8, window_bounds = array<i64: 2, 256>}, {transform_indices = @transform_9, window_bounds = array<i64: 2, 128>}]} {
    %c0 = arith.constant 0 : index
    %c0_0 = arith.constant 0 : index
    %0 = vector.load %arg1[%c0, %c0_0] : memref<2x1024xf32, #tpu.memory_space<vmem>>, vector<2x1024xf32>
    %1 = arith.truncf %0 : vector<2x1024xf32> to vector<2x1024xbf16>
    %c0_1 = arith.constant 0 : index
    %c0_2 = arith.constant 0 : index
    %2 = vector.load %arg2[%c0_1, %c0_2] : memref<1024x512xbf16, #tpu.memory_space<vmem>>, vector<1024x512xbf16>
    %cst = arith.constant dense<0.000000e+00> : vector<2x512xf32>
    %3 = tpu.matmul %1, %2, %cst {dimension_numbers = #tpu.dot_dimension_numbers<[1], [0], [0], [1], [0, 0, 1, 1], [], []>} : vector<2x1024xbf16>, vector<1024x512xbf16>, vector<2x512xf32> -> vector<2x512xf32>
    %c0_3 = arith.constant 0 : index
    %c0_4 = arith.constant 0 : index
    %4 = vector.load %arg5[%c0_3, %c0_4] : memref<1x512xf32, #tpu.memory_space<vmem>>, vector<1x512xf32>
    %5 = vector.broadcast %4 : vector<1x512xf32> to vector<2x512xf32>
    %6 = arith.addf %3, %5 : vector<2x512xf32>
    %cst_5 = arith.constant 0.000000e+00 : f32
    %7 = vector.broadcast %cst_5 : f32 to vector<2x512xf32>
    %8 = arith.maximumf %6, %7 : vector<2x512xf32>
    %c0_6 = arith.constant 0 : index
    %c0_7 = arith.constant 0 : index
    %9 = vector.load %arg8[%c0_6, %c0_7] : memref<2x512xf32, #tpu.memory_space<vmem>>, vector<2x512xf32>
    tpu.vector_store %arg8[%c0_6, %c0_7], %8 {strides = array<i32>} : memref<2x512xf32, #tpu.memory_space<vmem>>, vector<2x512xf32>,
    %10 = arith.truncf %8 : vector<2x512xf32> to vector<2x512xbf16>
    %c0_8 = arith.constant 0 : index
    %c0_9 = arith.constant 0 : index
    %11 = vector.load %arg3[%c0_8, %c0_9] : memref<512x256xbf16, #tpu.memory_space<vmem>>, vector<512x256xbf16>
    %cst_10 = arith.constant dense<0.000000e+00> : vector<2x256xf32>
    %12 = tpu.matmul %10, %11, %cst_10 {dimension_numbers = #tpu.dot_dimension_numbers<[1], [0], [0], [1], [0, 0, 1, 1], [], []>} : vector<2x512xbf16>, vector<512x256xbf16>, vector<2x256xf32> -> vector<2x256xf32>
    %c0_11 = arith.constant 0 : index
    %c0_12 = arith.constant 0 : index
    %13 = vector.load %arg6[%c0_11, %c0_12] : memref<1x256xf32, #tpu.memory_space<vmem>>, vector<1x256xf32>
    %14 = vector.broadcast %13 : vector<1x256xf32> to vector<2x256xf32>
    %15 = arith.addf %12, %14 : vector<2x256xf32>
    %cst_13 = arith.constant 0.000000e+00 : f32
    %16 = vector.broadcast %cst_13 : f32 to vector<2x256xf32>
    %17 = arith.maximumf %15, %16 : vector<2x256xf32>
    %c0_14 = arith.constant 0 : index
    %c0_15 = arith.constant 0 : index
    %18 = vector.load %arg9[%c0_14, %c0_15] : memref<2x256xf32, #tpu.memory_space<vmem>>, vector<2x256xf32>
    tpu.vector_store %arg9[%c0_14, %c0_15], %17 {strides = array<i32>} : memref<2x256xf32, #tpu.memory_space<vmem>>, vector<2x256xf32>,
    %19 = arith.truncf %17 : vector<2x256xf32> to vector<2x256xbf16>
    %c0_16 = arith.constant 0 : index
    %c0_17 = arith.constant 0 : index
    %20 = vector.load %arg4[%c0_16, %c0_17] : memref<256x128xbf16, #tpu.memory_space<vmem>>, vector<256x128xbf16>
    %cst_18 = arith.constant dense<0.000000e+00> : vector<2x128xf32>
    %21 = tpu.matmul %19, %20, %cst_18 {dimension_numbers = #tpu.dot_dimension_numbers<[1], [0], [0], [1], [0, 0, 1, 1], [], []>} : vector<2x256xbf16>, vector<256x128xbf16>, vector<2x128xf32> -> vector<2x128xf32>
    %c0_19 = arith.constant 0 : index
    %c0_20 = arith.constant 0 : index
    %22 = vector.load %arg7[%c0_19, %c0_20] : memref<1x128xf32, #tpu.memory_space<vmem>>, vector<1x128xf32>
    %23 = vector.broadcast %22 : vector<1x128xf32> to vector<2x128xf32>
    %24 = arith.addf %21, %23 : vector<2x128xf32>
    %cst_21 = arith.constant 0.000000e+00 : f32
    %25 = vector.broadcast %cst_21 : f32 to vector<2x128xf32>
    %26 = arith.maximumf %24, %25 : vector<2x128xf32>
    %c0_22 = arith.constant 0 : index
    %c0_23 = arith.constant 0 : index
    %27 = vector.load %arg10[%c0_22, %c0_23] : memref<2x128xf32, #tpu.memory_space<vmem>>, vector<2x128xf32>
    tpu.vector_store %arg10[%c0_22, %c0_23], %26 {strides = array<i32>} : memref<2x128xf32, #tpu.memory_space<vmem>>, vector<2x128xf32>,
    return
  }
  func.func @transform_0(%arg0: i32) -> (i32, i32) {
    %c0_i32 = arith.constant 0 : i32
    %c0_i32_0 = arith.constant 0 : i32
    return %arg0, %c0_i32 : i32, i32
  }
  func.func @transform_1(%arg0: i32) -> (i32, i32) {
    %c0_i32 = arith.constant 0 : i32
    %c0_i32_0 = arith.constant 0 : i32
    %c0_i32_1 = arith.constant 0 : i32
    return %c0_i32, %c0_i32_0 : i32, i32
  }
  func.func @transform_2(%arg0: i32) -> (i32, i32) {
    %c0_i32 = arith.constant 0 : i32
    %c0_i32_0 = arith.constant 0 : i32
    %c0_i32_1 = arith.constant 0 : i32
    return %c0_i32, %c0_i32_0 : i32, i32
  }
  func.func @transform_3(%arg0: i32) -> (i32, i32) {
    %c0_i32 = arith.constant 0 : i32
    %c0_i32_0 = arith.constant 0 : i32
    %c0_i32_1 = arith.constant 0 : i32
    return %c0_i32, %c0_i32_0 : i32, i32
  }
  func.func @transform_4(%arg0: i32) -> (i32, i32) {
    %c0_i32 = arith.constant 0 : i32
    %c0_i32_0 = arith.constant 0 : i32
    %c0_i32_1 = arith.constant 0 : i32
    return %c0_i32, %c0_i32_0 : i32, i32
  }
  func.func @transform_5(%arg0: i32) -> (i32, i32) {
    %c0_i32 = arith.constant 0 : i32
    %c0_i32_0 = arith.constant 0 : i32
    %c0_i32_1 = arith.constant 0 : i32
    return %c0_i32, %c0_i32_0 : i32, i32
  }
  func.func @transform_6(%arg0: i32) -> (i32, i32) {
    %c0_i32 = arith.constant 0 : i32
    %c0_i32_0 = arith.constant 0 : i32
    %c0_i32_1 = arith.constant 0 : i32
    return %c0_i32, %c0_i32_0 : i32, i32
  }
  func.func @transform_7(%arg0: i32) -> (i32, i32) {
    %c0_i32 = arith.constant 0 : i32
    %c0_i32_0 = arith.constant 0 : i32
    return %arg0, %c0_i32 : i32, i32
  }
  func.func @transform_8(%arg0: i32) -> (i32, i32) {
    %c0_i32 = arith.constant 0 : i32
    %c0_i32_0 = arith.constant 0 : i32
    return %arg0, %c0_i32 : i32, i32
  }
  func.func @transform_9(%arg0: i32) -> (i32, i32) {
    %c0_i32 = arith.constant 0 : i32
    %c0_i32_0 = arith.constant 0 : i32
    return %arg0, %c0_i32 : i32, i32
  }
}

</mosaic_0001>

<bundles_post_ra>
// kernel: tpu_custom_call.1
= control target key start
LH: loop header
LB: loop body
LE: loop exit
PB: predicated region body
PF: predicated region fallthrough
CT: control target
= control target key end

     0   :  { %15 = vsyncpa [#allocation3], 0  ;;  %s3985_s0 = inlined_call_operand.hbm [shape: f32[2,1024], index: 0, kind: input, shape index: {}]   ;;  %s3986_s1 = inlined_call_operand.hbm [shape: bf16[1024,512], index: 1, kind: input, shape index: {}]   ;;  %s3987_s2 = inlined_call_operand.hbm [shape: bf16[512,256], index: 2, kind: input, shape index: {}]   ;;  %s3988_s3 = inlined_call_operand.hbm [shape: bf16[256,128], index: 3, kind: input, shape index: {}]   ;;  %s3989_s4 = inlined_call_operand.vmem [shape: f32[1,512], index: 4, kind: input, shape index: {}]   ;;  %s3990_s5 = inlined_call_operand.vmem [shape: f32[1,256], index: 5, kind: input, shape index: {}]   ;;  %s3991_s6 = inlined_call_operand.vmem [shape: f32[1,128], index: 6, kind: input, shape index: {}]   ;;  %s3992_s7 = inlined_call_operand.hbm [shape: f32[2,512], index: 7, kind: output, shape index: {0}]   ;;  %s3993_s8 = inlined_call_operand.hbm [shape: f32[2,256], index: 8, kind: output, shape index: {1}]   ;;  %s3994_s9 = inlined_call_operand.hbm [shape: f32[2,128], index: 9, kind: output, shape index: {2}]  }
   0x1   :  { %16 = vsyncpa [#allocation6], 0 }
   0x2   :  { %17 = vsyncpa [#allocation9], 0 }
   0x3   :  { %18 = vsyncpa [#allocation4], 0 }
   0x4   :  { %19 = vsyncpa [#allocation12], 0  ;;  %s3793_s30 = smov [#allocation5]  }
   0x5   :  { %s35_s10 = sshll.u32 %s3793_s30, 4  ;;  %s36_s10 = int_to_ptr.vmem [resolvable:$true] %s35_s10 }
   0x6   :  { %s3651_s11 = scalar_lea.vmem %s36_s10, 32768  ;;  %p3656_p1 = scmp.lt.s32.totalorder %s36_s10, %s36_s10 }
   0x7   :  { %p3652_p0 = scmp.ne.s32.totalorder %s36_s10, %s3651_s11  ;;  %p3657_p2 = scmp.lt.s32.totalorder %s3651_s11, %s3651_s11 }
   0x9   :  { %p3658_p3 = por %p3657_p2, %p3656_p1 }
   0xb   :  { %p3659_p4 = pnand %p3658_p3, %p3652_p0 }
   0xd   :  { %3662 = shalt.err (!%p3659_p4)
}
   0xe   :  { %s3794_s12 = smov 256   ;;  %s3795_s13 = smov 16  }
   0xf   :  { %41 = dma.hbm_to_vmem [thread:$0]  %s3986_s1, 32768, %s36_s10, [#allocation6], %s3794_s12, %s3794_s12, %s3795_s13  }
  0x10   :  { %s3796_s16 = smov [#allocation2]   ;;  %s3797_s18 = smov [#allocation7]  }
  0x11   :  { %s26_s17 = sshll.u32 %s3796_s16, 4  ;;  %s47_s19 = sshll.u32 %s3797_s18, 4  ;;  %s27_s17 = int_to_ptr.vmem [resolvable:$true] %s26_s17  ;;  %s48_s19 = int_to_ptr.vmem [resolvable:$true] %s47_s19 }
  0x12   :  { %s3671_s20 = scalar_lea.vmem %s27_s17, 256  ;;  %p3676_p6 = scmp.lt.s32.totalorder %s27_s17, %s27_s17 }
  0x13   :  { %p3672_p5 = scmp.ne.s32.totalorder %s27_s17, %s3671_s20  ;;  %p3677_p7 = scmp.lt.s32.totalorder %s3671_s20, %s3671_s20 }
  0x15   :  { %p3678_p8 = por %p3677_p7, %p3676_p6 }
  0x17   :  { %p3679_p9 = pnand %p3678_p8, %p3672_p5 }
  0x19   :  { %3682 = shalt.err (!%p3679_p9)
}
  0x1a   :  { %29 = dma.hbm_to_vmem [thread:$0]  %s3985_s0, 256, %s27_s17, [#allocation3]  }
  0x1b   :  { %s3691_s23 = scalar_lea.vmem %s48_s19, 8192  ;;  %p3696_p11 = scmp.lt.s32.totalorder %s48_s19, %s48_s19 }
  0x1c   :  { %p3692_p10 = scmp.ne.s32.totalorder %s48_s19, %s3691_s23  ;;  %p3697_p12 = scmp.lt.s32.totalorder %s3691_s23, %s3691_s23 }
  0x1e   :  { %p3698_p13 = por %p3697_p12, %p3696_p11 }
  0x20   :  { %p3699_p0 = pnand %p3698_p13, %p3692_p10 }
  0x22   :  { %3702 = shalt.err (!%p3699_p0)
}
  0x23   :  { %s3798_s1 = smov 128   ;;  %s3799_s24 = smov 8  }
  0x24   :  { %53 = dma.hbm_to_vmem [thread:$0]  %s3987_s2, 8192, %s48_s19, [#allocation6], %s3798_s1, %s3798_s1, %s3799_s24  }
  0x25   :  { %s3800_s27 = smov [#allocation8]  }
  0x26   :  { %s59_s28 = sshll.u32 %s3800_s27, 4  ;;  %s60_s28 = int_to_ptr.vmem [resolvable:$true] %s59_s28 }
  0x27   :  { %s3711_s29 = scalar_lea.vmem %s60_s28, 2048  ;;  %p3716_p2 = scmp.lt.s32.totalorder %s60_s28, %s60_s28 }
  0x28   :  { %p3712_p1 = scmp.ne.s32.totalorder %s60_s28, %s3711_s29  ;;  %p3717_p3 = scmp.lt.s32.totalorder %s3711_s29, %s3711_s29 }
  0x2a   :  { %p3718_p4 = por %p3717_p3, %p3716_p2 }
  0x2c   :  { %p3719_p5 = pnand %p3718_p4, %p3712_p1 }
  0x2e   :  { %3722 = shalt.err (!%p3719_p5)
}
  0x2f   :  { %s3801_s0 = smov 64   ;;  %s3802_s30 = smov 4  }
  0x30   :  { %65 = dma.hbm_to_vmem [thread:$0]  %s3988_s3, 2048, %s60_s28, [#allocation9], %s3801_s0, %s3801_s0, %s3802_s30  }
  0x31   :  { %3783 = dma.done.wait [#allocation3], 256  }
  0x32   :  { %3784 = vsyncadd [#allocation3], 4294967040 }
  0x33   :  { %3785 = dma.done.wait [#allocation6], 40960  }
  0x34   :  { %3786 = vsyncadd [#allocation6], 4294926336 }
  0x35   :  { %3787 = dma.done.wait [#allocation9], 2048  }
  0x36   :  { %3788 = vsyncadd [#allocation9], 4294965248  ;;  %v3145_v0 = vld [vmem:[#allocation5 + $0xe4] ss:$16 sps:$4 sm:$0xff]   ;;  %v3149_v2 = vld [vmem:[#allocation5 + $0xe0] ss:$16 sps:$4 sm:$0xff]   ;;  %v93_v38 = vlaneseq }
  0x37   :  { %v3147_v1 = vld [vmem:[#allocation5 + $0x2e4] ss:$16 sps:$4 sm:$0xff]   ;;  %1697 = vmatprep.subr.bf16.mxu0 %v3145_v0  ;;  %v3150_v3 = vld [vmem:[#allocation5 + $0x2e0] ss:$16 sps:$4 sm:$0xff]   ;;  %v3803_v36 = vmov 1983009808  }
  0x38   :  { %1738 = vmatprep.subr.bf16.mxu1 %v3147_v1  ;;  %v3151_v4 = vld [vmem:[#allocation5 + $0xc4] ss:$16 sps:$4 sm:$0xff]   ;;  %1698 = vmatpush1.bf16.msra.mxu0 %v3149_v2  ;;  %v3155_v6 = vld [vmem:[#allocation5 + $0xc0] ss:$16 sps:$4 sm:$0xff]   ;;  %v91_v37 = vunpack.c.l.s4 %v3803_v36  ;;  %v3869_v43 = vshrl.u32 %v93_v38, 7  ;;  %s3805_s14 = smov [#allocation10]  }
  0x39   :  { %1739 = vmatpush1.bf16.msra.mxu1 %v3150_v3  ;;  %v3153_v5 = vld [vmem:[#allocation5 + $0x2c4] ss:$16 sps:$4 sm:$0xff]   ;;  %1699 = vmatprep.subr.bf16.mxu0 %v3151_v4  ;;  %v3156_v7 = vld [vmem:[#allocation5 + $0x2c0] ss:$16 sps:$4 sm:$0xff]   ;;  %s2733_s15 = sshll.u32 %s3805_s14, 4  ;;  %s2734_s15 = int_to_ptr.vmem [resolvable:$true] %s2733_s15 }
  0x3a   :  { %1740 = vmatprep.subr.bf16.mxu1 %v3153_v5  ;;  %v3157_v8 = vld [vmem:[#allocation5 + $0xa4] ss:$16 sps:$4 sm:$0xff]   ;;  %v3161_v10 = vld [vmem:[#allocation5 + $0xa0] ss:$16 sps:$4 sm:$0xff]   ;;  %v92_v42 = vunpack.c.0.s8 %v91_v37 }
  0x3b   :  { %v3159_v9 = vld [vmem:[#allocation5 + $0x2a4] ss:$16 sps:$4 sm:$0xff]   ;;  %v3162_v11 = vld [vmem:[#allocation5 + $0x2a0] ss:$16 sps:$4 sm:$0xff]  }
  0x3c   :  { %1700 = vmatpush1.bf16.msra.mxu0 %v3155_v6  ;;  %v3163_v12 = vld [vmem:[#allocation5 + $0x84] ss:$16 sps:$4 sm:$0xff]   ;;  %v3167_v14 = vld [vmem:[#allocation5 + $0x80] ss:$16 sps:$4 sm:$0xff]   ;;  %v3872_v49 = vsub.s32 %v92_v42, %v3869_v43  ;;  %v86_v42 = vld [vmem:[#allocation2 + $0x8] sm:$0xff] }
  0x3d   :  { %1741 = vmatpush1.bf16.msra.mxu1 %v3156_v7  ;;  %1701 = vmatprep.subr.bf16.mxu0 %v3157_v8  ;;  %v3165_v13 = vld [vmem:[#allocation5 + $0x284] ss:$16 sps:$4 sm:$0xff]   ;;  %v3168_v15 = vld [vmem:[#allocation5 + $0x280] ss:$16 sps:$4 sm:$0xff]  }
  0x3e   :  { %1742 = vmatprep.subr.bf16.mxu1 %v3159_v9  ;;  %v3169_v16 = vld [vmem:[#allocation5 + $0x64] ss:$16 sps:$4 sm:$0xff]   ;;  %v3173_v18 = vld [vmem:[#allocation5 + $0x60] ss:$16 sps:$4 sm:$0xff]  }
  0x3f   :  { %v3171_v17 = vld [vmem:[#allocation5 + $0x264] ss:$16 sps:$4 sm:$0xff]   ;;  %v3174_v19 = vld [vmem:[#allocation5 + $0x260] ss:$16 sps:$4 sm:$0xff]  }
  0x40   :  { %1702 = vmatpush1.bf16.msra.mxu0 %v3161_v10  ;;  %v3175_v20 = vld [vmem:[#allocation5 + $0x44] ss:$16 sps:$4 sm:$0xff]   ;;  %v3179_v22 = vld [vmem:[#allocation5 + $0x40] ss:$16 sps:$4 sm:$0xff]  }
  0x41   :  { %1743 = vmatpush1.bf16.msra.mxu1 %v3162_v11  ;;  %1703 = vmatprep.subr.bf16.mxu0 %v3163_v12  ;;  %v3177_v21 = vld [vmem:[#allocation5 + $0x244] ss:$16 sps:$4 sm:$0xff]   ;;  %v3180_v23 = vld [vmem:[#allocation5 + $0x240] ss:$16 sps:$4 sm:$0xff]  }
  0x42   :  { %1744 = vmatprep.subr.bf16.mxu1 %v3165_v13  ;;  %v3181_v24 = vld [vmem:[#allocation5 + $0x24] ss:$16 sps:$4 sm:$0xff]   ;;  %v3185_v26 = vld [vmem:[#allocation5 + $0x20] ss:$16 sps:$4 sm:$0xff]  }
  0x43   :  { %v3183_v25 = vld [vmem:[#allocation5 + $0x224] ss:$16 sps:$4 sm:$0xff]   ;;  %v3186_v27 = vld [vmem:[#allocation5 + $0x220] ss:$16 sps:$4 sm:$0xff]  }
  0x44   :  { %1704 = vmatpush1.bf16.msra.mxu0 %v3167_v14  ;;  %v3187_v28 = vld [vmem:[#allocation5 + $0x4] ss:$16 sps:$4 sm:$0xff]   ;;  %v3191_v30 = vld [vmem:[#allocation5] ss:$16 sps:$4 sm:$0xff]  }
  0x45   :  { %1745 = vmatpush1.bf16.msra.mxu1 %v3168_v15  ;;  %1705 = vmatprep.subr.bf16.mxu0 %v3169_v16  ;;  %v3189_v29 = vld [vmem:[#allocation5 + $0x204] ss:$16 sps:$4 sm:$0xff]   ;;  %v3192_v31 = vld [vmem:[#allocation5 + $0x200] ss:$16 sps:$4 sm:$0xff]  }
  0x46   :  { %1746 = vmatprep.subr.bf16.mxu1 %v3171_v17  ;;  %v3193_v32 = vld [vmem:[#allocation5 + $0x1e4] ss:$16 sps:$4 sm:$0xff]   ;;  %v3197_v34 = vld [vmem:[#allocation5 + $0x1e0] ss:$16 sps:$4 sm:$0xff]  }
  0x47   :  { %v3195_v33 = vld [vmem:[#allocation5 + $0x3e4] ss:$16 sps:$4 sm:$0xff]   ;;  %v3198_v35 = vld [vmem:[#allocation5 + $0x3e0] ss:$16 sps:$4 sm:$0xff]  }
  0x48   :  { %1706 = vmatpush1.bf16.msra.mxu0 %v3173_v18  ;;  %v3199_v39 = vld [vmem:[#allocation5 + $0x1c4] ss:$16 sps:$4 sm:$0xff]   ;;  %v3203_v41 = vld [vmem:[#allocation5 + $0x1c0] ss:$16 sps:$4 sm:$0xff]  }
  0x49   :  { %1747 = vmatpush1.bf16.msra.mxu1 %v3174_v19  ;;  %1707 = vmatprep.subr.bf16.mxu0 %v3175_v20  ;;  %v3201_v40 = vld [vmem:[#allocation5 + $0x3c4] ss:$16 sps:$4 sm:$0xff]   ;;  %v3204_v44 = vld [vmem:[#allocation5 + $0x3c0] ss:$16 sps:$4 sm:$0xff]  }
  0x4a   :  { %1748 = vmatprep.subr.bf16.mxu1 %v3177_v21  ;;  %v3205_v45 = vld [vmem:[#allocation5 + $0x1a4] ss:$16 sps:$4 sm:$0xff]   ;;  %v3209_v47 = vld [vmem:[#allocation5 + $0x1a0] ss:$16 sps:$4 sm:$0xff]  }
  0x4b   :  { %v3207_v46 = vld [vmem:[#allocation5 + $0x3a4] ss:$16 sps:$4 sm:$0xff]   ;;  %v3210_v48 = vld [vmem:[#allocation5 + $0x3a0] ss:$16 sps:$4 sm:$0xff]  }
  0x4c   :  { %1708 = vmatpush1.bf16.msra.mxu0 %v3179_v22  ;;  %v3211_v50 = vld [vmem:[#allocation5 + $0x184] ss:$16 sps:$4 sm:$0xff]   ;;  %v3215_v53 = vld [vmem:[#allocation5 + $0x180] ss:$16 sps:$4 sm:$0xff]  }
  0x4d   :  { %1749 = vmatpush1.bf16.msra.mxu1 %v3180_v23  ;;  %1709 = vmatprep.subr.bf16.mxu0 %v3181_v24  ;;  %v3213_v51 = vld [vmem:[#allocation5 + $0x384] ss:$16 sps:$4 sm:$0xff]   ;;  %v3216_v56 = vld [vmem:[#allocation5 + $0x380] ss:$16 sps:$4 sm:$0xff]  }
  0x4e   :  { %1750 = vmatprep.subr.bf16.mxu1 %v3183_v25  ;;  %v85_v52 = vld [vmem:[#allocation2] sm:$0xff] }
  0x4f   :  { %v96_v54 = vrot.slane %v85_v52, %v3872_v49  ;;  %v89_v55 = vcombine.high %v85_v52, %v85_v52  ;;  %v3217_v57 = vld [vmem:[#allocation5 + $0x164] ss:$16 sps:$4 sm:$0xff]   ;;  %v3221_v61 = vld [vmem:[#allocation5 + $0x160] ss:$16 sps:$4 sm:$0xff]  }
  0x50   :  { %1710 = vmatpush1.bf16.msra.mxu0 %v3185_v26  ;;  %v3219_v58 = vld [vmem:[#allocation5 + $0x364] ss:$16 sps:$4 sm:$0xff]   ;;  %v3222_v0 = vld [vmem:[#allocation5 + $0x360] ss:$16 sps:$4 sm:$0xff]  }
  0x51   :  { %1751 = vmatpush1.bf16.msra.mxu1 %v3186_v27  ;;  %1711 = vmatprep.subr.bf16.mxu0 %v3187_v28  ;;  %v104_v59 = vcombine.high %v96_v54, %v96_v54  ;;  %v103_v60 = vrot.slane %v89_v55, %v3872_v49  ;;  %v3223_v1 = vld [vmem:[#allocation5 + $0x144] ss:$16 sps:$4 sm:$0xff]   ;;  %v3227_v4 = vld [vmem:[#allocation5 + $0x140] ss:$16 sps:$4 sm:$0xff]   ;;  %v3882_v16 = vpack.c.bf16 %v96_v54, %v96_v54 }
  0x52   :  { %1752 = vmatprep.subr.bf16.mxu1 %v3189_v29  ;;  %v3225_v2 = vld [vmem:[#allocation5 + $0x344] ss:$16 sps:$4 sm:$0xff]   ;;  %v3228_v5 = vld [vmem:[#allocation5 + $0x340] ss:$16 sps:$4 sm:$0xff]  }
  0x53   :  { %v3876_v62 = vpack.c.bf16 %v104_v59, %v104_v59  ;;  %v105_v63 = vcombine.high %v103_v60, %v103_v60  ;;  %v3229_v6 = vld [vmem:[#allocation5 + $0x124] ss:$16 sps:$4 sm:$0xff]   ;;  %v3233_v8 = vld [vmem:[#allocation5 + $0x120] ss:$16 sps:$4 sm:$0xff]   ;;  %v3884_v17 = vpack.c.bf16 %v103_v60, %v103_v60 }
  0x54   :  { %1712 = vmatpush1.bf16.msra.mxu0 %v3191_v30  ;;  %v3231_v7 = vld [vmem:[#allocation5 + $0x324] ss:$16 sps:$4 sm:$0xff]   ;;  %v3234_v9 = vld [vmem:[#allocation5 + $0x320] ss:$16 sps:$4 sm:$0xff]  }
  0x55   :  { %1753 = vmatpush1.bf16.msra.mxu1 %v3192_v31  ;;  %1713 = vmatprep.subr.bf16.mxu0 %v3193_v32  ;;  %v3878_v3 = vpack.c.bf16 %v105_v63, %v105_v63  ;;  %v3235_v10 = vld [vmem:[#allocation5 + $0x104] ss:$16 sps:$4 sm:$0xff]   ;;  %v3239_v12 = vld [vmem:[#allocation5 + $0x100] ss:$16 sps:$4 sm:$0xff]  }
  0x56   :  { %1754 = vmatprep.subr.bf16.mxu1 %v3195_v33  ;;  %1729 = vmatprep.mubr.bf16.mxu0 %v3876_v62  ;;  %v3237_v11 = vld [vmem:[#allocation5 + $0x304] ss:$16 sps:$4 sm:$0xff]   ;;  %v3240_v13 = vld [vmem:[#allocation5 + $0x300] ss:$16 sps:$4 sm:$0xff]  }
  0x57   :  { %1770 = vmatprep.mubr.bf16.mxu1 %v3878_v3  ;;  %v3244_v14 = vld [vmem:[#allocation5 + $0x4e4] ss:$16 sps:$4 sm:$0xff]   ;;  %v3242_v18 = vld [vmem:[#allocation5 + $0x4e0] ss:$16 sps:$4 sm:$0xff]  }
  0x58   :  { %1714 = vmatpush2.bf16.msra.mxu0 %v3197_v34  ;;  %v3247_v15 = vld [vmem:[#allocation5 + $0x6e4] ss:$16 sps:$4 sm:$0xff]   ;;  %v3245_v19 = vld [vmem:[#allocation5 + $0x6e0] ss:$16 sps:$4 sm:$0xff]  }
  0x59   :  { %1755 = vmatpush2.bf16.msra.mxu1 %v3198_v35  ;;  %1715 = vmatprep.subr.bf16.mxu0 %v3199_v39  ;;  %v3250_v20 = vld [vmem:[#allocation5 + $0x4c4] ss:$16 sps:$4 sm:$0xff]   ;;  %v3248_v22 = vld [vmem:[#allocation5 + $0x4c0] ss:$16 sps:$4 sm:$0xff]  }
  0x5a   :  { %1756 = vmatprep.subr.bf16.mxu1 %v3201_v40  ;;  %v3253_v21 = vld [vmem:[#allocation5 + $0x6c4] ss:$16 sps:$4 sm:$0xff]   ;;  %v3251_v23 = vld [vmem:[#allocation5 + $0x6c0] ss:$16 sps:$4 sm:$0xff]  }
  0x5b   :  { %v3256_v24 = vld [vmem:[#allocation5 + $0x4a4] ss:$16 sps:$4 sm:$0xff]   ;;  %v3254_v26 = vld [vmem:[#allocation5 + $0x4a0] ss:$16 sps:$4 sm:$0xff]  }
  0x5c   :  { %1716 = vmatpush2.bf16.msra.mxu0 %v3203_v41  ;;  %v3259_v25 = vld [vmem:[#allocation5 + $0x6a4] ss:$16 sps:$4 sm:$0xff]   ;;  %v3257_v27 = vld [vmem:[#allocation5 + $0x6a0] ss:$16 sps:$4 sm:$0xff]  }
  0x5d   :  { %1757 = vmatpush2.bf16.msra.mxu1 %v3204_v44  ;;  %1717 = vmatprep.subr.bf16.mxu0 %v3205_v45  ;;  %v3262_v28 = vld [vmem:[#allocation5 + $0x484] ss:$16 sps:$4 sm:$0xff]   ;;  %v3260_v30 = vld [vmem:[#allocation5 + $0x480] ss:$16 sps:$4 sm:$0xff]   ;;  %v3889_v44 = vrot.slane %v86_v42, %v3872_v49  ;;  %v106_v45 = vcombine.high %v86_v42, %v86_v42  ;;  %v3351_v42 = vld [vmem:[#allocation5 + $0xa8] ss:$16 sps:$4 sm:$0xff]  }
  0x5e   :  { %1758 = vmatprep.subr.bf16.mxu1 %v3207_v46  ;;  %v3265_v29 = vld [vmem:[#allocation5 + $0x684] ss:$16 sps:$4 sm:$0xff]   ;;  %v3263_v31 = vld [vmem:[#allocation5 + $0x680] ss:$16 sps:$4 sm:$0xff]  }
  0x5f   :  { %v3268_v32 = vld [vmem:[#allocation5 + $0x464] ss:$16 sps:$4 sm:$0xff]   ;;  %v3266_v34 = vld [vmem:[#allocation5 + $0x460] ss:$16 sps:$4 sm:$0xff]  }
  0x60   :  { %1718 = vmatpush2.bf16.msra.mxu0 %v3209_v47  ;;  %v3271_v33 = vld [vmem:[#allocation5 + $0x664] ss:$16 sps:$4 sm:$0xff]   ;;  %v3269_v35 = vld [vmem:[#allocation5 + $0x660] ss:$16 sps:$4 sm:$0xff]  }
  0x61   :  { %1759 = vmatpush2.bf16.msra.mxu1 %v3210_v48  ;;  %1719 = vmatprep.subr.bf16.mxu0 %v3211_v50  ;;  %v3274_v36 = vld [vmem:[#allocation5 + $0x444] ss:$16 sps:$4 sm:$0xff]   ;;  %v3272_v38 = vld [vmem:[#allocation5 + $0x440] ss:$16 sps:$4 sm:$0xff]   ;;  %v121_v48 = vcombine.high %v3889_v44, %v3889_v44  ;;  %v3894_v50 = vrot.slane %v106_v45, %v3872_v49  ;;  %v3359_v45 = vld [vmem:[#allocation5 + $0x8c] ss:$16 sps:$4 sm:$0xff]  }
  0x62   :  { %1760 = vmatprep.subr.bf16.mxu1 %v3213_v51  ;;  %v3277_v37 = vld [vmem:[#allocation5 + $0x644] ss:$16 sps:$4 sm:$0xff]   ;;  %v3275_v39 = vld [vmem:[#allocation5 + $0x640] ss:$16 sps:$4 sm:$0xff]  }
  0x63   :  { %v3280_v40 = vld [vmem:[#allocation5 + $0x424] ss:$16 sps:$4 sm:$0xff]   ;;  %v3278_v46 = vld [vmem:[#allocation5 + $0x420] ss:$16 sps:$4 sm:$0xff]   ;;  %v122_v54 = vcombine.high %v3894_v50, %v3894_v50 }
  0x64   :  { %1720 = vmatpush2.bf16.msra.mxu0 %v3215_v53  ;;  %v3283_v41 = vld [vmem:[#allocation5 + $0x624] ss:$16 sps:$4 sm:$0xff]   ;;  %v3281_v47 = vld [vmem:[#allocation5 + $0x620] ss:$16 sps:$4 sm:$0xff]   ;;  %v3896_v53 = vpack.c.bf16 %v121_v48, %v121_v48  ;;  %v3360_v48 = vld [vmem:[#allocation5 + $0x288] ss:$16 sps:$4 sm:$0xff]  }
  0x65   :  { %1761 = vmatpush2.bf16.msra.mxu1 %v3216_v56  ;;  %1721 = vmatprep.subr.bf16.mxu0 %v3217_v57  ;;  %v3286_v51 = vld [vmem:[#allocation5 + $0x404] ss:$16 sps:$4 sm:$0xff]   ;;  %v3284_v55 = vld [vmem:[#allocation5 + $0x400] ss:$16 sps:$4 sm:$0xff]   ;;  %v3900_v57 = vpack.c.bf16 %v122_v54, %v122_v54  ;;  %v3374_v54 = vld [vmem:[#allocation5 + $0x24c] ss:$16 sps:$4 sm:$0xff]  }
  0x66   :  { %1762 = vmatprep.subr.bf16.mxu1 %v3219_v58  ;;  %v3289_v52 = vld [vmem:[#allocation5 + $0x604] ss:$16 sps:$4 sm:$0xff]   ;;  %v3287_v56 = vld [vmem:[#allocation5 + $0x600] ss:$16 sps:$4 sm:$0xff]  }
  0x67   :  { %v3292_v58 = vld [vmem:[#allocation5 + $0x5e4] ss:$16 sps:$4 sm:$0xff]   ;;  %v3290_v60 = vld [vmem:[#allocation5 + $0x5e0] ss:$16 sps:$4 sm:$0xff]  }
  0x68   :  { %1722 = vmatpush2.bf16.msra.mxu0 %v3221_v61  ;;  %v3295_v59 = vld [vmem:[#allocation5 + $0x7e4] ss:$16 sps:$4 sm:$0xff]   ;;  %v3293_v61 = vld [vmem:[#allocation5 + $0x7e0] ss:$16 sps:$4 sm:$0xff]  }
  0x69   :  { %1763 = vmatpush2.bf16.msra.mxu1 %v3222_v0  ;;  %1723 = vmatprep.subr.bf16.mxu0 %v3223_v1  ;;  %v3298_v63 = vld [vmem:[#allocation5 + $0x5c4] ss:$16 sps:$4 sm:$0xff]   ;;  %v3296_v1 = vld [vmem:[#allocation5 + $0x5c0] ss:$16 sps:$4 sm:$0xff]  }
  0x6a   :  { %1764 = vmatprep.subr.bf16.mxu1 %v3225_v2  ;;  %v3301_v0 = vld [vmem:[#allocation5 + $0x7c4] ss:$16 sps:$4 sm:$0xff]   ;;  %v3299_v2 = vld [vmem:[#allocation5 + $0x7c0] ss:$16 sps:$4 sm:$0xff]  }
  0x6c   :  { %1724 = vmatpush2.bf16.msra.mxu0 %v3227_v4  ;;  %v3304_v4 = vld [vmem:[#allocation5 + $0x5a4] ss:$16 sps:$4 sm:$0xff]  }
  0x6d   :  { %1765 = vmatpush2.bf16.msra.mxu1 %v3228_v5  ;;  %1725 = vmatprep.subr.bf16.mxu0 %v3229_v6  ;;  %v3307_v5 = vld [vmem:[#allocation5 + $0x7a4] ss:$16 sps:$4 sm:$0xff]   ;;  %v3302_v6 = vld [vmem:[#allocation5 + $0x5a0] ss:$16 sps:$4 sm:$0xff]  }
  0x6e   :  { %1766 = vmatprep.subr.bf16.mxu1 %v3231_v7  ;;  %v3305_v7 = vld [vmem:[#allocation5 + $0x7a0] ss:$16 sps:$4 sm:$0xff]  }
  0x70   :  { %1726 = vmatpush2.bf16.msra.mxu0 %v3233_v8  ;;  %v3310_v8 = vld [vmem:[#allocation5 + $0x584] ss:$16 sps:$4 sm:$0xff]  }
  0x71   :  { %1767 = vmatpush2.bf16.msra.mxu1 %v3234_v9  ;;  %1727 = vmatprep.subr.bf16.mxu0 %v3235_v10  ;;  %v3313_v9 = vld [vmem:[#allocation5 + $0x784] ss:$16 sps:$4 sm:$0xff]   ;;  %v3308_v10 = vld [vmem:[#allocation5 + $0x580] ss:$16 sps:$4 sm:$0xff]  }
  0x72   :  { %1768 = vmatprep.subr.bf16.mxu1 %v3237_v11  ;;  %v3311_v11 = vld [vmem:[#allocation5 + $0x780] ss:$16 sps:$4 sm:$0xff]  }
  0x74   :  { %1728 = vmatpush2.bf16.msra.mxu0 %v3239_v12  ;;  %v3316_v12 = vld [vmem:[#allocation5 + $0x564] ss:$16 sps:$4 sm:$0xff]  }
  0x75   :  { %1769 = vmatpush2.bf16.msra.mxu1 %v3240_v13  ;;  %1779 = vmatprep.subr.bf16.mxu0 %v3244_v14  ;;  %v3319_v13 = vld [vmem:[#allocation5 + $0x764] ss:$16 sps:$4 sm:$0xff]   ;;  %v3314_v14 = vld [vmem:[#allocation5 + $0x560] ss:$16 sps:$4 sm:$0xff]  }
  0x76   :  { %1820 = vmatprep.subr.bf16.mxu1 %v3247_v15  ;;  %v3317_v15 = vld [vmem:[#allocation5 + $0x760] ss:$16 sps:$4 sm:$0xff]  }
  0x77   :  { %1730 = vmatmul.mubr.bf16.vlgmr.msra.gmra.mxu0 %v3882_v16 }
  0x78   :  { %1771 = vmatmul.mubr.bf16.vlgmr.msra.gmra.mxu1 %v3884_v17  ;;  %1780 = vmatpush1.bf16.msra.mxu0 %v3242_v18  ;;  %v3322_v18 = vld [vmem:[#allocation5 + $0x544] ss:$16 sps:$4 sm:$0xff]  }
  0x79   :  { %1821 = vmatpush1.bf16.msra.mxu1 %v3245_v19  ;;  %1781 = vmatprep.subr.bf16.mxu0 %v3250_v20  ;;  %v3325_v19 = vld [vmem:[#allocation5 + $0x744] ss:$16 sps:$4 sm:$0xff]   ;;  %v3320_v20 = vld [vmem:[#allocation5 + $0x540] ss:$16 sps:$4 sm:$0xff]  }
  0x7a   :  { %1822 = vmatprep.subr.bf16.mxu1 %v3253_v21  ;;  %1811 = vmatprep.mubr.bf16.mxu0 %v3896_v53  ;;  %v3323_v21 = vld [vmem:[#allocation5 + $0x740] ss:$16 sps:$4 sm:$0xff]  }
  0x7b   :  { %1852 = vmatprep.mubr.bf16.mxu1 %v3900_v57 }
  0x7c   :  { %1782 = vmatpush1.bf16.msra.mxu0 %v3248_v22  ;;  %v3328_v22 = vld [vmem:[#allocation5 + $0x524] ss:$16 sps:$4 sm:$0xff]  }
  0x7d   :  { %1823 = vmatpush1.bf16.msra.mxu1 %v3251_v23  ;;  %1783 = vmatprep.subr.bf16.mxu0 %v3256_v24  ;;  %v3331_v23 = vld [vmem:[#allocation5 + $0x724] ss:$16 sps:$4 sm:$0xff]   ;;  %v3326_v24 = vld [vmem:[#allocation5 + $0x520] ss:$16 sps:$4 sm:$0xff]  }
  0x7e   :  { %1824 = vmatprep.subr.bf16.mxu1 %v3259_v25  ;;  %v3329_v25 = vld [vmem:[#allocation5 + $0x720] ss:$16 sps:$4 sm:$0xff]  }
  0x80   :  { %1784 = vmatpush1.bf16.msra.mxu0 %v3254_v26  ;;  %v3334_v26 = vld [vmem:[#allocation5 + $0x504] ss:$16 sps:$4 sm:$0xff]  }
  0x81   :  { %1825 = vmatpush1.bf16.msra.mxu1 %v3257_v27  ;;  %1785 = vmatprep.subr.bf16.mxu0 %v3262_v28  ;;  %v3337_v27 = vld [vmem:[#allocation5 + $0x704] ss:$16 sps:$4 sm:$0xff]   ;;  %v3332_v28 = vld [vmem:[#allocation5 + $0x500] ss:$16 sps:$4 sm:$0xff]  }
  0x82   :  { %1826 = vmatprep.subr.bf16.mxu1 %v3265_v29  ;;  %v3335_v29 = vld [vmem:[#allocation5 + $0x700] ss:$16 sps:$4 sm:$0xff]  }
  0x84   :  { %1786 = vmatpush1.bf16.msra.mxu0 %v3260_v30  ;;  %v3341_v30 = vld [vmem:[#allocation5 + $0xec] ss:$16 sps:$4 sm:$0xff]  }
  0x85   :  { %1827 = vmatpush1.bf16.msra.mxu1 %v3263_v31  ;;  %1787 = vmatprep.subr.bf16.mxu0 %v3268_v32  ;;  %v3344_v31 = vld [vmem:[#allocation5 + $0x2ec] ss:$16 sps:$4 sm:$0xff]   ;;  %v3906_v32 = vpack.c.bf16 %v3889_v44, %v3889_v44  ;;  %v3354_v44 = vld [vmem:[#allocation5 + $0x2a8] ss:$16 sps:$4 sm:$0xff]  }
  0x86   :  { %1828 = vmatprep.subr.bf16.mxu1 %v3271_v33  ;;  %v3910_v33 = vpack.c.bf16 %v3894_v50, %v3894_v50  ;;  %v3365_v50 = vld [vmem:[#allocation5 + $0x6c] ss:$16 sps:$4 sm:$0xff]  }
  0x88   :  { %1788 = vmatpush1.bf16.msra.mxu0 %v3266_v34  ;;  %v3339_v34 = vld [vmem:[#allocation5 + $0xe8] ss:$16 sps:$4 sm:$0xff]  }
  0x89   :  { %1829 = vmatpush1.bf16.msra.mxu1 %v3269_v35  ;;  %1789 = vmatprep.subr.bf16.mxu0 %v3274_v36  ;;  %v3342_v35 = vld [vmem:[#allocation5 + $0x2e8] ss:$16 sps:$4 sm:$0xff]   ;;  %v3347_v36 = vld [vmem:[#allocation5 + $0xcc] ss:$16 sps:$4 sm:$0xff]  }
  0x8a   :  { %1830 = vmatprep.subr.bf16.mxu1 %v3277_v37  ;;  %v3350_v37 = vld [vmem:[#allocation5 + $0x2cc] ss:$16 sps:$4 sm:$0xff]  }
  0x8c   :  { %1790 = vmatpush1.bf16.msra.mxu0 %v3272_v38  ;;  %v3345_v38 = vld [vmem:[#allocation5 + $0xc8] ss:$16 sps:$4 sm:$0xff]  }
  0x8d   :  { %1831 = vmatpush1.bf16.msra.mxu1 %v3275_v39  ;;  %1791 = vmatprep.subr.bf16.mxu0 %v3280_v40  ;;  %v3348_v39 = vld [vmem:[#allocation5 + $0x2c8] ss:$16 sps:$4 sm:$0xff]   ;;  %v3353_v40 = vld [vmem:[#allocation5 + $0xac] ss:$16 sps:$4 sm:$0xff]  }
  0x8e   :  { %1832 = vmatprep.subr.bf16.mxu1 %v3283_v41  ;;  %v3356_v41 = vld [vmem:[#allocation5 + $0x2ac] ss:$16 sps:$4 sm:$0xff]  }
  0x90   :  { %1792 = vmatpush1.bf16.msra.mxu0 %v3278_v46  ;;  %v3362_v46 = vld [vmem:[#allocation5 + $0x28c] ss:$16 sps:$4 sm:$0xff]  }
  0x91   :  { %1833 = vmatpush1.bf16.msra.mxu1 %v3281_v47  ;;  %1793 = vmatprep.subr.bf16.mxu0 %v3286_v51  ;;  %v3357_v47 = vld [vmem:[#allocation5 + $0x88] ss:$16 sps:$4 sm:$0xff]   ;;  %v3368_v51 = vld [vmem:[#allocation5 + $0x26c] ss:$16 sps:$4 sm:$0xff]  }
  0x92   :  { %1834 = vmatprep.subr.bf16.mxu1 %v3289_v52  ;;  %v3371_v52 = vld [vmem:[#allocation5 + $0x4c] ss:$16 sps:$4 sm:$0xff]  }
  0x94   :  { %1794 = vmatpush1.bf16.msra.mxu0 %v3284_v55  ;;  %v3369_v55 = vld [vmem:[#allocation5 + $0x48] ss:$16 sps:$4 sm:$0xff]  }
  0x95   :  { %1835 = vmatpush1.bf16.msra.mxu1 %v3287_v56  ;;  %1795 = vmatprep.subr.bf16.mxu0 %v3292_v58  ;;  %v3372_v56 = vld [vmem:[#allocation5 + $0x248] ss:$16 sps:$4 sm:$0xff]   ;;  %v3377_v58 = vld [vmem:[#allocation5 + $0x2c] ss:$16 sps:$4 sm:$0xff]  }
  0x96   :  { %1836 = vmatprep.subr.bf16.mxu1 %v3295_v59  ;;  %v3380_v59 = vld [vmem:[#allocation5 + $0x22c] ss:$16 sps:$4 sm:$0xff]  }
  0x98   :  { %1796 = vmatpush2.bf16.msra.mxu0 %v3290_v60  ;;  %v3375_v60 = vld [vmem:[#allocation5 + $0x28] ss:$16 sps:$4 sm:$0xff]  }
  0x99   :  { %1837 = vmatpush2.bf16.msra.mxu1 %v3293_v61  ;;  %1797 = vmatprep.subr.bf16.mxu0 %v3298_v63  ;;  %v3378_v61 = vld [vmem:[#allocation5 + $0x228] ss:$16 sps:$4 sm:$0xff]   ;;  %v3383_v63 = vld [vmem:[#allocation5 + $0xc] ss:$16 sps:$4 sm:$0xff]  }
  0x9a   :  { %1838 = vmatprep.subr.bf16.mxu1 %v3301_v0  ;;  %v3386_v0 = vld [vmem:[#allocation5 + $0x20c] ss:$16 sps:$4 sm:$0xff]  }
  0x9c   :  { %1798 = vmatpush2.bf16.msra.mxu0 %v3296_v1  ;;  %v3381_v1 = vld [vmem:[#allocation5 + $0x8] ss:$16 sps:$4 sm:$0xff]  }
  0x9d   :  { %1839 = vmatpush2.bf16.msra.mxu1 %v3299_v2  ;;  %1799 = vmatprep.subr.bf16.mxu0 %v3304_v4  ;;  %v3384_v2 = vld [vmem:[#allocation5 + $0x208] ss:$16 sps:$4 sm:$0xff]   ;;  %v3389_v4 = vld [vmem:[#allocation5 + $0x1ec] ss:$16 sps:$4 sm:$0xff]  }
  0x9e   :  { %1840 = vmatprep.subr.bf16.mxu1 %v3307_v5  ;;  %v3392_v5 = vld [vmem:[#allocation5 + $0x3ec] ss:$16 sps:$4 sm:$0xff]  }
  0xa0   :  { %1800 = vmatpush2.bf16.msra.mxu0 %v3302_v6  ;;  %v3387_v6 = vld [vmem:[#allocation5 + $0x1e8] ss:$16 sps:$4 sm:$0xff]  }
  0xa1   :  { %1841 = vmatpush2.bf16.msra.mxu1 %v3305_v7  ;;  %1801 = vmatprep.subr.bf16.mxu0 %v3310_v8  ;;  %v3390_v7 = vld [vmem:[#allocation5 + $0x3e8] ss:$16 sps:$4 sm:$0xff]   ;;  %v3395_v8 = vld [vmem:[#allocation5 + $0x1cc] ss:$16 sps:$4 sm:$0xff]  }
  0xa2   :  { %1842 = vmatprep.subr.bf16.mxu1 %v3313_v9  ;;  %v3398_v9 = vld [vmem:[#allocation5 + $0x3cc] ss:$16 sps:$4 sm:$0xff]  }
  0xa4   :  { %1802 = vmatpush2.bf16.msra.mxu0 %v3308_v10  ;;  %v3393_v10 = vld [vmem:[#allocation5 + $0x1c8] ss:$16 sps:$4 sm:$0xff]  }
  0xa5   :  { %1843 = vmatpush2.bf16.msra.mxu1 %v3311_v11  ;;  %1803 = vmatprep.subr.bf16.mxu0 %v3316_v12  ;;  %v3396_v11 = vld [vmem:[#allocation5 + $0x3c8] ss:$16 sps:$4 sm:$0xff]   ;;  %v3401_v12 = vld [vmem:[#allocation5 + $0x1ac] ss:$16 sps:$4 sm:$0xff]  }
  0xa6   :  { %1844 = vmatprep.subr.bf16.mxu1 %v3319_v13  ;;  %v3404_v13 = vld [vmem:[#allocation5 + $0x3ac] ss:$16 sps:$4 sm:$0xff]  }
  0xa8   :  { %1804 = vmatpush2.bf16.msra.mxu0 %v3314_v14  ;;  %v3399_v14 = vld [vmem:[#allocation5 + $0x1a8] ss:$16 sps:$4 sm:$0xff]  }
  0xa9   :  { %1845 = vmatpush2.bf16.msra.mxu1 %v3317_v15  ;;  %1805 = vmatprep.subr.bf16.mxu0 %v3322_v18  ;;  %v3402_v15 = vld [vmem:[#allocation5 + $0x3a8] ss:$16 sps:$4 sm:$0xff]   ;;  %v3407_v18 = vld [vmem:[#allocation5 + $0x18c] ss:$16 sps:$4 sm:$0xff]  }
  0xaa   :  { %1846 = vmatprep.subr.bf16.mxu1 %v3325_v19  ;;  %v3410_v19 = vld [vmem:[#allocation5 + $0x38c] ss:$16 sps:$4 sm:$0xff]  }
  0xac   :  { %1806 = vmatpush2.bf16.msra.mxu0 %v3320_v20  ;;  %v3405_v20 = vld [vmem:[#allocation5 + $0x188] ss:$16 sps:$4 sm:$0xff]  }
  0xad   :  { %1847 = vmatpush2.bf16.msra.mxu1 %v3323_v21  ;;  %1807 = vmatprep.subr.bf16.mxu0 %v3328_v22  ;;  %v3408_v21 = vld [vmem:[#allocation5 + $0x388] ss:$16 sps:$4 sm:$0xff]   ;;  %v3413_v22 = vld [vmem:[#allocation5 + $0x16c] ss:$16 sps:$4 sm:$0xff]  }
  0xae   :  { %1848 = vmatprep.subr.bf16.mxu1 %v3331_v23  ;;  %v3416_v23 = vld [vmem:[#allocation5 + $0x36c] ss:$16 sps:$4 sm:$0xff]  }
  0xb0   :  { %1808 = vmatpush2.bf16.msra.mxu0 %v3326_v24  ;;  %v3411_v24 = vld [vmem:[#allocation5 + $0x168] ss:$16 sps:$4 sm:$0xff]  }
  0xb1   :  { %1849 = vmatpush2.bf16.msra.mxu1 %v3329_v25  ;;  %1809 = vmatprep.subr.bf16.mxu0 %v3334_v26  ;;  %v3414_v25 = vld [vmem:[#allocation5 + $0x368] ss:$16 sps:$4 sm:$0xff]   ;;  %v3419_v26 = vld [vmem:[#allocation5 + $0x14c] ss:$16 sps:$4 sm:$0xff]  }
  0xb2   :  { %1850 = vmatprep.subr.bf16.mxu1 %v3337_v27  ;;  %v3422_v27 = vld [vmem:[#allocation5 + $0x34c] ss:$16 sps:$4 sm:$0xff]  }
  0xb4   :  { %1810 = vmatpush2.bf16.msra.mxu0 %v3332_v28  ;;  %v3417_v28 = vld [vmem:[#allocation5 + $0x148] ss:$16 sps:$4 sm:$0xff]  }
  0xb5   :  { %1851 = vmatpush2.bf16.msra.mxu1 %v3335_v29  ;;  %1861 = vmatprep.subr.bf16.mxu0 %v3341_v30  ;;  %v3420_v29 = vld [vmem:[#allocation5 + $0x348] ss:$16 sps:$4 sm:$0xff]   ;;  %v3425_v30 = vld [vmem:[#allocation5 + $0x12c] ss:$16 sps:$4 sm:$0xff]  }
  0xb6   :  { %1902 = vmatprep.subr.bf16.mxu1 %v3344_v31  ;;  %v3428_v31 = vld [vmem:[#allocation5 + $0x32c] ss:$16 sps:$4 sm:$0xff]  }
  0xb7   :  { %1812 = vmatmul.mubr.bf16.vlgmr.msra.gmra.mxu0 %v3906_v32 }
  0xb8   :  { %1853 = vmatmul.mubr.bf16.vlgmr.msra.gmra.mxu1 %v3910_v33  ;;  %1862 = vmatpush1.bf16.msra.mxu0 %v3339_v34  ;;  %v3423_v34 = vld [vmem:[#allocation5 + $0x128] ss:$16 sps:$4 sm:$0xff]  }
  0xb9   :  { %1903 = vmatpush1.bf16.msra.mxu1 %v3342_v35  ;;  %1863 = vmatprep.subr.bf16.mxu0 %v3347_v36  ;;  %v3426_v35 = vld [vmem:[#allocation5 + $0x328] ss:$16 sps:$4 sm:$0xff]   ;;  %v3431_v36 = vld [vmem:[#allocation5 + $0x10c] ss:$16 sps:$4 sm:$0xff]  }
  0xba   :  { %1904 = vmatprep.subr.bf16.mxu1 %v3350_v37  ;;  %1893 = vmatprep.mubr.bf16.mxu0 %v3876_v62  ;;  %v3363_v62 = vld [vmem:[#allocation5 + $0x68] ss:$16 sps:$4 sm:$0xff]   ;;  %v3434_v37 = vld [vmem:[#allocation5 + $0x30c] ss:$16 sps:$4 sm:$0xff]  }
  0xbb   :  { %1934 = vmatprep.mubr.bf16.mxu1 %v3878_v3  ;;  %v3366_v3 = vld [vmem:[#allocation5 + $0x268] ss:$16 sps:$4 sm:$0xff]  }
  0xbc   :  { %1864 = vmatpush1.bf16.msra.mxu0 %v3345_v38  ;;  %v3429_v38 = vld [vmem:[#allocation5 + $0x108] ss:$16 sps:$4 sm:$0xff]  }
  0xbd   :  { %1905 = vmatpush1.bf16.msra.mxu1 %v3348_v39  ;;  %1865 = vmatprep.subr.bf16.mxu0 %v3353_v40  ;;  %v3432_v39 = vld [vmem:[#allocation5 + $0x308] ss:$16 sps:$4 sm:$0xff]   ;;  %v3437_v40 = vld [vmem:[#allocation5 + $0x4ec] ss:$16 sps:$4 sm:$0xff]  }
  0xbe   :  { %1906 = vmatprep.subr.bf16.mxu1 %v3356_v41  ;;  %v3440_v41 = vld [vmem:[#allocation5 + $0x6ec] ss:$16 sps:$4 sm:$0xff]  }
  0xc0   :  { %1866 = vmatpush1.bf16.msra.mxu0 %v3351_v42  ;;  %v3435_v42 = vld [vmem:[#allocation5 + $0x4e8] ss:$16 sps:$4 sm:$0xff]  }
  0xc1   :  { %1907 = vmatpush1.bf16.msra.mxu1 %v3354_v44  ;;  %1867 = vmatprep.subr.bf16.mxu0 %v3359_v45  ;;  %v3438_v44 = vld [vmem:[#allocation5 + $0x6e8] ss:$16 sps:$4 sm:$0xff]   ;;  %v3443_v45 = vld [vmem:[#allocation5 + $0x4cc] ss:$16 sps:$4 sm:$0xff]  }
  0xc2   :  { %1908 = vmatprep.subr.bf16.mxu1 %v3362_v46  ;;  %v3446_v46 = vld [vmem:[#allocation5 + $0x6cc] ss:$16 sps:$4 sm:$0xff]  }
  0xc4   :  { %1868 = vmatpush1.bf16.msra.mxu0 %v3357_v47  ;;  %v3441_v47 = vld [vmem:[#allocation5 + $0x4c8] ss:$16 sps:$4 sm:$0xff]  }
  0xc5   :  { %1909 = vmatpush1.bf16.msra.mxu1 %v3360_v48  ;;  %1869 = vmatprep.subr.bf16.mxu0 %v3365_v50  ;;  %v3444_v48 = vld [vmem:[#allocation5 + $0x6c8] ss:$16 sps:$4 sm:$0xff]   ;;  %v3449_v50 = vld [vmem:[#allocation5 + $0x4ac] ss:$16 sps:$4 sm:$0xff]  }
  0xc6   :  { %1910 = vmatprep.subr.bf16.mxu1 %v3368_v51  ;;  %v3452_v51 = vld [vmem:[#allocation5 + $0x6ac] ss:$16 sps:$4 sm:$0xff]  }
  0xc8   :  { %1870 = vmatpush1.bf16.msra.mxu0 %v3363_v62  ;;  %v3447_v62 = vld [vmem:[#allocation5 + $0x4a8] ss:$16 sps:$4 sm:$0xff]  }
  0xc9   :  { %1911 = vmatpush1.bf16.msra.mxu1 %v3366_v3  ;;  %1871 = vmatprep.subr.bf16.mxu0 %v3371_v52  ;;  %v3450_v3 = vld [vmem:[#allocation5 + $0x6a8] ss:$16 sps:$4 sm:$0xff]   ;;  %v3455_v52 = vld [vmem:[#allocation5 + $0x48c] ss:$16 sps:$4 sm:$0xff]  }
  0xca   :  { %1912 = vmatprep.subr.bf16.mxu1 %v3374_v54  ;;  %v3453_v54 = vld [vmem:[#allocation5 + $0x488] ss:$16 sps:$4 sm:$0xff]  }
  0xcc   :  { %1872 = vmatpush1.bf16.msra.mxu0 %v3369_v55  ;;  %v3461_v55 = vld [vmem:[#allocation5 + $0x46c] ss:$16 sps:$4 sm:$0xff]  }
  0xcd   :  { %1913 = vmatpush1.bf16.msra.mxu1 %v3372_v56  ;;  %1873 = vmatprep.subr.bf16.mxu0 %v3377_v58  ;;  %v3464_v56 = vld [vmem:[#allocation5 + $0x66c] ss:$16 sps:$4 sm:$0xff]   ;;  %v3459_v58 = vld [vmem:[#allocation5 + $0x468] ss:$16 sps:$4 sm:$0xff]  }
  0xce   :  { %1914 = vmatprep.subr.bf16.mxu1 %v3380_v59  ;;  %v3462_v59 = vld [vmem:[#allocation5 + $0x668] ss:$16 sps:$4 sm:$0xff]  }
  0xd0   :  { %1874 = vmatpush1.bf16.msra.mxu0 %v3375_v60  ;;  %v3467_v60 = vld [vmem:[#allocation5 + $0x44c] ss:$16 sps:$4 sm:$0xff]  }
  0xd1   :  { %1915 = vmatpush1.bf16.msra.mxu1 %v3378_v61  ;;  %1875 = vmatprep.subr.bf16.mxu0 %v3383_v63  ;;  %v3468_v61 = vld [vmem:[#allocation5 + $0x648] ss:$16 sps:$4 sm:$0xff]   ;;  %v3473_v63 = vld [vmem:[#allocation5 + $0x42c] ss:$16 sps:$4 sm:$0xff]  }
  0xd2   :  { %1916 = vmatprep.subr.bf16.mxu1 %v3386_v0  ;;  %v3476_v0 = vld [vmem:[#allocation5 + $0x62c] ss:$16 sps:$4 sm:$0xff]  }
  0xd4   :  { %1876 = vmatpush1.bf16.msra.mxu0 %v3381_v1  ;;  %v3471_v1 = vld [vmem:[#allocation5 + $0x428] ss:$16 sps:$4 sm:$0xff]  }
  0xd5   :  { %1917 = vmatpush1.bf16.msra.mxu1 %v3384_v2  ;;  %1877 = vmatprep.subr.bf16.mxu0 %v3389_v4  ;;  %v3474_v2 = vld [vmem:[#allocation5 + $0x628] ss:$16 sps:$4 sm:$0xff]   ;;  %v3479_v4 = vld [vmem:[#allocation5 + $0x40c] ss:$16 sps:$4 sm:$0xff]  }
  0xd6   :  { %1918 = vmatprep.subr.bf16.mxu1 %v3392_v5  ;;  %v3482_v5 = vld [vmem:[#allocation5 + $0x60c] ss:$16 sps:$4 sm:$0xff]  }
  0xd8   :  { %1878 = vmatpush2.bf16.msra.mxu0 %v3387_v6  ;;  %v3477_v6 = vld [vmem:[#allocation5 + $0x408] ss:$16 sps:$4 sm:$0xff]  }
  0xd9   :  { %1919 = vmatpush2.bf16.msra.mxu1 %v3390_v7  ;;  %1879 = vmatprep.subr.bf16.mxu0 %v3395_v8  ;;  %v3480_v7 = vld [vmem:[#allocation5 + $0x608] ss:$16 sps:$4 sm:$0xff]   ;;  %v3485_v8 = vld [vmem:[#allocation5 + $0x5ec] ss:$16 sps:$4 sm:$0xff]  }
  0xda   :  { %1920 = vmatprep.subr.bf16.mxu1 %v3398_v9  ;;  %v3488_v9 = vld [vmem:[#allocation5 + $0x7ec] ss:$16 sps:$4 sm:$0xff]  }
  0xdc   :  { %1880 = vmatpush2.bf16.msra.mxu0 %v3393_v10  ;;  %v3483_v10 = vld [vmem:[#allocation5 + $0x5e8] ss:$16 sps:$4 sm:$0xff]  }
  0xdd   :  { %1921 = vmatpush2.bf16.msra.mxu1 %v3396_v11  ;;  %1881 = vmatprep.subr.bf16.mxu0 %v3401_v12  ;;  %v3486_v11 = vld [vmem:[#allocation5 + $0x7e8] ss:$16 sps:$4 sm:$0xff]   ;;  %v3491_v12 = vld [vmem:[#allocation5 + $0x5cc] ss:$16 sps:$4 sm:$0xff]  }
  0xde   :  { %1922 = vmatprep.subr.bf16.mxu1 %v3404_v13  ;;  %v3494_v13 = vld [vmem:[#allocation5 + $0x7cc] ss:$16 sps:$4 sm:$0xff]  }
  0xe0   :  { %1882 = vmatpush2.bf16.msra.mxu0 %v3399_v14  ;;  %v3489_v14 = vld [vmem:[#allocation5 + $0x5c8] ss:$16 sps:$4 sm:$0xff]  }
  0xe1   :  { %1923 = vmatpush2.bf16.msra.mxu1 %v3402_v15  ;;  %1883 = vmatprep.subr.bf16.mxu0 %v3407_v18  ;;  %v3492_v15 = vld [vmem:[#allocation5 + $0x7c8] ss:$16 sps:$4 sm:$0xff]   ;;  %v3497_v18 = vld [vmem:[#allocation5 + $0x5ac] ss:$16 sps:$4 sm:$0xff]  }
  0xe2   :  { %1924 = vmatprep.subr.bf16.mxu1 %v3410_v19  ;;  %v3500_v19 = vld [vmem:[#allocation5 + $0x7ac] ss:$16 sps:$4 sm:$0xff]  }
  0xe4   :  { %1884 = vmatpush2.bf16.msra.mxu0 %v3405_v20  ;;  %v3495_v20 = vld [vmem:[#allocation5 + $0x5a8] ss:$16 sps:$4 sm:$0xff]  }
  0xe5   :  { %1925 = vmatpush2.bf16.msra.mxu1 %v3408_v21  ;;  %1885 = vmatprep.subr.bf16.mxu0 %v3413_v22  ;;  %v3498_v21 = vld [vmem:[#allocation5 + $0x7a8] ss:$16 sps:$4 sm:$0xff]   ;;  %v3503_v22 = vld [vmem:[#allocation5 + $0x58c] ss:$16 sps:$4 sm:$0xff]  }
  0xe6   :  { %1926 = vmatprep.subr.bf16.mxu1 %v3416_v23  ;;  %v3506_v23 = vld [vmem:[#allocation5 + $0x78c] ss:$16 sps:$4 sm:$0xff]  }
  0xe8   :  { %1886 = vmatpush2.bf16.msra.mxu0 %v3411_v24  ;;  %v3501_v24 = vld [vmem:[#allocation5 + $0x588] ss:$16 sps:$4 sm:$0xff]  }
  0xe9   :  { %1927 = vmatpush2.bf16.msra.mxu1 %v3414_v25  ;;  %1887 = vmatprep.subr.bf16.mxu0 %v3419_v26  ;;  %v3504_v25 = vld [vmem:[#allocation5 + $0x788] ss:$16 sps:$4 sm:$0xff]   ;;  %v3509_v26 = vld [vmem:[#allocation5 + $0x56c] ss:$16 sps:$4 sm:$0xff]  }
  0xea   :  { %1928 = vmatprep.subr.bf16.mxu1 %v3422_v27  ;;  %v3512_v27 = vld [vmem:[#allocation5 + $0x76c] ss:$16 sps:$4 sm:$0xff]  }
  0xec   :  { %1888 = vmatpush2.bf16.msra.mxu0 %v3417_v28  ;;  %v3507_v28 = vld [vmem:[#allocation5 + $0x568] ss:$16 sps:$4 sm:$0xff]  }
  0xed   :  { %1929 = vmatpush2.bf16.msra.mxu1 %v3420_v29  ;;  %1889 = vmatprep.subr.bf16.mxu0 %v3425_v30  ;;  %v3510_v29 = vld [vmem:[#allocation5 + $0x768] ss:$16 sps:$4 sm:$0xff]   ;;  %v3515_v30 = vld [vmem:[#allocation5 + $0x54c] ss:$16 sps:$4 sm:$0xff]  }
  0xee   :  { %1930 = vmatprep.subr.bf16.mxu1 %v3428_v31  ;;  %v3518_v31 = vld [vmem:[#allocation5 + $0x74c] ss:$16 sps:$4 sm:$0xff]  }
  0xf0   :  { %1890 = vmatpush2.bf16.msra.mxu0 %v3423_v34  ;;  %v3513_v34 = vld [vmem:[#allocation5 + $0x548] ss:$16 sps:$4 sm:$0xff]  }
  0xf1   :  { %1931 = vmatpush2.bf16.msra.mxu1 %v3426_v35  ;;  %1891 = vmatprep.subr.bf16.mxu0 %v3431_v36  ;;  %v3516_v35 = vld [vmem:[#allocation5 + $0x748] ss:$16 sps:$4 sm:$0xff]   ;;  %v3521_v36 = vld [vmem:[#allocation5 + $0x52c] ss:$16 sps:$4 sm:$0xff]  }
  0xf2   :  { %1932 = vmatprep.subr.bf16.mxu1 %v3434_v37  ;;  %v3524_v37 = vld [vmem:[#allocation5 + $0x72c] ss:$16 sps:$4 sm:$0xff]  }
  0xf4   :  { %1892 = vmatpush2.bf16.msra.mxu0 %v3429_v38  ;;  %v3519_v38 = vld [vmem:[#allocation5 + $0x528] ss:$16 sps:$4 sm:$0xff]  }
  0xf5   :  { %1933 = vmatpush2.bf16.msra.mxu1 %v3432_v39  ;;  %1943 = vmatprep.subr.bf16.mxu0 %v3437_v40  ;;  %v3522_v39 = vld [vmem:[#allocation5 + $0x728] ss:$16 sps:$4 sm:$0xff]   ;;  %v3527_v40 = vld [vmem:[#allocation5 + $0x50c] ss:$16 sps:$4 sm:$0xff]  }
  0xf6   :  { %1984 = vmatprep.subr.bf16.mxu1 %v3440_v41  ;;  %v3530_v41 = vld [vmem:[#allocation5 + $0x70c] ss:$16 sps:$4 sm:$0xff]  }
  0xf7   :  { %1894 = vmatmul.mubr.bf16.vlgmr.msra.gmra.mxu0 %v3882_v16  ;;  %v3458_v16 = vld [vmem:[#allocation5 + $0x68c] ss:$16 sps:$4 sm:$0xff]  }
  0xf8   :  { %1935 = vmatmul.mubr.bf16.vlgmr.msra.gmra.mxu1 %v3884_v17  ;;  %1944 = vmatpush1.bf16.msra.mxu0 %v3435_v42  ;;  %v3456_v17 = vld [vmem:[#allocation5 + $0x688] ss:$16 sps:$4 sm:$0xff]  }
  0xf9   :  { %1985 = vmatpush1.bf16.msra.mxu1 %v3438_v44  ;;  %1945 = vmatprep.subr.bf16.mxu0 %v3443_v45  ;;  %v3525_v42 = vld [vmem:[#allocation5 + $0x508] ss:$16 sps:$4 sm:$0xff]   ;;  %v3533_v45 = vld [vmem:[#allocation7 + $0x74] ss:$8 sps:$4 sm:$0xff]  }
  0xfa   :  { %1986 = vmatprep.subr.bf16.mxu1 %v3446_v46  ;;  %1975 = vmatprep.mubr.bf16.mxu0 %v3896_v53  ;;  %v3470_v53 = vld [vmem:[#allocation5 + $0x64c] ss:$16 sps:$4 sm:$0xff]   ;;  %v3528_v44 = vld [vmem:[#allocation5 + $0x708] ss:$16 sps:$4 sm:$0xff]  }
  0xfb   :  { %2016 = vmatprep.mubr.bf16.mxu1 %v3900_v57  ;;  %v3465_v57 = vld [vmem:[#allocation5 + $0x448] ss:$16 sps:$4 sm:$0xff]  }
  0xfc   :  { %1946 = vmatpush1.bf16.msra.mxu0 %v3441_v47  ;;  %v3531_v46 = vld [vmem:[#allocation7 + $0x70] ss:$8 sps:$4 sm:$0xff]   ;;  %v3536_v47 = vld [vmem:[#allocation7 + $0x64] ss:$8 sps:$4 sm:$0xff]  }
  0xfd   :  { %1987 = vmatpush1.bf16.msra.mxu1 %v3444_v48  ;;  %1947 = vmatprep.subr.bf16.mxu0 %v3449_v50 }
  0xfe   :  { %1988 = vmatprep.subr.bf16.mxu1 %v3452_v51  ;;  %v3534_v51 = vld [vmem:[#allocation7 + $0x60] ss:$8 sps:$4 sm:$0xff]  }
 0x100   :  { %1948 = vmatpush1.bf16.msra.mxu0 %v3447_v62 }
 0x101   :  { %1989 = vmatpush1.bf16.msra.mxu1 %v3450_v3  ;;  %1949 = vmatprep.subr.bf16.mxu0 %v3455_v52  ;;  %v3539_v52 = vld [vmem:[#allocation7 + $0x54] ss:$8 sps:$4 sm:$0xff]  }
 0x102   :  { %1990 = vmatprep.subr.bf16.mxu1 %v3458_v16 }
 0x104   :  { %1950 = vmatpush1.bf16.msra.mxu0 %v3453_v54 }
 0x105   :  { %1991 = vmatpush1.bf16.msra.mxu1 %v3456_v17  ;;  %1951 = vmatprep.subr.bf16.mxu0 %v3461_v55  ;;  %v3537_v17 = vld [vmem:[#allocation7 + $0x50] ss:$8 sps:$4 sm:$0xff]  }
 0x106   :  { %1992 = vmatprep.subr.bf16.mxu1 %v3464_v56 }
 0x108   :  { %1952 = vmatpush1.bf16.msra.mxu0 %v3459_v58  ;;  %v3542_v58 = vld [vmem:[#allocation7 + $0x44] ss:$8 sps:$4 sm:$0xff]  }
 0x109   :  { %1993 = vmatpush1.bf16.msra.mxu1 %v3462_v59  ;;  %1953 = vmatprep.subr.bf16.mxu0 %v3467_v60  ;;  %v3579_v59 = vld [vmem:[#allocation7 + $0x170] ss:$8 sps:$4 sm:$0xff]   ;;  %v3584_v60 = vld [vmem:[#allocation7 + $0x164] ss:$8 sps:$4 sm:$0xff]  }
 0x10a   :  { %1994 = vmatprep.subr.bf16.mxu1 %v3470_v53  ;;  %v3582_v53 = vld [vmem:[#allocation7 + $0x160] ss:$8 sps:$4 sm:$0xff]  }
 0x10c   :  { %1954 = vmatpush1.bf16.msra.mxu0 %v3465_v57  ;;  %v3545_v57 = vld [vmem:[#allocation7 + $0x34] ss:$8 sps:$4 sm:$0xff]  }
 0x10d   :  { %1995 = vmatpush1.bf16.msra.mxu1 %v3468_v61  ;;  %1955 = vmatprep.subr.bf16.mxu0 %v3473_v63  ;;  %v3587_v61 = vld [vmem:[#allocation7 + $0x154] ss:$8 sps:$4 sm:$0xff]   ;;  %v3543_v63 = vld [vmem:[#allocation7 + $0x30] ss:$8 sps:$4 sm:$0xff]  }
 0x10e   :  { %1996 = vmatprep.subr.bf16.mxu1 %v3476_v0  ;;  %v3585_v0 = vld [vmem:[#allocation7 + $0x150] ss:$8 sps:$4 sm:$0xff]  }
 0x110   :  { %1956 = vmatpush1.bf16.msra.mxu0 %v3471_v1  ;;  %v3548_v1 = vld [vmem:[#allocation7 + $0x24] ss:$8 sps:$4 sm:$0xff]  }
 0x111   :  { %1997 = vmatpush1.bf16.msra.mxu1 %v3474_v2  ;;  %1957 = vmatprep.subr.bf16.mxu0 %v3479_v4  ;;  %v3590_v2 = vld [vmem:[#allocation7 + $0x144] ss:$8 sps:$4 sm:$0xff]   ;;  %v3546_v4 = vld [vmem:[#allocation7 + $0x20] ss:$8 sps:$4 sm:$0xff]  }
 0x112   :  { %1998 = vmatprep.subr.bf16.mxu1 %v3482_v5  ;;  %v3588_v5 = vld [vmem:[#allocation7 + $0x140] ss:$8 sps:$4 sm:$0xff]  }
 0x114   :  { %1958 = vmatpush1.bf16.msra.mxu0 %v3477_v6  ;;  %v3551_v6 = vld [vmem:[#allocation7 + $0x14] ss:$8 sps:$4 sm:$0xff]  }
 0x115   :  { %1999 = vmatpush1.bf16.msra.mxu1 %v3480_v7  ;;  %1959 = vmatprep.subr.bf16.mxu0 %v3485_v8  ;;  %v3593_v7 = vld [vmem:[#allocation7 + $0x134] ss:$8 sps:$4 sm:$0xff]   ;;  %v3549_v8 = vld [vmem:[#allocation7 + $0x10] ss:$8 sps:$4 sm:$0xff]  }
 0x116   :  { %2000 = vmatprep.subr.bf16.mxu1 %v3488_v9  ;;  %v3591_v9 = vld [vmem:[#allocation7 + $0x130] ss:$8 sps:$4 sm:$0xff]  }
 0x118   :  { %1960 = vmatpush2.bf16.msra.mxu0 %v3483_v10  ;;  %v3554_v10 = vld [vmem:[#allocation7 + $0x4] ss:$8 sps:$4 sm:$0xff]  }
 0x119   :  { %2001 = vmatpush2.bf16.msra.mxu1 %v3486_v11  ;;  %1961 = vmatprep.subr.bf16.mxu0 %v3491_v12  ;;  %v3596_v11 = vld [vmem:[#allocation7 + $0x124] ss:$8 sps:$4 sm:$0xff]   ;;  %v3552_v12 = vld [vmem:[#allocation7] ss:$8 sps:$4 sm:$0xff]  }
 0x11a   :  { %2002 = vmatprep.subr.bf16.mxu1 %v3494_v13  ;;  %v3594_v13 = vld [vmem:[#allocation7 + $0x120] ss:$8 sps:$4 sm:$0xff]  }
 0x11c   :  { %1962 = vmatpush2.bf16.msra.mxu0 %v3489_v14  ;;  %v3557_v14 = vld [vmem:[#allocation7 + $0xf4] ss:$8 sps:$4 sm:$0xff]  }
 0x11d   :  { %2003 = vmatpush2.bf16.msra.mxu1 %v3492_v15  ;;  %1963 = vmatprep.subr.bf16.mxu0 %v3497_v18  ;;  %v3599_v15 = vld [vmem:[#allocation7 + $0x114] ss:$8 sps:$4 sm:$0xff]   ;;  %v3555_v18 = vld [vmem:[#allocation7 + $0xf0] ss:$8 sps:$4 sm:$0xff]  }
 0x11e   :  { %2004 = vmatprep.subr.bf16.mxu1 %v3500_v19  ;;  %v3597_v19 = vld [vmem:[#allocation7 + $0x110] ss:$8 sps:$4 sm:$0xff]  }
 0x120   :  { %1964 = vmatpush2.bf16.msra.mxu0 %v3495_v20  ;;  %v3560_v20 = vld [vmem:[#allocation7 + $0xe4] ss:$8 sps:$4 sm:$0xff]  }
 0x121   :  { %2005 = vmatpush2.bf16.msra.mxu1 %v3498_v21  ;;  %1965 = vmatprep.subr.bf16.mxu0 %v3503_v22  ;;  %v3602_v21 = vld [vmem:[#allocation7 + $0x104] ss:$8 sps:$4 sm:$0xff]   ;;  %v3558_v22 = vld [vmem:[#allocation7 + $0xe0] ss:$8 sps:$4 sm:$0xff]  }
 0x122   :  { %2006 = vmatprep.subr.bf16.mxu1 %v3506_v23  ;;  %v3600_v23 = vld [vmem:[#allocation7 + $0x100] ss:$8 sps:$4 sm:$0xff]  }
 0x124   :  { %1966 = vmatpush2.bf16.msra.mxu0 %v3501_v24  ;;  %v3563_v24 = vld [vmem:[#allocation7 + $0xd4] ss:$8 sps:$4 sm:$0xff]  }
 0x125   :  { %2007 = vmatpush2.bf16.msra.mxu1 %v3504_v25  ;;  %1967 = vmatprep.subr.bf16.mxu0 %v3509_v26  ;;  %v3605_v25 = vld [vmem:[#allocation7 + $0x1f4] ss:$8 sps:$4 sm:$0xff]   ;;  %v3561_v26 = vld [vmem:[#allocation7 + $0xd0] ss:$8 sps:$4 sm:$0xff]  }
 0x126   :  { %2008 = vmatprep.subr.bf16.mxu1 %v3512_v27  ;;  %v3603_v27 = vld [vmem:[#allocation7 + $0x1f0] ss:$8 sps:$4 sm:$0xff]  }
 0x128   :  { %1968 = vmatpush2.bf16.msra.mxu0 %v3507_v28  ;;  %v3566_v28 = vld [vmem:[#allocation7 + $0xc4] ss:$8 sps:$4 sm:$0xff]  }
 0x129   :  { %2009 = vmatpush2.bf16.msra.mxu1 %v3510_v29  ;;  %1969 = vmatprep.subr.bf16.mxu0 %v3515_v30  ;;  %v3608_v29 = vld [vmem:[#allocation7 + $0x1e4] ss:$8 sps:$4 sm:$0xff]   ;;  %v3564_v30 = vld [vmem:[#allocation7 + $0xc0] ss:$8 sps:$4 sm:$0xff]  }
 0x12a   :  { %2010 = vmatprep.subr.bf16.mxu1 %v3518_v31  ;;  %v3606_v31 = vld [vmem:[#allocation7 + $0x1e0] ss:$8 sps:$4 sm:$0xff]  }
 0x12c   :  { %1970 = vmatpush2.bf16.msra.mxu0 %v3513_v34  ;;  %v3569_v34 = vld [vmem:[#allocation7 + $0xb4] ss:$8 sps:$4 sm:$0xff]  }
 0x12d   :  { %2011 = vmatpush2.bf16.msra.mxu1 %v3516_v35  ;;  %1971 = vmatprep.subr.bf16.mxu0 %v3521_v36  ;;  %v3611_v35 = vld [vmem:[#allocation7 + $0x1d4] ss:$8 sps:$4 sm:$0xff]   ;;  %v3567_v36 = vld [vmem:[#allocation7 + $0xb0] ss:$8 sps:$4 sm:$0xff]  }
 0x12e   :  { %2012 = vmatprep.subr.bf16.mxu1 %v3524_v37  ;;  %v3609_v37 = vld [vmem:[#allocation7 + $0x1d0] ss:$8 sps:$4 sm:$0xff]  }
 0x130   :  { %1972 = vmatpush2.bf16.msra.mxu0 %v3519_v38  ;;  %v3572_v38 = vld [vmem:[#allocation7 + $0xa4] ss:$8 sps:$4 sm:$0xff]  }
 0x131   :  { %2013 = vmatpush2.bf16.msra.mxu1 %v3522_v39  ;;  %1973 = vmatprep.subr.bf16.mxu0 %v3527_v40  ;;  %v3614_v39 = vld [vmem:[#allocation7 + $0x1c4] ss:$8 sps:$4 sm:$0xff]   ;;  %v3570_v40 = vld [vmem:[#allocation7 + $0xa0] ss:$8 sps:$4 sm:$0xff]  }
 0x132   :  { %2014 = vmatprep.subr.bf16.mxu1 %v3530_v41  ;;  %v3612_v41 = vld [vmem:[#allocation7 + $0x1c0] ss:$8 sps:$4 sm:$0xff]  }
 0x134   :  { %1974 = vmatpush2.bf16.msra.mxu0 %v3525_v42  ;;  %v3575_v42 = vld [vmem:[#allocation7 + $0x94] ss:$8 sps:$4 sm:$0xff]  }
 0x135   :  { %2015 = vmatpush2.bf16.msra.mxu1 %v3528_v44  ;;  %2452 = vmatprep.subr.bf16.mxu0 %v3533_v45  ;;  %v3617_v44 = vld [vmem:[#allocation7 + $0x1b4] ss:$8 sps:$4 sm:$0xff]   ;;  %v399_v45 = vsub.s32 0, %v3869_v43 }
 0x137   :  { %v3920_v48 = vpop.f32.mrf.mxu0  ;;  %1976 = vmatmul.mubr.bf16.vlgmr.msra.gmra.mxu0 %v3906_v32  ;;  %v3581_v32 = vld [vmem:[#allocation7 + $0x174] ss:$8 sps:$4 sm:$0xff]  }
 0x138   :  { %v3922_v50 = vpop.f32.mrf.mxu1  ;;  %2017 = vmatmul.mubr.bf16.vlgmr.msra.gmra.mxu1 %v3910_v33  ;;  %2453 = vmatpush1.bf16.msra.mxu0 %v3531_v46  ;;  %v3540_v33 = vld [vmem:[#allocation7 + $0x40] ss:$8 sps:$4 sm:$0xff]   ;;  %v3934_v46 = vld [vmem:[%s3989_s4] sm:$0xf] }
 0x139   :  { %v3926_v62 = vpop.f32.mrf.mxu0  ;;  %2454 = vmatprep.subr.bf16.mxu0 %v3536_v47  ;;  %2493 = vmatprep.subr.bf16.mxu1 %v3581_v32  ;;  %v403_v47 = vsub.s32 1, %v3869_v43 }
 0x13a   :  { %v3928_v3 = vpop.f32.mrf.mxu1  ;;  %2494 = vmatpush1.bf16.msra.mxu1 %v3579_v59  ;;  %v3620_v59 = vld [vmem:[#allocation7 + $0x1a4] ss:$8 sps:$4 sm:$0xff]  }
 0x13b   :  { %v1735_v16 = vpop.f32.mrf.mxu0  ;;  %2495 = vmatprep.subr.bf16.mxu1 %v3584_v60  ;;  %v3618_v60 = vld [vmem:[#allocation7 + $0x1a0] ss:$8 sps:$4 sm:$0xff]  }
 0x13c   :  { %v1776_v54 = vpop.f32.mrf.mxu1  ;;  %2455 = vmatpush1.bf16.msra.mxu0 %v3534_v51  ;;  %v3573_v51 = vld [vmem:[#allocation7 + $0x90] ss:$8 sps:$4 sm:$0xff]   ;;  %v3578_v16 = vld [vmem:[#allocation7 + $0x84] ss:$8 sps:$4 sm:$0xff]  }
 0x13d   :  { %v1736_v55 = vpop.f32.mrf.mxu0  ;;  %2456 = vmatprep.subr.bf16.mxu0 %v3539_v52  ;;  %v3615_v52 = vld [vmem:[#allocation7 + $0x1b0] ss:$8 sps:$4 sm:$0xff]   ;;  %v400_v54 = vrot.slane %v3934_v46, %v399_v45 }
 0x13e   :  { %v1777_v56 = vpop.f32.mrf.mxu1  ;;  %2496 = vmatpush1.bf16.msra.mxu1 %v3582_v53  ;;  %v3576_v55 = vld [vmem:[#allocation7 + $0x80] ss:$8 sps:$4 sm:$0xff]  }
 0x13f   :  { %2497 = vmatprep.subr.bf16.mxu1 %v3587_v61  ;;  %v1732_v56 = vadd.f32 %v3920_v48, %v400_v54  ;;  %v3621_v48 = vld [vmem:[#allocation7 + $0x190] ss:$8 sps:$4 sm:$0xff]  }
 0x140   :  { %2457 = vmatpush1.bf16.msra.mxu0 %v3537_v17  ;;  %v404_v17 = vrot.slane %v3934_v46, %v403_v47 }
 0x141   :  { %2458 = vmatprep.subr.bf16.mxu0 %v3542_v58  ;;  %v1773_v32 = vadd.f32 %v3922_v50, %v1732_v56 }
 0x142   :  { %2498 = vmatpush1.bf16.msra.mxu1 %v3585_v0  ;;  %v1734_v58 = vadd.f32 %v3926_v62, %v404_v17 }
 0x143   :  { %2499 = vmatprep.subr.bf16.mxu1 %v3590_v2 }
 0x144   :  { %2459 = vmatpush1.bf16.msra.mxu0 %v3540_v33 }
 0x145   :  { %2460 = vmatprep.subr.bf16.mxu0 %v3545_v57  ;;  %v1775_v57 = vadd.f32 %v3928_v3, %v1734_v58  ;;  %v3624_v3 = vld [vmem:[#allocation7 + $0x180] ss:$8 sps:$4 sm:$0xff]  }
 0x146   :  { %2500 = vmatpush1.bf16.msra.mxu1 %v3588_v5 }
 0x147   :  { %2501 = vmatprep.subr.bf16.mxu1 %v3593_v7 }
 0x148   :  { %2461 = vmatpush1.bf16.msra.mxu0 %v3543_v63 }
 0x149   :  { %2462 = vmatprep.subr.bf16.mxu0 %v3548_v1  ;;  %v3623_v1 = vld [vmem:[#allocation7 + $0x194] ss:$8 sps:$4 sm:$0xff]  }
 0x14a   :  { %2502 = vmatpush1.bf16.msra.mxu1 %v3591_v9  ;;  %v3626_v9 = vld [vmem:[#allocation7 + $0x184] ss:$8 sps:$4 sm:$0xff]  }
 0x14b   :  { %2503 = vmatprep.subr.bf16.mxu1 %v3596_v11 }
 0x14c   :  { %2463 = vmatpush1.bf16.msra.mxu0 %v3546_v4 }
 0x14d   :  { %2464 = vmatprep.subr.bf16.mxu0 %v3551_v6 }
 0x14e   :  { %2504 = vmatpush1.bf16.msra.mxu1 %v3594_v13 }
 0x14f   :  { %2505 = vmatprep.subr.bf16.mxu1 %v3599_v15 }
 0x150   :  { %2465 = vmatpush1.bf16.msra.mxu0 %v3549_v8 }
 0x151   :  { %2466 = vmatprep.subr.bf16.mxu0 %v3554_v10 }
 0x152   :  { %2506 = vmatpush1.bf16.msra.mxu1 %v3597_v19 }
 0x153   :  { %2507 = vmatprep.subr.bf16.mxu1 %v3602_v21 }
 0x154   :  { %2467 = vmatpush1.bf16.msra.mxu0 %v3552_v12 }
 0x155   :  { %2468 = vmatprep.subr.bf16.mxu0 %v3557_v14 }
 0x156   :  { %2508 = vmatpush1.bf16.msra.mxu1 %v3600_v23 }
 0x157   :  { %2509 = vmatprep.subr.bf16.mxu1 %v3605_v25  ;;  %v3628_v25 = vld [vmem:[#allocation8 + $0x38] sm:$0xff]  }
 0x158   :  { %2469 = vmatpush2.bf16.msra.mxu0 %v3555_v18 }
 0x159   :  { %2470 = vmatprep.subr.bf16.mxu0 %v3560_v20 }
 0x15a   :  { %2510 = vmatpush2.bf16.msra.mxu1 %v3603_v27  ;;  %v3630_v27 = vld [vmem:[#allocation8 + $0x30] sm:$0xff]  }
 0x15b   :  { %2511 = vmatprep.subr.bf16.mxu1 %v3608_v29  ;;  %v3632_v29 = vld [vmem:[#allocation8 + $0x28] sm:$0xff]  }
 0x15c   :  { %2471 = vmatpush2.bf16.msra.mxu0 %v3558_v22 }
 0x15d   :  { %2472 = vmatprep.subr.bf16.mxu0 %v3563_v24  ;;  %v3627_v24 = vld [vmem:[#allocation8 + $0x78] sm:$0xff]  }
 0x15e   :  { %2512 = vmatpush2.bf16.msra.mxu1 %v3606_v31  ;;  %v3634_v31 = vld [vmem:[#allocation8 + $0x20] sm:$0xff]  }
 0x15f   :  { %2513 = vmatprep.subr.bf16.mxu1 %v3611_v35  ;;  %v3636_v35 = vld [vmem:[#allocation8 + $0x18] sm:$0xff]  }
 0x160   :  { %2473 = vmatpush2.bf16.msra.mxu0 %v3561_v26  ;;  %v3629_v26 = vld [vmem:[#allocation8 + $0x70] sm:$0xff]  }
 0x161   :  { %2474 = vmatprep.subr.bf16.mxu0 %v3566_v28  ;;  %v3631_v28 = vld [vmem:[#allocation8 + $0x68] sm:$0xff]  }
 0x162   :  { %2514 = vmatpush2.bf16.msra.mxu1 %v3609_v37  ;;  %v3638_v37 = vld [vmem:[#allocation8 + $0x10] sm:$0xff]  }
 0x163   :  { %2515 = vmatprep.subr.bf16.mxu1 %v3614_v39  ;;  %v411_v39 = vsub.s32 3, %v3869_v43 }
 0x164   :  { %2475 = vmatpush2.bf16.msra.mxu0 %v3564_v30  ;;  %v3633_v30 = vld [vmem:[#allocation8 + $0x60] sm:$0xff]  }
 0x165   :  { %2476 = vmatprep.subr.bf16.mxu0 %v3569_v34  ;;  %v3635_v34 = vld [vmem:[#allocation8 + $0x58] sm:$0xff]  }
 0x166   :  { %2516 = vmatpush2.bf16.msra.mxu1 %v3612_v41  ;;  %v412_v41 = vrot.slane %v3934_v46, %v411_v39 }
 0x167   :  { %2517 = vmatprep.subr.bf16.mxu1 %v3617_v44 }
 0x168   :  { %2477 = vmatpush2.bf16.msra.mxu0 %v3567_v36  ;;  %v3637_v36 = vld [vmem:[#allocation8 + $0x50] sm:$0xff]  }
 0x169   :  { %2478 = vmatprep.subr.bf16.mxu0 %v3572_v38  ;;  %v407_v38 = vsub.s32 2, %v3869_v43 }
 0x16a   :  { %2518 = vmatpush2.bf16.msra.mxu1 %v3615_v52 }
 0x16b   :  { %2519 = vmatprep.subr.bf16.mxu1 %v3620_v59 }
 0x16c   :  { %2479 = vmatpush2.bf16.msra.mxu0 %v3570_v40  ;;  %v408_v40 = vrot.slane %v3934_v46, %v407_v38 }
 0x16d   :  { %2480 = vmatprep.subr.bf16.mxu0 %v3575_v42 }
 0x16e   :  { %2520 = vmatpush2.bf16.msra.mxu1 %v3618_v60 }
 0x16f   :  { %2521 = vmatprep.subr.bf16.mxu1 %v3623_v1 }
 0x170   :  { %2481 = vmatpush2.bf16.msra.mxu0 %v3573_v51 }
 0x171   :  { %2482 = vmatprep.subr.bf16.mxu0 %v3578_v16 }
 0x172   :  { %2522 = vmatpush2.bf16.msra.mxu1 %v3621_v48 }
 0x173   :  { %2523 = vmatprep.subr.bf16.mxu1 %v3626_v9  ;;  %v3641_v9 = vld [vmem:[#allocation8 + $0x40] sm:$0xff]  }
 0x174   :  { %2483 = vmatpush2.bf16.msra.mxu0 %v3576_v55 }
 0x175   :  { %3109 = vmatprep.subr.bf16.mxu0 %v3627_v24 }
 0x176   :  { %2524 = vmatpush2.bf16.msra.mxu1 %v3624_v3  ;;  %v3642_v3 = vld [vmem:[#allocation8] sm:$0xff]  }
 0x177   :  { %v1813_v33 = vpop.f32.mrf.mxu0 }
 0x178   :  { %v1854_v53 = vpop.f32.mrf.mxu1  ;;  %v1814_v61 = vadd.f32 %v1813_v33, %v1773_v32 }
 0x179   :  { %v1815_v63 = vpop.f32.mrf.mxu0 }
 0x17a   :  { %v1856_v0 = vpop.f32.mrf.mxu1  ;;  %v1855_v2 = vadd.f32 %v1854_v53, %v1814_v61  ;;  %v1816_v4 = vadd.f32 %v1815_v63, %v1775_v57 }
 0x17b   :  { %v1817_v5 = vpop.f32.mrf.mxu0 }
 0x17c   :  { %v1858_v62 = vpop.f32.mrf.mxu1  ;;  %v1857_v6 = vadd.f32 %v1856_v0, %v1816_v4  ;;  %v3947_v50 = vmax.f32 %v1855_v2, 0.0 }
 0x17d   :  { %v1818_v7 = vpop.f32.mrf.mxu0  ;;  %v3639_v62 = vld [vmem:[#allocation8 + $0x48] sm:$0xff]  }
 0x17e   :  { %v1859_v8 = vpop.f32.mrf.mxu1  ;;  %v3949_v10 = vmax.f32 %v1857_v6, 0.0  ;;  %v2052_v13 = vpack.c.bf16 %v3947_v50, %v3947_v50  ;;  %v3640_v6 = vld [vmem:[#allocation8 + $0x8] sm:$0xff]  }
 0x180   :  { %v2033_v11 = vcombine.low %v3947_v50, %v3949_v10  ;;  %v2053_v12 = vpack.c.bf16 %v3949_v10, %v3949_v10 }
 0x182   :  { %2484 = vmatprep.mubr.bf16.mxu0 %v2053_v12  ;;  %v2041_v2 = vrot.slane %v2033_v11, %v3872_v49 }
 0x183   :  { %2485 = vmatmul.mubr.bf16.vlgmr.msra.gmra.mxu0 %v2052_v13 }
 0x184   :  { %3110 = vmatpush3.bf16.msra.mxu0 %v3628_v25 }
 0x185   :  { %3111 = vmatprep.subr.bf16.mxu0 %v3629_v26 }
 0x188   :  { %3112 = vmatpush3.bf16.msra.mxu0 %v3630_v27 }
 0x189   :  { %3113 = vmatprep.subr.bf16.mxu0 %v3631_v28 }
 0x18c   :  { %3114 = vmatpush3.bf16.msra.mxu0 %v3632_v29 }
 0x18d   :  { %3115 = vmatprep.subr.bf16.mxu0 %v3633_v30 }
 0x190   :  { %3116 = vmatpush3.bf16.msra.mxu0 %v3634_v31 }
 0x191   :  { %3117 = vmatprep.subr.bf16.mxu0 %v3635_v34 }
 0x194   :  { %3118 = vmatpush3.bf16.msra.mxu0 %v3636_v35 }
 0x195   :  { %3119 = vmatprep.subr.bf16.mxu0 %v3637_v36 }
 0x198   :  { %3120 = vmatpush3.bf16.msra.mxu0 %v3638_v37 }
 0x199   :  { %3121 = vmatprep.subr.bf16.mxu0 %v3639_v62 }
 0x19c   :  { %3122 = vmatpush3.bf16.msra.mxu0 %v3640_v6 }
 0x19d   :  { %3123 = vmatprep.subr.bf16.mxu0 %v3641_v9 }
 0x1a0   :  { %3124 = vmatpush3.bf16.msra.mxu0 %v3642_v3 }
 0x1b7   :  { %v1895_v14 = vpop.f32.mrf.mxu0 }
 0x1b8   :  { %v1936_v15 = vpop.f32.mrf.mxu1  ;;  %v1896_v42 = vadd.f32 %v1895_v14, %v408_v40 }
 0x1b9   :  { %v1897_v18 = vpop.f32.mrf.mxu0 }
 0x1ba   :  { %v1938_v19 = vpop.f32.mrf.mxu1  ;;  %v1898_v44 = vadd.f32 %v1897_v18, %v412_v41  ;;  %v1937_v51 = vadd.f32 %v1936_v15, %v1896_v42 }
 0x1bb   :  { %v1899_v20 = vpop.f32.mrf.mxu0 }
 0x1bc   :  { %v1940_v21 = vpop.f32.mrf.mxu1  ;;  %v1939_v54 = vadd.f32 %v1938_v19, %v1898_v44 }
 0x1bd   :  { %v1900_v22 = vpop.f32.mrf.mxu0 }
 0x1be   :  { %v1941_v23 = vpop.f32.mrf.mxu1 }
 0x1f7   :  { %v1977_v52 = vpop.f32.mrf.mxu0 }
 0x1f8   :  { %v2018_v16 = vpop.f32.mrf.mxu1  ;;  %v1978_v17 = vadd.f32 %v1977_v52, %v1937_v51 }
 0x1f9   :  { %v1979_v55 = vpop.f32.mrf.mxu0 }
 0x1fa   :  { %v2020_v56 = vpop.f32.mrf.mxu1  ;;  %v2019_v58 = vadd.f32 %v2018_v16, %v1978_v17  ;;  %v1980_v59 = vadd.f32 %v1979_v55, %v1939_v54 }
 0x1fb   :  { %v1981_v32 = vpop.f32.mrf.mxu0 }
 0x1fc   :  { %v2022_v60 = vpop.f32.mrf.mxu1  ;;  %v2021_v33 = vadd.f32 %v2020_v56, %v1980_v59  ;;  %v2027_v53 = vmax.f32 %v2019_v58, 0.0 }
 0x1fd   :  { %v1982_v57 = vpop.f32.mrf.mxu0 }
 0x1fe   :  { %v2023_v61 = vpop.f32.mrf.mxu1  ;;  %v2028_v63 = vmax.f32 %v2021_v33, 0.0  ;;  %v2054_v1 = vpack.c.bf16 %v2027_v53, %v2027_v53 }
 0x200   :  { %v2034_v0 = vcombine.low %v2027_v53, %v2028_v63  ;;  %v2055_v46 = vpack.c.bf16 %v2028_v63, %v2028_v63 }
 0x202   :  { %v2048_v4 = vrot.slane %v2034_v0, %v3872_v49  ;;  %2525 = vmatprep.mubr.bf16.mxu1 %v2055_v46  ;;  %v2120_v49 = vld [vmem:[%s3990_s5] sm:$0x3]  ;;  %s3804_s5 = smov [#allocation11]  }
 0x203   :  { %2526 = vmatmul.mubr.bf16.vlgmr.msra.gmra.mxu1 %v2054_v1  ;;  %v2125_v50 = vrot.slane %v2120_v49, %v399_v45  ;;  %v2129_v10 = vrot.slane %v2120_v49, %v403_v47  ;;  %s2743_s13 = sshll.u32 %s3804_s5, 4  ;;  %s2744_s13 = int_to_ptr.vmem [resolvable:$true] %s2743_s13 }
 0x204   :  { %v2049_v48 = vcombine.low %v2041_v2, %v2048_v4  ;;  %s3723_s16 = scalar_lea.vmem %s2744_s13, 64  ;;  %p3728_p7 = scmp.lt.s32.totalorder %s2744_s13, %s2744_s13 }
 0x205   :  { %p3724_p6 = scmp.ne.s32.totalorder %s2744_s13, %s3723_s16  ;;  %p3729_p8 = scmp.lt.s32.totalorder %s3723_s16, %s3723_s16 }
 0x206   :  { %2051 = vst [vmem:[#allocation10] sm:$0xff] %v2049_v48 }
 0x207   :  { %p3730_p9 = por %p3729_p8, %p3728_p7 }
 0x209   :  { %p3731_p10 = pnand %p3730_p9, %p3724_p6 }
 0x243   :  { %v2486_v5 = vpop.f32.mrf.mxu0 }
 0x244   :  { %v2487_v11 = vadd.f32 %v2486_v5, %v2125_v50 }
 0x245   :  { %v2488_v7 = vpop.f32.mrf.mxu0 }
 0x246   :  { %v2489_v14 = vadd.f32 %v2488_v7, %v2129_v10 }
 0x247   :  { %v2490_v8 = vpop.f32.mrf.mxu0 }
 0x249   :  { %v2491_v12 = vpop.f32.mrf.mxu0 }
 0x2c3   :  { %v2527_v13 = vpop.f32.mrf.mxu1 }
 0x2c4   :  { %v2528_v15 = vadd.f32 %v2527_v13, %v2487_v11 }
 0x2c5   :  { %v2529_v18 = vpop.f32.mrf.mxu1 }
 0x2c6   :  { %v2530_v19 = vadd.f32 %v2529_v18, %v2489_v14  ;;  %v2534_v20 = vmax.f32 %v2528_v15, 0.0 }
 0x2c7   :  { %v2531_v21 = vpop.f32.mrf.mxu1 }
 0x2c8   :  { %v2535_v22 = vmax.f32 %v2530_v19, 0.0  ;;  %v2548_v26 = vpack.c.bf16 %v2534_v20, %v2534_v20 }
 0x2c9   :  { %v2532_v23 = vpop.f32.mrf.mxu1 }
 0x2ca   :  { %v2538_v24 = vcombine.low %v2534_v20, %v2535_v22  ;;  %v2549_v25 = vpack.c.bf16 %v2535_v22, %v2535_v22 }
 0x2cc   :  { %3091 = vst.sshfl [vmem:[#allocation11] sm:$0x33 pattern:$0x76325410] %v2538_v24  ;;  %2717 = vmatprep.mubr.bf16.mxu0 %v2549_v25 }
 0x2cd   :  { %2718 = vmatmul.mubr.bf16.vlgmr.msra.gmra.mxu0 %v2548_v26 }
 0x2ce   :  { %3734 = shalt.err (!%p3731_p10)
}
 0x2cf   :  { %2746 = dma.vmem_to_hbm [thread:$0]  %s2744_s13, 64, %s3993_s8, [#allocation12]  }
 0x2d0   :  { %s3743_s19 = scalar_lea.vmem %s2734_s15, 128  ;;  %p3748_p12 = scmp.lt.s32.totalorder %s2734_s15, %s2734_s15 }
 0x2d1   :  { %p3744_p11 = scmp.ne.s32.totalorder %s2734_s15, %s3743_s19  ;;  %p3749_p13 = scmp.lt.s32.totalorder %s3743_s19, %s3743_s19 }
 0x2d3   :  { %p3750_p0 = por %p3749_p13, %p3748_p12 }
 0x2d5   :  { %p3751_p1 = pnand %p3750_p0, %p3744_p11 }
 0x2d7   :  { %3754 = shalt.err (!%p3751_p1)
}
 0x2d8   :  { %2736 = dma.vmem_to_hbm [thread:$0]  %s2734_s15, 128, %s3992_s7, [#allocation4]   ;;  %v3092_v45 = vld [vmem:[%s3991_s6] ss:$0 sm:$0xff] }
 0x2d9   :  { %s3806_s8 = smov [#allocation13]  }
 0x2da   :  { %s2753_s1 = sshll.u32 %s3806_s8, 4  ;;  %s2754_s1 = int_to_ptr.vmem [resolvable:$true] %s2753_s1 }
 0x2db   :  { %s3763_s24 = scalar_lea.vmem %s2754_s1, 32  ;;  %p3768_p3 = scmp.lt.s32.totalorder %s2754_s1, %s2754_s1 }
 0x2dc   :  { %p3764_p2 = scmp.ne.s32.totalorder %s2754_s1, %s3763_s24  ;;  %p3769_p4 = scmp.lt.s32.totalorder %s3763_s24, %s3763_s24 }
 0x2de   :  { %p3770_p5 = por %p3769_p4, %p3768_p3 }
 0x2e0   :  { %p3771_p6 = pnand %p3770_p5, %p3764_p2 }
 0x38d   :  { %v3125_v43 = vpop.f32.mrf.mxu0 }
 0x38f   :  { %v3126_v47 = vpop.f32.mrf.mxu0 }
 0x390   :  { %v3127_v27 = vadd.f32 %v3126_v47, %v3125_v43 }
 0x391   :  { %v3128_v28 = vpop.f32.mrf.mxu0 }
 0x392   :  { %v2720_v29 = vadd.f32 %v3127_v27, %v3092_v45 }
 0x393   :  { %v3129_v30 = vpop.f32.mrf.mxu0 }
 0x394   :  { %v2725_v31 = vmax.f32 %v2720_v29, 0.0 }
 0x396   :  { %2726 = vst [vmem:[#allocation13] sm:$0x3] %v2725_v31 }
 0x397   :  { %3774 = shalt.err (!%p3771_p6)
}
 0x398   :  { %2756 = dma.vmem_to_hbm [thread:$0]  %s2754_s1, 32, %s3994_s9, [#allocation12]  }
 0x399   :  { %3789 = dma.done.wait [#allocation4], 128  }
 0x39a   :  { %3790 = vsyncadd [#allocation4], 4294967168 }
 0x39b   :  { %3791 = dma.done.wait [#allocation12], 96  }
 0x39c   :  { %3792 = vsyncadd [#allocation12], 4294967200 }
 0x39d   :  { %2766 = vsyncpa [#allocation3], 1 }
 0x39e   :  { %2767 = vsyncpa [#allocation6], 1 }
 0x39f   :  { %2768 = vsyncpa [#allocation9], 1 }
 0x3a0   :  { %2769 = vsyncpa [#allocation4], 1 }
 0x3a1   :  { %2770 = vsyncpa [#allocation12], 1 }

// kernel: tpu_custom_call.1
= control target key start
LH: loop header
LB: loop body
LE: loop exit
PB: predicated region body
PF: predicated region fallthrough
CT: control target
= control target key end

     0   :  { %15 = vsyncpa [#allocation3], 0  ;;  %s3985_s0 = inlined_call_operand.hbm [shape: f32[2,1024], index: 0, kind: input, shape index: {}]   ;;  %s3986_s1 = inlined_call_operand.hbm [shape: bf16[1024,512], index: 1, kind: input, shape index: {}]   ;;  %s3987_s2 = inlined_call_operand.hbm [shape: bf16[512,256], index: 2, kind: input, shape index: {}]   ;;  %s3988_s3 = inlined_call_operand.hbm [shape: bf16[256,128], index: 3, kind: input, shape index: {}]   ;;  %s3989_s4 = inlined_call_operand.vmem [shape: f32[1,512], index: 4, kind: input, shape index: {}]   ;;  %s3990_s5 = inlined_call_operand.vmem [shape: f32[1,256], index: 5, kind: input, shape index: {}]   ;;  %s3991_s6 = inlined_call_operand.vmem [shape: f32[1,128], index: 6, kind: input, shape index: {}]   ;;  %s3992_s7 = inlined_call_operand.hbm [shape: f32[2,512], index: 7, kind: output, shape index: {0}]   ;;  %s3993_s8 = inlined_call_operand.hbm [shape: f32[2,256], index: 8, kind: output, shape index: {1}]   ;;  %s3994_s9 = inlined_call_operand.hbm [shape: f32[2,128], index: 9, kind: output, shape index: {2}]  }
   0x1   :  { %16 = vsyncpa [#allocation6], 0 }
   0x2   :  { %17 = vsyncpa [#allocation9], 0 }
   0x3   :  { %18 = vsyncpa [#allocation4], 0 }
   0x4   :  { %19 = vsyncpa [#allocation12], 0  ;;  %s3793_s30 = smov [#allocation5]  }
   0x5   :  { %s35_s10 = sshll.u32 %s3793_s30, 4  ;;  %s36_s10 = int_to_ptr.vmem [resolvable:$true] %s35_s10 }
   0x6   :  { %s3651_s11 = scalar_lea.vmem %s36_s10, 32768  ;;  %p3656_p1 = scmp.lt.s32.totalorder %s36_s10, %s36_s10 }
   0x7   :  { %p3652_p0 = scmp.ne.s32.totalorder %s36_s10, %s3651_s11  ;;  %p3657_p2 = scmp.lt.s32.totalorder %s3651_s11, %s3651_s11 }
   0x9   :  { %p3658_p3 = por %p3657_p2, %p3656_p1 }
   0xb   :  { %p3659_p4 = pnand %p3658_p3, %p3652_p0 }
   0xd   :  { %3662 = shalt.err (!%p3659_p4)
}
   0xe   :  { %s3794_s12 = smov 256   ;;  %s3795_s13 = smov 16  }
   0xf   :  { %41 = dma.hbm_to_vmem [thread:$0]  %s3986_s1, 32768, %s36_s10, [#allocation6], %s3794_s12, %s3794_s12, %s3795_s13  }
  0x10   :  { %s3796_s16 = smov [#allocation2]   ;;  %s3797_s18 = smov [#allocation7]  }
  0x11   :  { %s26_s17 = sshll.u32 %s3796_s16, 4  ;;  %s47_s19 = sshll.u32 %s3797_s18, 4  ;;  %s27_s17 = int_to_ptr.vmem [resolvable:$true] %s26_s17  ;;  %s48_s19 = int_to_ptr.vmem [resolvable:$true] %s47_s19 }
  0x12   :  { %s3671_s20 = scalar_lea.vmem %s27_s17, 256  ;;  %p3676_p6 = scmp.lt.s32.totalorder %s27_s17, %s27_s17 }
  0x13   :  { %p3672_p5 = scmp.ne.s32.totalorder %s27_s17, %s3671_s20  ;;  %p3677_p7 = scmp.lt.s32.totalorder %s3671_s20, %s3671_s20 }
  0x15   :  { %p3678_p8 = por %p3677_p7, %p3676_p6 }
  0x17   :  { %p3679_p9 = pnand %p3678_p8, %p3672_p5 }
  0x19   :  { %3682 = shalt.err (!%p3679_p9)
}
  0x1a   :  { %29 = dma.hbm_to_vmem [thread:$0]  %s3985_s0, 256, %s27_s17, [#allocation3]  }
  0x1b   :  { %s3691_s23 = scalar_lea.vmem %s48_s19, 8192  ;;  %p3696_p11 = scmp.lt.s32.totalorder %s48_s19, %s48_s19 }
  0x1c   :  { %p3692_p10 = scmp.ne.s32.totalorder %s48_s19, %s3691_s23  ;;  %p3697_p12 = scmp.lt.s32.totalorder %s3691_s23, %s3691_s23 }
  0x1e   :  { %p3698_p13 = por %p3697_p12, %p3696_p11 }
  0x20   :  { %p3699_p0 = pnand %p3698_p13, %p3692_p10 }
  0x22   :  { %3702 = shalt.err (!%p3699_p0)
}
  0x23   :  { %s3798_s1 = smov 128   ;;  %s3799_s24 = smov 8  }
  0x24   :  { %53 = dma.hbm_to_vmem [thread:$0]  %s3987_s2, 8192, %s48_s19, [#allocation6], %s3798_s1, %s3798_s1, %s3799_s24  }
  0x25   :  { %s3800_s27 = smov [#allocation8]  }
  0x26   :  { %s59_s28 = sshll.u32 %s3800_s27, 4  ;;  %s60_s28 = int_to_ptr.vmem [resolvable:$true] %s59_s28 }
  0x27   :  { %s3711_s29 = scalar_lea.vmem %s60_s28, 2048  ;;  %p3716_p2 = scmp.lt.s32.totalorder %s60_s28, %s60_s28 }
  0x28   :  { %p3712_p1 = scmp.ne.s32.totalorder %s60_s28, %s3711_s29  ;;  %p3717_p3 = scmp.lt.s32.totalorder %s3711_s29, %s3711_s29 }
  0x2a   :  { %p3718_p4 = por %p3717_p3, %p3716_p2 }
  0x2c   :  { %p3719_p5 = pnand %p3718_p4, %p3712_p1 }
  0x2e   :  { %3722 = shalt.err (!%p3719_p5)
}
  0x2f   :  { %s3801_s0 = smov 64   ;;  %s3802_s30 = smov 4  }
  0x30   :  { %65 = dma.hbm_to_vmem [thread:$0]  %s3988_s3, 2048, %s60_s28, [#allocation9], %s3801_s0, %s3801_s0, %s3802_s30  }
  0x31   :  { %3783 = dma.done.wait [#allocation3], 256  }
  0x32   :  { %3784 = vsyncadd [#allocation3], 4294967040 }
  0x33   :  { %3785 = dma.done.wait [#allocation6], 40960  }
  0x34   :  { %3786 = vsyncadd [#allocation6], 4294926336 }
  0x35   :  { %3787 = dma.done.wait [#allocation9], 2048  }
  0x36   :  { %3788 = vsyncadd [#allocation9], 4294965248  ;;  %v3145_v0 = vld [vmem:[#allocation5 + $0xe4] ss:$16 sps:$4 sm:$0xff]   ;;  %v3149_v2 = vld [vmem:[#allocation5 + $0xe0] ss:$16 sps:$4 sm:$0xff]   ;;  %v93_v38 = vlaneseq }
  0x37   :  { %v3147_v1 = vld [vmem:[#allocation5 + $0x2e4] ss:$16 sps:$4 sm:$0xff]   ;;  %1697 = vmatprep.subr.bf16.mxu0 %v3145_v0  ;;  %v3150_v3 = vld [vmem:[#allocation5 + $0x2e0] ss:$16 sps:$4 sm:$0xff]   ;;  %v3803_v36 = vmov 1983009808  }
  0x38   :  { %1738 = vmatprep.subr.bf16.mxu1 %v3147_v1  ;;  %v3151_v4 = vld [vmem:[#allocation5 + $0xc4] ss:$16 sps:$4 sm:$0xff]   ;;  %1698 = vmatpush1.bf16.msra.mxu0 %v3149_v2  ;;  %v3155_v6 = vld [vmem:[#allocation5 + $0xc0] ss:$16 sps:$4 sm:$0xff]   ;;  %v91_v37 = vunpack.c.l.s4 %v3803_v36  ;;  %v3869_v43 = vshrl.u32 %v93_v38, 7  ;;  %s3805_s14 = smov [#allocation10]  }
  0x39   :  { %1739 = vmatpush1.bf16.msra.mxu1 %v3150_v3  ;;  %v3153_v5 = vld [vmem:[#allocation5 + $0x2c4] ss:$16 sps:$4 sm:$0xff]   ;;  %1699 = vmatprep.subr.bf16.mxu0 %v3151_v4  ;;  %v3156_v7 = vld [vmem:[#allocation5 + $0x2c0] ss:$16 sps:$4 sm:$0xff]   ;;  %s2733_s15 = sshll.u32 %s3805_s14, 4  ;;  %s2734_s15 = int_to_ptr.vmem [resolvable:$true] %s2733_s15 }
  0x3a   :  { %1740 = vmatprep.subr.bf16.mxu1 %v3153_v5  ;;  %v3157_v8 = vld [vmem:[#allocation5 + $0xa4] ss:$16 sps:$4 sm:$0xff]   ;;  %v3161_v10 = vld [vmem:[#allocation5 + $0xa0] ss:$16 sps:$4 sm:$0xff]   ;;  %v92_v42 = vunpack.c.0.s8 %v91_v37 }
  0x3b   :  { %v3159_v9 = vld [vmem:[#allocation5 + $0x2a4] ss:$16 sps:$4 sm:$0xff]   ;;  %v3162_v11 = vld [vmem:[#allocation5 + $0x2a0] ss:$16 sps:$4 sm:$0xff]  }
  0x3c   :  { %1700 = vmatpush1.bf16.msra.mxu0 %v3155_v6  ;;  %v3163_v12 = vld [vmem:[#allocation5 + $0x84] ss:$16 sps:$4 sm:$0xff]   ;;  %v3167_v14 = vld [vmem:[#allocation5 + $0x80] ss:$16 sps:$4 sm:$0xff]   ;;  %v3872_v49 = vsub.s32 %v92_v42, %v3869_v43  ;;  %v86_v42 = vld [vmem:[#allocation2 + $0x8] sm:$0xff] }
  0x3d   :  { %1741 = vmatpush1.bf16.msra.mxu1 %v3156_v7  ;;  %1701 = vmatprep.subr.bf16.mxu0 %v3157_v8  ;;  %v3165_v13 = vld [vmem:[#allocation5 + $0x284] ss:$16 sps:$4 sm:$0xff]   ;;  %v3168_v15 = vld [vmem:[#allocation5 + $0x280] ss:$16 sps:$4 sm:$0xff]  }
  0x3e   :  { %1742 = vmatprep.subr.bf16.mxu1 %v3159_v9  ;;  %v3169_v16 = vld [vmem:[#allocation5 + $0x64] ss:$16 sps:$4 sm:$0xff]   ;;  %v3173_v18 = vld [vmem:[#allocation5 + $0x60] ss:$16 sps:$4 sm:$0xff]  }
  0x3f   :  { %v3171_v17 = vld [vmem:[#allocation5 + $0x264] ss:$16 sps:$4 sm:$0xff]   ;;  %v3174_v19 = vld [vmem:[#allocation5 + $0x260] ss:$16 sps:$4 sm:$0xff]  }
  0x40   :  { %1702 = vmatpush1.bf16.msra.mxu0 %v3161_v10  ;;  %v3175_v20 = vld [vmem:[#allocation5 + $0x44] ss:$16 sps:$4 sm:$0xff]   ;;  %v3179_v22 = vld [vmem:[#allocation5 + $0x40] ss:$16 sps:$4 sm:$0xff]  }
  0x41   :  { %1743 = vmatpush1.bf16.msra.mxu1 %v3162_v11  ;;  %1703 = vmatprep.subr.bf16.mxu0 %v3163_v12  ;;  %v3177_v21 = vld [vmem:[#allocation5 + $0x244] ss:$16 sps:$4 sm:$0xff]   ;;  %v3180_v23 = vld [vmem:[#allocation5 + $0x240] ss:$16 sps:$4 sm:$0xff]  }
  0x42   :  { %1744 = vmatprep.subr.bf16.mxu1 %v3165_v13  ;;  %v3181_v24 = vld [vmem:[#allocation5 + $0x24] ss:$16 sps:$4 sm:$0xff]   ;;  %v3185_v26 = vld [vmem:[#allocation5 + $0x20] ss:$16 sps:$4 sm:$0xff]  }
  0x43   :  { %v3183_v25 = vld [vmem:[#allocation5 + $0x224] ss:$16 sps:$4 sm:$0xff]   ;;  %v3186_v27 = vld [vmem:[#allocation5 + $0x220] ss:$16 sps:$4 sm:$0xff]  }
  0x44   :  { %1704 = vmatpush1.bf16.msra.mxu0 %v3167_v14  ;;  %v3187_v28 = vld [vmem:[#allocation5 + $0x4] ss:$16 sps:$4 sm:$0xff]   ;;  %v3191_v30 = vld [vmem:[#allocation5] ss:$16 sps:$4 sm:$0xff]  }
  0x45   :  { %1745 = vmatpush1.bf16.msra.mxu1 %v3168_v15  ;;  %1705 = vmatprep.subr.bf16.mxu0 %v3169_v16  ;;  %v3189_v29 = vld [vmem:[#allocation5 + $0x204] ss:$16 sps:$4 sm:$0xff]   ;;  %v3192_v31 = vld [vmem:[#allocation5 + $0x200] ss:$16 sps:$4 sm:$0xff]  }
  0x46   :  { %1746 = vmatprep.subr.bf16.mxu1 %v3171_v17  ;;  %v3193_v32 = vld [vmem:[#allocation5 + $0x1e4] ss:$16 sps:$4 sm:$0xff]   ;;  %v3197_v34 = vld [vmem:[#allocation5 + $0x1e0] ss:$16 sps:$4 sm:$0xff]  }
  0x47   :  { %v3195_v33 = vld [vmem:[#allocation5 + $0x3e4] ss:$16 sps:$4 sm:$0xff]   ;;  %v3198_v35 = vld [vmem:[#allocation5 + $0x3e0] ss:$16 sps:$4 sm:$0xff]  }
  0x48   :  { %1706 = vmatpush1.bf16.msra.mxu0 %v3173_v18  ;;  %v3199_v39 = vld [vmem:[#allocation5 + $0x1c4] ss:$16 sps:$4 sm:$0xff]   ;;  %v3203_v41 = vld [vmem:[#allocation5 + $0x1c0] ss:$16 sps:$4 sm:$0xff]  }
  0x49   :  { %1747 = vmatpush1.bf16.msra.mxu1 %v3174_v19  ;;  %1707 = vmatprep.subr.bf16.mxu0 %v3175_v20  ;;  %v3201_v40 = vld [vmem:[#allocation5 + $0x3c4] ss:$16 sps:$4 sm:$0xff]   ;;  %v3204_v44 = vld [vmem:[#allocation5 + $0x3c0] ss:$16 sps:$4 sm:$0xff]  }
  0x4a   :  { %1748 = vmatprep.subr.bf16.mxu1 %v3177_v21  ;;  %v3205_v45 = vld [vmem:[#allocation5 + $0x1a4] ss:$16 sps:$4 sm:$0xff]   ;;  %v3209_v47 = vld [vmem:[#allocation5 + $0x1a0] ss:$16 sps:$4 sm:$0xff]  }
  0x4b   :  { %v3207_v46 = vld [vmem:[#allocation5 + $0x3a4] ss:$16 sps:$4 sm:$0xff]   ;;  %v3210_v48 = vld [vmem:[#allocation5 + $0x3a0] ss:$16 sps:$4 sm:$0xff]  }
  0x4c   :  { %1708 = vmatpush1.bf16.msra.mxu0 %v3179_v22  ;;  %v3211_v50 = vld [vmem:[#allocation5 + $0x184] ss:$16 sps:$4 sm:$0xff]   ;;  %v3215_v53 = vld [vmem:[#allocation5 + $0x180] ss:$16 sps:$4 sm:$0xff]  }
  0x4d   :  { %1749 = vmatpush1.bf16.msra.mxu1 %v3180_v23  ;;  %1709 = vmatprep.subr.bf16.mxu0 %v3181_v24  ;;  %v3213_v51 = vld [vmem:[#allocation5 + $0x384] ss:$16 sps:$4 sm:$0xff]   ;;  %v3216_v56 = vld [vmem:[#allocation5 + $0x380] ss:$16 sps:$4 sm:$0xff]  }
  0x4e   :  { %1750 = vmatprep.subr.bf16.mxu1 %v3183_v25  ;;  %v85_v52 = vld [vmem:[#allocation2] sm:$0xff] }
  0x4f   :  { %v96_v54 = vrot.slane %v85_v52, %v3872_v49  ;;  %v89_v55 = vcombine.high %v85_v52, %v85_v52  ;;  %v3217_v57 = vld [vmem:[#allocation5 + $0x164] ss:$16 sps:$4 sm:$0xff]   ;;  %v3221_v61 = vld [vmem:[#allocation5 + $0x160] ss:$16 sps:$4 sm:$0xff]  }
  0x50   :  { %1710 = vmatpush1.bf16.msra.mxu0 %v3185_v26  ;;  %v3219_v58 = vld [vmem:[#allocation5 + $0x364] ss:$16 sps:$4 sm:$0xff]   ;;  %v3222_v0 = vld [vmem:[#allocation5 + $0x360] ss:$16 sps:$4 sm:$0xff]  }
  0x51   :  { %1751 = vmatpush1.bf16.msra.mxu1 %v3186_v27  ;;  %1711 = vmatprep.subr.bf16.mxu0 %v3187_v28  ;;  %v104_v59 = vcombine.high %v96_v54, %v96_v54  ;;  %v103_v60 = vrot.slane %v89_v55, %v3872_v49  ;;  %v3223_v1 = vld [vmem:[#allocation5 + $0x144] ss:$16 sps:$4 sm:$0xff]   ;;  %v3227_v4 = vld [vmem:[#allocation5 + $0x140] ss:$16 sps:$4 sm:$0xff]   ;;  %v3882_v16 = vpack.c.bf16 %v96_v54, %v96_v54 }
  0x52   :  { %1752 = vmatprep.subr.bf16.mxu1 %v3189_v29  ;;  %v3225_v2 = vld [vmem:[#allocation5 + $0x344] ss:$16 sps:$4 sm:$0xff]   ;;  %v3228_v5 = vld [vmem:[#allocation5 + $0x340] ss:$16 sps:$4 sm:$0xff]  }
  0x53   :  { %v3876_v62 = vpack.c.bf16 %v104_v59, %v104_v59  ;;  %v105_v63 = vcombine.high %v103_v60, %v103_v60  ;;  %v3229_v6 = vld [vmem:[#allocation5 + $0x124] ss:$16 sps:$4 sm:$0xff]   ;;  %v3233_v8 = vld [vmem:[#allocation5 + $0x120] ss:$16 sps:$4 sm:$0xff]   ;;  %v3884_v17 = vpack.c.bf16 %v103_v60, %v103_v60 }
  0x54   :  { %1712 = vmatpush1.bf16.msra.mxu0 %v3191_v30  ;;  %v3231_v7 = vld [vmem:[#allocation5 + $0x324] ss:$16 sps:$4 sm:$0xff]   ;;  %v3234_v9 = vld [vmem:[#allocation5 + $0x320] ss:$16 sps:$4 sm:$0xff]  }
  0x55   :  { %1753 = vmatpush1.bf16.msra.mxu1 %v3192_v31  ;;  %1713 = vmatprep.subr.bf16.mxu0 %v3193_v32  ;;  %v3878_v3 = vpack.c.bf16 %v105_v63, %v105_v63  ;;  %v3235_v10 = vld [vmem:[#allocation5 + $0x104] ss:$16 sps:$4 sm:$0xff]   ;;  %v3239_v12 = vld [vmem:[#allocation5 + $0x100] ss:$16 sps:$4 sm:$0xff]  }
  0x56   :  { %1754 = vmatprep.subr.bf16.mxu1 %v3195_v33  ;;  %1729 = vmatprep.mubr.bf16.mxu0 %v3876_v62  ;;  %v3237_v11 = vld [vmem:[#allocation5 + $0x304] ss:$16 sps:$4 sm:$0xff]   ;;  %v3240_v13 = vld [vmem:[#allocation5 + $0x300] ss:$16 sps:$4 sm:$0xff]  }
  0x57   :  { %1770 = vmatprep.mubr.bf16.mxu1 %v3878_v3  ;;  %v3244_v14 = vld [vmem:[#allocation5 + $0x4e4] ss:$16 sps:$4 sm:$0xff]   ;;  %v3242_v18 = vld [vmem:[#allocation5 + $0x4e0] ss:$16 sps:$4 sm:$0xff]  }
  0x58   :  { %1714 = vmatpush2.bf16.msra.mxu0 %v3197_v34  ;;  %v3247_v15 = vld [vmem:[#allocation5 + $0x6e4] ss:$16 sps:$4 sm:$0xff]   ;;  %v3245_v19 = vld [vmem:[#allocation5 + $0x6e0] ss:$16 sps:$4 sm:$0xff]  }
  0x59   :  { %1755 = vmatpush2.bf16.msra.mxu1 %v3198_v35  ;;  %1715 = vmatprep.subr.bf16.mxu0 %v3199_v39  ;;  %v3250_v20 = vld [vmem:[#allocation5 + $0x4c4] ss:$16 sps:$4 sm:$0xff]   ;;  %v3248_v22 = vld [vmem:[#allocation5 + $0x4c0] ss:$16 sps:$4 sm:$0xff]  }
  0x5a   :  { %1756 = vmatprep.subr.bf16.mxu1 %v3201_v40  ;;  %v3253_v21 = vld [vmem:[#allocation5 + $0x6c4] ss:$16 sps:$4 sm:$0xff]   ;;  %v3251_v23 = vld [vmem:[#allocation5 + $0x6c0] ss:$16 sps:$4 sm:$0xff]  }
  0x5b   :  { %v3256_v24 = vld [vmem:[#allocation5 + $0x4a4] ss:$16 sps:$4 sm:$0xff]   ;;  %v3254_v26 = vld [vmem:[#allocation5 + $0x4a0] ss:$16 sps:$4 sm:$0xff]  }
  0x5c   :  { %1716 = vmatpush2.bf16.msra.mxu0 %v3203_v41  ;;  %v3259_v25 = vld [vmem:[#allocation5 + $0x6a4] ss:$16 sps:$4 sm:$0xff]   ;;  %v3257_v27 = vld [vmem:[#allocation5 + $0x6a0] ss:$16 sps:$4 sm:$0xff]  }
  0x5d   :  { %1757 = vmatpush2.bf16.msra.mxu1 %v3204_v44  ;;  %1717 = vmatprep.subr.bf16.mxu0 %v3205_v45  ;;  %v3262_v28 = vld [vmem:[#allocation5 + $0x484] ss:$16 sps:$4 sm:$0xff]   ;;  %v3260_v30 = vld [vmem:[#allocation5 + $0x480] ss:$16 sps:$4 sm:$0xff]   ;;  %v3889_v44 = vrot.slane %v86_v42, %v3872_v49  ;;  %v106_v45 = vcombine.high %v86_v42, %v86_v42  ;;  %v3351_v42 = vld [vmem:[#allocation5 + $0xa8] ss:$16 sps:$4 sm:$0xff]  }
  0x5e   :  { %1758 = vmatprep.subr.bf16.mxu1 %v3207_v46  ;;  %v3265_v29 = vld [vmem:[#allocation5 + $0x684] ss:$16 sps:$4 sm:$0xff]   ;;  %v3263_v31 = vld [vmem:[#allocation5 + $0x680] ss:$16 sps:$4 sm:$0xff]  }
  0x5f   :  { %v3268_v32 = vld [vmem:[#allocation5 + $0x464] ss:$16 sps:$4 sm:$0xff]   ;;  %v3266_v34 = vld [vmem:[#allocation5 + $0x460] ss:$16 sps:$4 sm:$0xff]  }
  0x60   :  { %1718 = vmatpush2.bf16.msra.mxu0 %v3209_v47  ;;  %v3271_v33 = vld [vmem:[#allocation5 + $0x664] ss:$16 sps:$4 sm:$0xff]   ;;  %v3269_v35 = vld [vmem:[#allocation5 + $0x660] ss:$16 sps:$4 sm:$0xff]  }
  0x61   :  { %1759 = vmatpush2.bf16.msra.mxu1 %v3210_v48  ;;  %1719 = vmatprep.subr.bf16.mxu0 %v3211_v50  ;;  %v3274_v36 = vld [vmem:[#allocation5 + $0x444] ss:$16 sps:$4 sm:$0xff]   ;;  %v3272_v38 = vld [vmem:[#allocation5 + $0x440] ss:$16 sps:$4 sm:$0xff]   ;;  %v121_v48 = vcombine.high %v3889_v44, %v3889_v44  ;;  %v3894_v50 = vrot.slane %v106_v45, %v3872_v49  ;;  %v3359_v45 = vld [vmem:[#allocation5 + $0x8c] ss:$16 sps:$4 sm:$0xff]  }
  0x62   :  { %1760 = vmatprep.subr.bf16.mxu1 %v3213_v51  ;;  %v3277_v37 = vld [vmem:[#allocation5 + $0x644] ss:$16 sps:$4 sm:$0xff]   ;;  %v3275_v39 = vld [vmem:[#allocation5 + $0x640] ss:$16 sps:$4 sm:$0xff]  }
  0x63   :  { %v3280_v40 = vld [vmem:[#allocation5 + $0x424] ss:$16 sps:$4 sm:$0xff]   ;;  %v3278_v46 = vld [vmem:[#allocation5 + $0x420] ss:$16 sps:$4 sm:$0xff]   ;;  %v122_v54 = vcombine.high %v3894_v50, %v3894_v50 }
  0x64   :  { %1720 = vmatpush2.bf16.msra.mxu0 %v3215_v53  ;;  %v3283_v41 = vld [vmem:[#allocation5 + $0x624] ss:$16 sps:$4 sm:$0xff]   ;;  %v3281_v47 = vld [vmem:[#allocation5 + $0x620] ss:$16 sps:$4 sm:$0xff]   ;;  %v3896_v53 = vpack.c.bf16 %v121_v48, %v121_v48  ;;  %v3360_v48 = vld [vmem:[#allocation5 + $0x288] ss:$16 sps:$4 sm:$0xff]  }
  0x65   :  { %1761 = vmatpush2.bf16.msra.mxu1 %v3216_v56  ;;  %1721 = vmatprep.subr.bf16.mxu0 %v3217_v57  ;;  %v3286_v51 = vld [vmem:[#allocation5 + $0x404] ss:$16 sps:$4 sm:$0xff]   ;;  %v3284_v55 = vld [vmem:[#allocation5 + $0x400] ss:$16 sps:$4 sm:$0xff]   ;;  %v3900_v57 = vpack.c.bf16 %v122_v54, %v122_v54  ;;  %v3374_v54 = vld [vmem:[#allocation5 + $0x24c] ss:$16 sps:$4 sm:$0xff]  }
  0x66   :  { %1762 = vmatprep.subr.bf16.mxu1 %v3219_v58  ;;  %v3289_v52 = vld [vmem:[#allocation5 + $0x604] ss:$16 sps:$4 sm:$0xff]   ;;  %v3287_v56 = vld [vmem:[#allocation5 + $0x600] ss:$16 sps:$4 sm:$0xff]  }
  0x67   :  { %v3292_v58 = vld [vmem:[#allocation5 + $0x5e4] ss:$16 sps:$4 sm:$0xff]   ;;  %v3290_v60 = vld [vmem:[#allocation5 + $0x5e0] ss:$16 sps:$4 sm:$0xff]  }
  0x68   :  { %1722 = vmatpush2.bf16.msra.mxu0 %v3221_v61  ;;  %v3295_v59 = vld [vmem:[#allocation5 + $0x7e4] ss:$16 sps:$4 sm:$0xff]   ;;  %v3293_v61 = vld [vmem:[#allocation5 + $0x7e0] ss:$16 sps:$4 sm:$0xff]  }
  0x69   :  { %1763 = vmatpush2.bf16.msra.mxu1 %v3222_v0  ;;  %1723 = vmatprep.subr.bf16.mxu0 %v3223_v1  ;;  %v3298_v63 = vld [vmem:[#allocation5 + $0x5c4] ss:$16 sps:$4 sm:$0xff]   ;;  %v3296_v1 = vld [vmem:[#allocation5 + $0x5c0] ss:$16 sps:$4 sm:$0xff]  }
  0x6a   :  { %1764 = vmatprep.subr.bf16.mxu1 %v3225_v2  ;;  %v3301_v0 = vld [vmem:[#allocation5 + $0x7c4] ss:$16 sps:$4 sm:$0xff]   ;;  %v3299_v2 = vld [vmem:[#allocation5 + $0x7c0] ss:$16 sps:$4 sm:$0xff]  }
  0x6c   :  { %1724 = vmatpush2.bf16.msra.mxu0 %v3227_v4  ;;  %v3304_v4 = vld [vmem:[#allocation5 + $0x5a4] ss:$16 sps:$4 sm:$0xff]  }
  0x6d   :  { %1765 = vmatpush2.bf16.msra.mxu1 %v3228_v5  ;;  %1725 = vmatprep.subr.bf16.mxu0 %v3229_v6  ;;  %v3307_v5 = vld [vmem:[#allocation5 + $0x7a4] ss:$16 sps:$4 sm:$0xff]   ;;  %v3302_v6 = vld [vmem:[#allocation5 + $0x5a0] ss:$16 sps:$4 sm:$0xff]  }
  0x6e   :  { %1766 = vmatprep.subr.bf16.mxu1 %v3231_v7  ;;  %v3305_v7 = vld [vmem:[#allocation5 + $0x7a0] ss:$16 sps:$4 sm:$0xff]  }
  0x70   :  { %1726 = vmatpush2.bf16.msra.mxu0 %v3233_v8  ;;  %v3310_v8 = vld [vmem:[#allocation5 + $0x584] ss:$16 sps:$4 sm:$0xff]  }
  0x71   :  { %1767 = vmatpush2.bf16.msra.mxu1 %v3234_v9  ;;  %1727 = vmatprep.subr.bf16.mxu0 %v3235_v10  ;;  %v3313_v9 = vld [vmem:[#allocation5 + $0x784] ss:$16 sps:$4 sm:$0xff]   ;;  %v3308_v10 = vld [vmem:[#allocation5 + $0x580] ss:$16 sps:$4 sm:$0xff]  }
  0x72   :  { %1768 = vmatprep.subr.bf16.mxu1 %v3237_v11  ;;  %v3311_v11 = vld [vmem:[#allocation5 + $0x780] ss:$16 sps:$4 sm:$0xff]  }
  0x74   :  { %1728 = vmatpush2.bf16.msra.mxu0 %v3239_v12  ;;  %v3316_v12 = vld [vmem:[#allocation5 + $0x564] ss:$16 sps:$4 sm:$0xff]  }
  0x75   :  { %1769 = vmatpush2.bf16.msra.mxu1 %v3240_v13  ;;  %1779 = vmatprep.subr.bf16.mxu0 %v3244_v14  ;;  %v3319_v13 = vld [vmem:[#allocation5 + $0x764] ss:$16 sps:$4 sm:$0xff]   ;;  %v3314_v14 = vld [vmem:[#allocation5 + $0x560] ss:$16 sps:$4 sm:$0xff]  }
  0x76   :  { %1820 = vmatprep.subr.bf16.mxu1 %v3247_v15  ;;  %v3317_v15 = vld [vmem:[#allocation5 + $0x760] ss:$16 sps:$4 sm:$0xff]  }
  0x77   :  { %1730 = vmatmul.mubr.bf16.vlgmr.msra.gmra.mxu0 %v3882_v16 }
  0x78   :  { %1771 = vmatmul.mubr.bf16.vlgmr.msra.gmra.mxu1 %v3884_v17  ;;  %1780 = vmatpush1.bf16.msra.mxu0 %v3242_v18  ;;  %v3322_v18 = vld [vmem:[#allocation5 + $0x544] ss:$16 sps:$4 sm:$0xff]  }
  0x79   :  { %1821 = vmatpush1.bf16.msra.mxu1 %v3245_v19  ;;  %1781 = vmatprep.subr.bf16.mxu0 %v3250_v20  ;;  %v3325_v19 = vld [vmem:[#allocation5 + $0x744] ss:$16 sps:$4 sm:$0xff]   ;;  %v3320_v20 = vld [vmem:[#allocation5 + $0x540] ss:$16 sps:$4 sm:$0xff]  }
  0x7a   :  { %1822 = vmatprep.subr.bf16.mxu1 %v3253_v21  ;;  %1811 = vmatprep.mubr.bf16.mxu0 %v3896_v53  ;;  %v3323_v21 = vld [vmem:[#allocation5 + $0x740] ss:$16 sps:$4 sm:$0xff]  }
  0x7b   :  { %1852 = vmatprep.mubr.bf16.mxu1 %v3900_v57 }
  0x7c   :  { %1782 = vmatpush1.bf16.msra.mxu0 %v3248_v22  ;;  %v3328_v22 = vld [vmem:[#allocation5 + $0x524] ss:$16 sps:$4 sm:$0xff]  }
  0x7d   :  { %1823 = vmatpush1.bf16.msra.mxu1 %v3251_v23  ;;  %1783 = vmatprep.subr.bf16.mxu0 %v3256_v24  ;;  %v3331_v23 = vld [vmem:[#allocation5 + $0x724] ss:$16 sps:$4 sm:$0xff]   ;;  %v3326_v24 = vld [vmem:[#allocation5 + $0x520] ss:$16 sps:$4 sm:$0xff]  }
  0x7e   :  { %1824 = vmatprep.subr.bf16.mxu1 %v3259_v25  ;;  %v3329_v25 = vld [vmem:[#allocation5 + $0x720] ss:$16 sps:$4 sm:$0xff]  }
  0x80   :  { %1784 = vmatpush1.bf16.msra.mxu0 %v3254_v26  ;;  %v3334_v26 = vld [vmem:[#allocation5 + $0x504] ss:$16 sps:$4 sm:$0xff]  }
  0x81   :  { %1825 = vmatpush1.bf16.msra.mxu1 %v3257_v27  ;;  %1785 = vmatprep.subr.bf16.mxu0 %v3262_v28  ;;  %v3337_v27 = vld [vmem:[#allocation5 + $0x704] ss:$16 sps:$4 sm:$0xff]   ;;  %v3332_v28 = vld [vmem:[#allocation5 + $0x500] ss:$16 sps:$4 sm:$0xff]  }
  0x82   :  { %1826 = vmatprep.subr.bf16.mxu1 %v3265_v29  ;;  %v3335_v29 = vld [vmem:[#allocation5 + $0x700] ss:$16 sps:$4 sm:$0xff]  }
  0x84   :  { %1786 = vmatpush1.bf16.msra.mxu0 %v3260_v30  ;;  %v3341_v30 = vld [vmem:[#allocation5 + $0xec] ss:$16 sps:$4 sm:$0xff]  }
  0x85   :  { %1827 = vmatpush1.bf16.msra.mxu1 %v3263_v31  ;;  %1787 = vmatprep.subr.bf16.mxu0 %v3268_v32  ;;  %v3344_v31 = vld [vmem:[#allocation5 + $0x2ec] ss:$16 sps:$4 sm:$0xff]   ;;  %v3906_v32 = vpack.c.bf16 %v3889_v44, %v3889_v44  ;;  %v3354_v44 = vld [vmem:[#allocation5 + $0x2a8] ss:$16 sps:$4 sm:$0xff]  }
  0x86   :  { %1828 = vmatprep.subr.bf16.mxu1 %v3271_v33  ;;  %v3910_v33 = vpack.c.bf16 %v3894_v50, %v3894_v50  ;;  %v3365_v50 = vld [vmem:[#allocation5 + $0x6c] ss:$16 sps:$4 sm:$0xff]  }
  0x88   :  { %1788 = vmatpush1.bf16.msra.mxu0 %v3266_v34  ;;  %v3339_v34 = vld [vmem:[#allocation5 + $0xe8] ss:$16 sps:$4 sm:$0xff]  }
  0x89   :  { %1829 = vmatpush1.bf16.msra.mxu1 %v3269_v35  ;;  %1789 = vmatprep.subr.bf16.mxu0 %v3274_v36  ;;  %v3342_v35 = vld [vmem:[#allocation5 + $0x2e8] ss:$16 sps:$4 sm:$0xff]   ;;  %v3347_v36 = vld [vmem:[#allocation5 + $0xcc] ss:$16 sps:$4 sm:$0xff]  }
  0x8a   :  { %1830 = vmatprep.subr.bf16.mxu1 %v3277_v37  ;;  %v3350_v37 = vld [vmem:[#allocation5 + $0x2cc] ss:$16 sps:$4 sm:$0xff]  }
  0x8c   :  { %1790 = vmatpush1.bf16.msra.mxu0 %v3272_v38  ;;  %v3345_v38 = vld [vmem:[#allocation5 + $0xc8] ss:$16 sps:$4 sm:$0xff]  }
  0x8d   :  { %1831 = vmatpush1.bf16.msra.mxu1 %v3275_v39  ;;  %1791 = vmatprep.subr.bf16.mxu0 %v3280_v40  ;;  %v3348_v39 = vld [vmem:[#allocation5 + $0x2c8] ss:$16 sps:$4 sm:$0xff]   ;;  %v3353_v40 = vld [vmem:[#allocation5 + $0xac] ss:$16 sps:$4 sm:$0xff]  }
  0x8e   :  { %1832 = vmatprep.subr.bf16.mxu1 %v3283_v41  ;;  %v3356_v41 = vld [vmem:[#allocation5 + $0x2ac] ss:$16 sps:$4 sm:$0xff]  }
  0x90   :  { %1792 = vmatpush1.bf16.msra.mxu0 %v3278_v46  ;;  %v3362_v46 = vld [vmem:[#allocation5 + $0x28c] ss:$16 sps:$4 sm:$0xff]  }
  0x91   :  { %1833 = vmatpush1.bf16.msra.mxu1 %v3281_v47  ;;  %1793 = vmatprep.subr.bf16.mxu0 %v3286_v51  ;;  %v3357_v47 = vld [vmem:[#allocation5 + $0x88] ss:$16 sps:$4 sm:$0xff]   ;;  %v3368_v51 = vld [vmem:[#allocation5 + $0x26c] ss:$16 sps:$4 sm:$0xff]  }
  0x92   :  { %1834 = vmatprep.subr.bf16.mxu1 %v3289_v52  ;;  %v3371_v52 = vld [vmem:[#allocation5 + $0x4c] ss:$16 sps:$4 sm:$0xff]  }
  0x94   :  { %1794 = vmatpush1.bf16.msra.mxu0 %v3284_v55  ;;  %v3369_v55 = vld [vmem:[#allocation5 + $0x48] ss:$16 sps:$4 sm:$0xff]  }
  0x95   :  { %1835 = vmatpush1.bf16.msra.mxu1 %v3287_v56  ;;  %1795 = vmatprep.subr.bf16.mxu0 %v3292_v58  ;;  %v3372_v56 = vld [vmem:[#allocation5 + $0x248] ss:$16 sps:$4 sm:$0xff]   ;;  %v3377_v58 = vld [vmem:[#allocation5 + $0x2c] ss:$16 sps:$4 sm:$0xff]  }
  0x96   :  { %1836 = vmatprep.subr.bf16.mxu1 %v3295_v59  ;;  %v3380_v59 = vld [vmem:[#allocation5 + $0x22c] ss:$16 sps:$4 sm:$0xff]  }
  0x98   :  { %1796 = vmatpush2.bf16.msra.mxu0 %v3290_v60  ;;  %v3375_v60 = vld [vmem:[#allocation5 + $0x28] ss:$16 sps:$4 sm:$0xff]  }
  0x99   :  { %1837 = vmatpush2.bf16.msra.mxu1 %v3293_v61  ;;  %1797 = vmatprep.subr.bf16.mxu0 %v3298_v63  ;;  %v3378_v61 = vld [vmem:[#allocation5 + $0x228] ss:$16 sps:$4 sm:$0xff]   ;;  %v3383_v63 = vld [vmem:[#allocation5 + $0xc] ss:$16 sps:$4 sm:$0xff]  }
  0x9a   :  { %1838 = vmatprep.subr.bf16.mxu1 %v3301_v0  ;;  %v3386_v0 = vld [vmem:[#allocation5 + $0x20c] ss:$16 sps:$4 sm:$0xff]  }
  0x9c   :  { %1798 = vmatpush2.bf16.msra.mxu0 %v3296_v1  ;;  %v3381_v1 = vld [vmem:[#allocation5 + $0x8] ss:$16 sps:$4 sm:$0xff]  }
  0x9d   :  { %1839 = vmatpush2.bf16.msra.mxu1 %v3299_v2  ;;  %1799 = vmatprep.subr.bf16.mxu0 %v3304_v4  ;;  %v3384_v2 = vld [vmem:[#allocation5 + $0x208] ss:$16 sps:$4 sm:$0xff]   ;;  %v3389_v4 = vld [vmem:[#allocation5 + $0x1ec] ss:$16 sps:$4 sm:$0xff]  }
  0x9e   :  { %1840 = vmatprep.subr.bf16.mxu1 %v3307_v5  ;;  %v3392_v5 = vld [vmem:[#allocation5 + $0x3ec] ss:$16 sps:$4 sm:$0xff]  }
  0xa0   :  { %1800 = vmatpush2.bf16.msra.mxu0 %v3302_v6  ;;  %v3387_v6 = vld [vmem:[#allocation5 + $0x1e8] ss:$16 sps:$4 sm:$0xff]  }
  0xa1   :  { %1841 = vmatpush2.bf16.msra.mxu1 %v3305_v7  ;;  %1801 = vmatprep.subr.bf16.mxu0 %v3310_v8  ;;  %v3390_v7 = vld [vmem:[#allocation5 + $0x3e8] ss:$16 sps:$4 sm:$0xff]   ;;  %v3395_v8 = vld [vmem:[#allocation5 + $0x1cc] ss:$16 sps:$4 sm:$0xff]  }
  0xa2   :  { %1842 = vmatprep.subr.bf16.mxu1 %v3313_v9  ;;  %v3398_v9 = vld [vmem:[#allocation5 + $0x3cc] ss:$16 sps:$4 sm:$0xff]  }
  0xa4   :  { %1802 = vmatpush2.bf16.msra.mxu0 %v3308_v10  ;;  %v3393_v10 = vld [vmem:[#allocation5 + $0x1c8] ss:$16 sps:$4 sm:$0xff]  }
  0xa5   :  { %1843 = vmatpush2.bf16.msra.mxu1 %v3311_v11  ;;  %1803 = vmatprep.subr.bf16.mxu0 %v3316_v12  ;;  %v3396_v11 = vld [vmem:[#allocation5 + $0x3c8] ss:$16 sps:$4 sm:$0xff]   ;;  %v3401_v12 = vld [vmem:[#allocation5 + $0x1ac] ss:$16 sps:$4 sm:$0xff]  }
  0xa6   :  { %1844 = vmatprep.subr.bf16.mxu1 %v3319_v13  ;;  %v3404_v13 = vld [vmem:[#allocation5 + $0x3ac] ss:$16 sps:$4 sm:$0xff]  }
  0xa8   :  { %1804 = vmatpush2.bf16.msra.mxu0 %v3314_v14  ;;  %v3399_v14 = vld [vmem:[#allocation5 + $0x1a8] ss:$16 sps:$4 sm:$0xff]  }
  0xa9   :  { %1845 = vmatpush2.bf16.msra.mxu1 %v3317_v15  ;;  %1805 = vmatprep.subr.bf16.mxu0 %v3322_v18  ;;  %v3402_v15 = vld [vmem:[#allocation5 + $0x3a8] ss:$16 sps:$4 sm:$0xff]   ;;  %v3407_v18 = vld [vmem:[#allocation5 + $0x18c] ss:$16 sps:$4 sm:$0xff]  }
  0xaa   :  { %1846 = vmatprep.subr.bf16.mxu1 %v3325_v19  ;;  %v3410_v19 = vld [vmem:[#allocation5 + $0x38c] ss:$16 sps:$4 sm:$0xff]  }
  0xac   :  { %1806 = vmatpush2.bf16.msra.mxu0 %v3320_v20  ;;  %v3405_v20 = vld [vmem:[#allocation5 + $0x188] ss:$16 sps:$4 sm:$0xff]  }
  0xad   :  { %1847 = vmatpush2.bf16.msra.mxu1 %v3323_v21  ;;  %1807 = vmatprep.subr.bf16.mxu0 %v3328_v22  ;;  %v3408_v21 = vld [vmem:[#allocation5 + $0x388] ss:$16 sps:$4 sm:$0xff]   ;;  %v3413_v22 = vld [vmem:[#allocation5 + $0x16c] ss:$16 sps:$4 sm:$0xff]  }
  0xae   :  { %1848 = vmatprep.subr.bf16.mxu1 %v3331_v23  ;;  %v3416_v23 = vld [vmem:[#allocation5 + $0x36c] ss:$16 sps:$4 sm:$0xff]  }
  0xb0   :  { %1808 = vmatpush2.bf16.msra.mxu0 %v3326_v24  ;;  %v3411_v24 = vld [vmem:[#allocation5 + $0x168] ss:$16 sps:$4 sm:$0xff]  }
  0xb1   :  { %1849 = vmatpush2.bf16.msra.mxu1 %v3329_v25  ;;  %1809 = vmatprep.subr.bf16.mxu0 %v3334_v26  ;;  %v3414_v25 = vld [vmem:[#allocation5 + $0x368] ss:$16 sps:$4 sm:$0xff]   ;;  %v3419_v26 = vld [vmem:[#allocation5 + $0x14c] ss:$16 sps:$4 sm:$0xff]  }
  0xb2   :  { %1850 = vmatprep.subr.bf16.mxu1 %v3337_v27  ;;  %v3422_v27 = vld [vmem:[#allocation5 + $0x34c] ss:$16 sps:$4 sm:$0xff]  }
  0xb4   :  { %1810 = vmatpush2.bf16.msra.mxu0 %v3332_v28  ;;  %v3417_v28 = vld [vmem:[#allocation5 + $0x148] ss:$16 sps:$4 sm:$0xff]  }
  0xb5   :  { %1851 = vmatpush2.bf16.msra.mxu1 %v3335_v29  ;;  %1861 = vmatprep.subr.bf16.mxu0 %v3341_v30  ;;  %v3420_v29 = vld [vmem:[#allocation5 + $0x348] ss:$16 sps:$4 sm:$0xff]   ;;  %v3425_v30 = vld [vmem:[#allocation5 + $0x12c] ss:$16 sps:$4 sm:$0xff]  }
  0xb6   :  { %1902 = vmatprep.subr.bf16.mxu1 %v3344_v31  ;;  %v3428_v31 = vld [vmem:[#allocation5 + $0x32c] ss:$16 sps:$4 sm:$0xff]  }
  0xb7   :  { %1812 = vmatmul.mubr.bf16.vlgmr.msra.gmra.mxu0 %v3906_v32 }
  0xb8   :  { %1853 = vmatmul.mubr.bf16.vlgmr.msra.gmra.mxu1 %v3910_v33  ;;  %1862 = vmatpush1.bf16.msra.mxu0 %v3339_v34  ;;  %v3423_v34 = vld [vmem:[#allocation5 + $0x128] ss:$16 sps:$4 sm:$0xff]  }
  0xb9   :  { %1903 = vmatpush1.bf16.msra.mxu1 %v3342_v35  ;;  %1863 = vmatprep.subr.bf16.mxu0 %v3347_v36  ;;  %v3426_v35 = vld [vmem:[#allocation5 + $0x328] ss:$16 sps:$4 sm:$0xff]   ;;  %v3431_v36 = vld [vmem:[#allocation5 + $0x10c] ss:$16 sps:$4 sm:$0xff]  }
  0xba   :  { %1904 = vmatprep.subr.bf16.mxu1 %v3350_v37  ;;  %1893 = vmatprep.mubr.bf16.mxu0 %v3876_v62  ;;  %v3363_v62 = vld [vmem:[#allocation5 + $0x68] ss:$16 sps:$4 sm:$0xff]   ;;  %v3434_v37 = vld [vmem:[#allocation5 + $0x30c] ss:$16 sps:$4 sm:$0xff]  }
  0xbb   :  { %1934 = vmatprep.mubr.bf16.mxu1 %v3878_v3  ;;  %v3366_v3 = vld [vmem:[#allocation5 + $0x268] ss:$16 sps:$4 sm:$0xff]  }
  0xbc   :  { %1864 = vmatpush1.bf16.msra.mxu0 %v3345_v38  ;;  %v3429_v38 = vld [vmem:[#allocation5 + $0x108] ss:$16 sps:$4 sm:$0xff]  }
  0xbd   :  { %1905 = vmatpush1.bf16.msra.mxu1 %v3348_v39  ;;  %1865 = vmatprep.subr.bf16.mxu0 %v3353_v40  ;;  %v3432_v39 = vld [vmem:[#allocation5 + $0x308] ss:$16 sps:$4 sm:$0xff]   ;;  %v3437_v40 = vld [vmem:[#allocation5 + $0x4ec] ss:$16 sps:$4 sm:$0xff]  }
  0xbe   :  { %1906 = vmatprep.subr.bf16.mxu1 %v3356_v41  ;;  %v3440_v41 = vld [vmem:[#allocation5 + $0x6ec] ss:$16 sps:$4 sm:$0xff]  }
  0xc0   :  { %1866 = vmatpush1.bf16.msra.mxu0 %v3351_v42  ;;  %v3435_v42 = vld [vmem:[#allocation5 + $0x4e8] ss:$16 sps:$4 sm:$0xff]  }
  0xc1   :  { %1907 = vmatpush1.bf16.msra.mxu1 %v3354_v44  ;;  %1867 = vmatprep.subr.bf16.mxu0 %v3359_v45  ;;  %v3438_v44 = vld [vmem:[#allocation5 + $0x6e8] ss:$16 sps:$4 sm:$0xff]   ;;  %v3443_v45 = vld [vmem:[#allocation5 + $0x4cc] ss:$16 sps:$4 sm:$0xff]  }
  0xc2   :  { %1908 = vmatprep.subr.bf16.mxu1 %v3362_v46  ;;  %v3446_v46 = vld [vmem:[#allocation5 + $0x6cc] ss:$16 sps:$4 sm:$0xff]  }
  0xc4   :  { %1868 = vmatpush1.bf16.msra.mxu0 %v3357_v47  ;;  %v3441_v47 = vld [vmem:[#allocation5 + $0x4c8] ss:$16 sps:$4 sm:$0xff]  }
  0xc5   :  { %1909 = vmatpush1.bf16.msra.mxu1 %v3360_v48  ;;  %1869 = vmatprep.subr.bf16.mxu0 %v3365_v50  ;;  %v3444_v48 = vld [vmem:[#allocation5 + $0x6c8] ss:$16 sps:$4 sm:$0xff]   ;;  %v3449_v50 = vld [vmem:[#allocation5 + $0x4ac] ss:$16 sps:$4 sm:$0xff]  }
  0xc6   :  { %1910 = vmatprep.subr.bf16.mxu1 %v3368_v51  ;;  %v3452_v51 = vld [vmem:[#allocation5 + $0x6ac] ss:$16 sps:$4 sm:$0xff]  }
  0xc8   :  { %1870 = vmatpush1.bf16.msra.mxu0 %v3363_v62  ;;  %v3447_v62 = vld [vmem:[#allocation5 + $0x4a8] ss:$16 sps:$4 sm:$0xff]  }
  0xc9   :  { %1911 = vmatpush1.bf16.msra.mxu1 %v3366_v3  ;;  %1871 = vmatprep.subr.bf16.mxu0 %v3371_v52  ;;  %v3450_v3 = vld [vmem:[#allocation5 + $0x6a8] ss:$16 sps:$4 sm:$0xff]   ;;  %v3455_v52 = vld [vmem:[#allocation5 + $0x48c] ss:$16 sps:$4 sm:$0xff]  }
  0xca   :  { %1912 = vmatprep.subr.bf16.mxu1 %v3374_v54  ;;  %v3453_v54 = vld [vmem:[#allocation5 + $0x488] ss:$16 sps:$4 sm:$0xff]  }
  0xcc   :  { %1872 = vmatpush1.bf16.msra.mxu0 %v3369_v55  ;;  %v3461_v55 = vld [vmem:[#allocation5 + $0x46c] ss:$16 sps:$4 sm:$0xff]  }
  0xcd   :  { %1913 = vmatpush1.bf16.msra.mxu1 %v3372_v56  ;;  %1873 = vmatprep.subr.bf16.mxu0 %v3377_v58  ;;  %v3464_v56 = vld [vmem:[#allocation5 + $0x66c] ss:$16 sps:$4 sm:$0xff]   ;;  %v3459_v58 = vld [vmem:[#allocation5 + $0x468] ss:$16 sps:$4 sm:$0xff]  }
  0xce   :  { %1914 = vmatprep.subr.bf16.mxu1 %v3380_v59  ;;  %v3462_v59 = vld [vmem:[#allocation5 + $0x668] ss:$16 sps:$4 sm:$0xff]  }
  0xd0   :  { %1874 = vmatpush1.bf16.msra.mxu0 %v3375_v60  ;;  %v3467_v60 = vld [vmem:[#allocation5 + $0x44c] ss:$16 sps:$4 sm:$0xff]  }
  0xd1   :  { %1915 = vmatpush1.bf16.msra.mxu1 %v3378_v61  ;;  %1875 = vmatprep.subr.bf16.mxu0 %v3383_v63  ;;  %v3468_v61 = vld [vmem:[#allocation5 + $0x648] ss:$16 sps:$4 sm:$0xff]   ;;  %v3473_v63 = vld [vmem:[#allocation5 + $0x42c] ss:$16 sps:$4 sm:$0xff]  }
  0xd2   :  { %1916 = vmatprep.subr.bf16.mxu1 %v3386_v0  ;;  %v3476_v0 = vld [vmem:[#allocation5 + $0x62c] ss:$16 sps:$4 sm:$0xff]  }
  0xd4   :  { %1876 = vmatpush1.bf16.msra.mxu0 %v3381_v1  ;;  %v3471_v1 = vld [vmem:[#allocation5 + $0x428] ss:$16 sps:$4 sm:$0xff]  }
  0xd5   :  { %1917 = vmatpush1.bf16.msra.mxu1 %v3384_v2  ;;  %1877 = vmatprep.subr.bf16.mxu0 %v3389_v4  ;;  %v3474_v2 = vld [vmem:[#allocation5 + $0x628] ss:$16 sps:$4 sm:$0xff]   ;;  %v3479_v4 = vld [vmem:[#allocation5 + $0x40c] ss:$16 sps:$4 sm:$0xff]  }
  0xd6   :  { %1918 = vmatprep.subr.bf16.mxu1 %v3392_v5  ;;  %v3482_v5 = vld [vmem:[#allocation5 + $0x60c] ss:$16 sps:$4 sm:$0xff]  }
  0xd8   :  { %1878 = vmatpush2.bf16.msra.mxu0 %v3387_v6  ;;  %v3477_v6 = vld [vmem:[#allocation5 + $0x408] ss:$16 sps:$4 sm:$0xff]  }
  0xd9   :  { %1919 = vmatpush2.bf16.msra.mxu1 %v3390_v7  ;;  %1879 = vmatprep.subr.bf16.mxu0 %v3395_v8  ;;  %v3480_v7 = vld [vmem:[#allocation5 + $0x608] ss:$16 sps:$4 sm:$0xff]   ;;  %v3485_v8 = vld [vmem:[#allocation5 + $0x5ec] ss:$16 sps:$4 sm:$0xff]  }
  0xda   :  { %1920 = vmatprep.subr.bf16.mxu1 %v3398_v9  ;;  %v3488_v9 = vld [vmem:[#allocation5 + $0x7ec] ss:$16 sps:$4 sm:$0xff]  }
  0xdc   :  { %1880 = vmatpush2.bf16.msra.mxu0 %v3393_v10  ;;  %v3483_v10 = vld [vmem:[#allocation5 + $0x5e8] ss:$16 sps:$4 sm:$0xff]  }
  0xdd   :  { %1921 = vmatpush2.bf16.msra.mxu1 %v3396_v11  ;;  %1881 = vmatprep.subr.bf16.mxu0 %v3401_v12  ;;  %v3486_v11 = vld [vmem:[#allocation5 + $0x7e8] ss:$16 sps:$4 sm:$0xff]   ;;  %v3491_v12 = vld [vmem:[#allocation5 + $0x5cc] ss:$16 sps:$4 sm:$0xff]  }
  0xde   :  { %1922 = vmatprep.subr.bf16.mxu1 %v3404_v13  ;;  %v3494_v13 = vld [vmem:[#allocation5 + $0x7cc] ss:$16 sps:$4 sm:$0xff]  }
  0xe0   :  { %1882 = vmatpush2.bf16.msra.mxu0 %v3399_v14  ;;  %v3489_v14 = vld [vmem:[#allocation5 + $0x5c8] ss:$16 sps:$4 sm:$0xff]  }
  0xe1   :  { %1923 = vmatpush2.bf16.msra.mxu1 %v3402_v15  ;;  %1883 = vmatprep.subr.bf16.mxu0 %v3407_v18  ;;  %v3492_v15 = vld [vmem:[#allocation5 + $0x7c8] ss:$16 sps:$4 sm:$0xff]   ;;  %v3497_v18 = vld [vmem:[#allocation5 + $0x5ac] ss:$16 sps:$4 sm:$0xff]  }
  0xe2   :  { %1924 = vmatprep.subr.bf16.mxu1 %v3410_v19  ;;  %v3500_v19 = vld [vmem:[#allocation5 + $0x7ac] ss:$16 sps:$4 sm:$0xff]  }
  0xe4   :  { %1884 = vmatpush2.bf16.msra.mxu0 %v3405_v20  ;;  %v3495_v20 = vld [vmem:[#allocation5 + $0x5a8] ss:$16 sps:$4 sm:$0xff]  }
  0xe5   :  { %1925 = vmatpush2.bf16.msra.mxu1 %v3408_v21  ;;  %1885 = vmatprep.subr.bf16.mxu0 %v3413_v22  ;;  %v3498_v21 = vld [vmem:[#allocation5 + $0x7a8] ss:$16 sps:$4 sm:$0xff]   ;;  %v3503_v22 = vld [vmem:[#allocation5 + $0x58c] ss:$16 sps:$4 sm:$0xff]  }
  0xe6   :  { %1926 = vmatprep.subr.bf16.mxu1 %v3416_v23  ;;  %v3506_v23 = vld [vmem:[#allocation5 + $0x78c] ss:$16 sps:$4 sm:$0xff]  }
  0xe8   :  { %1886 = vmatpush2.bf16.msra.mxu0 %v3411_v24  ;;  %v3501_v24 = vld [vmem:[#allocation5 + $0x588] ss:$16 sps:$4 sm:$0xff]  }
  0xe9   :  { %1927 = vmatpush2.bf16.msra.mxu1 %v3414_v25  ;;  %1887 = vmatprep.subr.bf16.mxu0 %v3419_v26  ;;  %v3504_v25 = vld [vmem:[#allocation5 + $0x788] ss:$16 sps:$4 sm:$0xff]   ;;  %v3509_v26 = vld [vmem:[#allocation5 + $0x56c] ss:$16 sps:$4 sm:$0xff]  }
  0xea   :  { %1928 = vmatprep.subr.bf16.mxu1 %v3422_v27  ;;  %v3512_v27 = vld [vmem:[#allocation5 + $0x76c] ss:$16 sps:$4 sm:$0xff]  }
  0xec   :  { %1888 = vmatpush2.bf16.msra.mxu0 %v3417_v28  ;;  %v3507_v28 = vld [vmem:[#allocation5 + $0x568] ss:$16 sps:$4 sm:$0xff]  }
  0xed   :  { %1929 = vmatpush2.bf16.msra.mxu1 %v3420_v29  ;;  %1889 = vmatprep.subr.bf16.mxu0 %v3425_v30  ;;  %v3510_v29 = vld [vmem:[#allocation5 + $0x768] ss:$16 sps:$4 sm:$0xff]   ;;  %v3515_v30 = vld [vmem:[#allocation5 + $0x54c] ss:$16 sps:$4 sm:$0xff]  }
  0xee   :  { %1930 = vmatprep.subr.bf16.mxu1 %v3428_v31  ;;  %v3518_v31 = vld [vmem:[#allocation5 + $0x74c] ss:$16 sps:$4 sm:$0xff]  }
  0xf0   :  { %1890 = vmatpush2.bf16.msra.mxu0 %v3423_v34  ;;  %v3513_v34 = vld [vmem:[#allocation5 + $0x548] ss:$16 sps:$4 sm:$0xff]  }
  0xf1   :  { %1931 = vmatpush2.bf16.msra.mxu1 %v3426_v35  ;;  %1891 = vmatprep.subr.bf16.mxu0 %v3431_v36  ;;  %v3516_v35 = vld [vmem:[#allocation5 + $0x748] ss:$16 sps:$4 sm:$0xff]   ;;  %v3521_v36 = vld [vmem:[#allocation5 + $0x52c] ss:$16 sps:$4 sm:$0xff]  }
  0xf2   :  { %1932 = vmatprep.subr.bf16.mxu1 %v3434_v37  ;;  %v3524_v37 = vld [vmem:[#allocation5 + $0x72c] ss:$16 sps:$4 sm:$0xff]  }
  0xf4   :  { %1892 = vmatpush2.bf16.msra.mxu0 %v3429_v38  ;;  %v3519_v38 = vld [vmem:[#allocation5 + $0x528] ss:$16 sps:$4 sm:$0xff]  }
  0xf5   :  { %1933 = vmatpush2.bf16.msra.mxu1 %v3432_v39  ;;  %1943 = vmatprep.subr.bf16.mxu0 %v3437_v40  ;;  %v3522_v39 = vld [vmem:[#allocation5 + $0x728] ss:$16 sps:$4 sm:$0xff]   ;;  %v3527_v40 = vld [vmem:[#allocation5 + $0x50c] ss:$16 sps:$4 sm:$0xff]  }
  0xf6   :  { %1984 = vmatprep.subr.bf16.mxu1 %v3440_v41  ;;  %v3530_v41 = vld [vmem:[#allocation5 + $0x70c] ss:$16 sps:$4 sm:$0xff]  }
  0xf7   :  { %1894 = vmatmul.mubr.bf16.vlgmr.msra.gmra.mxu0 %v3882_v16  ;;  %v3458_v16 = vld [vmem:[#allocation5 + $0x68c] ss:$16 sps:$4 sm:$0xff]  }
  0xf8   :  { %1935 = vmatmul.mubr.bf16.vlgmr.msra.gmra.mxu1 %v3884_v17  ;;  %1944 = vmatpush1.bf16.msra.mxu0 %v3435_v42  ;;  %v3456_v17 = vld [vmem:[#allocation5 + $0x688] ss:$16 sps:$4 sm:$0xff]  }
  0xf9   :  { %1985 = vmatpush1.bf16.msra.mxu1 %v3438_v44  ;;  %1945 = vmatprep.subr.bf16.mxu0 %v3443_v45  ;;  %v3525_v42 = vld [vmem:[#allocation5 + $0x508] ss:$16 sps:$4 sm:$0xff]   ;;  %v3533_v45 = vld [vmem:[#allocation7 + $0x74] ss:$8 sps:$4 sm:$0xff]  }
  0xfa   :  { %1986 = vmatprep.subr.bf16.mxu1 %v3446_v46  ;;  %1975 = vmatprep.mubr.bf16.mxu0 %v3896_v53  ;;  %v3470_v53 = vld [vmem:[#allocation5 + $0x64c] ss:$16 sps:$4 sm:$0xff]   ;;  %v3528_v44 = vld [vmem:[#allocation5 + $0x708] ss:$16 sps:$4 sm:$0xff]  }
  0xfb   :  { %2016 = vmatprep.mubr.bf16.mxu1 %v3900_v57  ;;  %v3465_v57 = vld [vmem:[#allocation5 + $0x448] ss:$16 sps:$4 sm:$0xff]  }
  0xfc   :  { %1946 = vmatpush1.bf16.msra.mxu0 %v3441_v47  ;;  %v3531_v46 = vld [vmem:[#allocation7 + $0x70] ss:$8 sps:$4 sm:$0xff]   ;;  %v3536_v47 = vld [vmem:[#allocation7 + $0x64] ss:$8 sps:$4 sm:$0xff]  }
  0xfd   :  { %1987 = vmatpush1.bf16.msra.mxu1 %v3444_v48  ;;  %1947 = vmatprep.subr.bf16.mxu0 %v3449_v50 }
  0xfe   :  { %1988 = vmatprep.subr.bf16.mxu1 %v3452_v51  ;;  %v3534_v51 = vld [vmem:[#allocation7 + $0x60] ss:$8 sps:$4 sm:$0xff]  }
 0x100   :  { %1948 = vmatpush1.bf16.msra.mxu0 %v3447_v62 }
 0x101   :  { %1989 = vmatpush1.bf16.msra.mxu1 %v3450_v3  ;;  %1949 = vmatprep.subr.bf16.mxu0 %v3455_v52  ;;  %v3539_v52 = vld [vmem:[#allocation7 + $0x54] ss:$8 sps:$4 sm:$0xff]  }
 0x102   :  { %1990 = vmatprep.subr.bf16.mxu1 %v3458_v16 }
 0x104   :  { %1950 = vmatpush1.bf16.msra.mxu0 %v3453_v54 }
 0x105   :  { %1991 = vmatpush1.bf16.msra.mxu1 %v3456_v17  ;;  %1951 = vmatprep.subr.bf16.mxu0 %v3461_v55  ;;  %v3537_v17 = vld [vmem:[#allocation7 + $0x50] ss:$8 sps:$4 sm:$0xff]  }
 0x106   :  { %1992 = vmatprep.subr.bf16.mxu1 %v3464_v56 }
 0x108   :  { %1952 = vmatpush1.bf16.msra.mxu0 %v3459_v58  ;;  %v3542_v58 = vld [vmem:[#allocation7 + $0x44] ss:$8 sps:$4 sm:$0xff]  }
 0x109   :  { %1993 = vmatpush1.bf16.msra.mxu1 %v3462_v59  ;;  %1953 = vmatprep.subr.bf16.mxu0 %v3467_v60  ;;  %v3579_v59 = vld [vmem:[#allocation7 + $0x170] ss:$8 sps:$4 sm:$0xff]   ;;  %v3584_v60 = vld [vmem:[#allocation7 + $0x164] ss:$8 sps:$4 sm:$0xff]  }
 0x10a   :  { %1994 = vmatprep.subr.bf16.mxu1 %v3470_v53  ;;  %v3582_v53 = vld [vmem:[#allocation7 + $0x160] ss:$8 sps:$4 sm:$0xff]  }
 0x10c   :  { %1954 = vmatpush1.bf16.msra.mxu0 %v3465_v57  ;;  %v3545_v57 = vld [vmem:[#allocation7 + $0x34] ss:$8 sps:$4 sm:$0xff]  }
 0x10d   :  { %1995 = vmatpush1.bf16.msra.mxu1 %v3468_v61  ;;  %1955 = vmatprep.subr.bf16.mxu0 %v3473_v63  ;;  %v3587_v61 = vld [vmem:[#allocation7 + $0x154] ss:$8 sps:$4 sm:$0xff]   ;;  %v3543_v63 = vld [vmem:[#allocation7 + $0x30] ss:$8 sps:$4 sm:$0xff]  }
 0x10e   :  { %1996 = vmatprep.subr.bf16.mxu1 %v3476_v0  ;;  %v3585_v0 = vld [vmem:[#allocation7 + $0x150] ss:$8 sps:$4 sm:$0xff]  }
 0x110   :  { %1956 = vmatpush1.bf16.msra.mxu0 %v3471_v1  ;;  %v3548_v1 = vld [vmem:[#allocation7 + $0x24] ss:$8 sps:$4 sm:$0xff]  }
 0x111   :  { %1997 = vmatpush1.bf16.msra.mxu1 %v3474_v2  ;;  %1957 = vmatprep.subr.bf16.mxu0 %v3479_v4  ;;  %v3590_v2 = vld [vmem:[#allocation7 + $0x144] ss:$8 sps:$4 sm:$0xff]   ;;  %v3546_v4 = vld [vmem:[#allocation7 + $0x20] ss:$8 sps:$4 sm:$0xff]  }
 0x112   :  { %1998 = vmatprep.subr.bf16.mxu1 %v3482_v5  ;;  %v3588_v5 = vld [vmem:[#allocation7 + $0x140] ss:$8 sps:$4 sm:$0xff]  }
 0x114   :  { %1958 = vmatpush1.bf16.msra.mxu0 %v3477_v6  ;;  %v3551_v6 = vld [vmem:[#allocation7 + $0x14] ss:$8 sps:$4 sm:$0xff]  }
 0x115   :  { %1999 = vmatpush1.bf16.msra.mxu1 %v3480_v7  ;;  %1959 = vmatprep.subr.bf16.mxu0 %v3485_v8  ;;  %v3593_v7 = vld [vmem:[#allocation7 + $0x134] ss:$8 sps:$4 sm:$0xff]   ;;  %v3549_v8 = vld [vmem:[#allocation7 + $0x10] ss:$8 sps:$4 sm:$0xff]  }
 0x116   :  { %2000 = vmatprep.subr.bf16.mxu1 %v3488_v9  ;;  %v3591_v9 = vld [vmem:[#allocation7 + $0x130] ss:$8 sps:$4 sm:$0xff]  }
 0x118   :  { %1960 = vmatpush2.bf16.msra.mxu0 %v3483_v10  ;;  %v3554_v10 = vld [vmem:[#allocation7 + $0x4] ss:$8 sps:$4 sm:$0xff]  }
 0x119   :  { %2001 = vmatpush2.bf16.msra.mxu1 %v3486_v11  ;;  %1961 = vmatprep.subr.bf16.mxu0 %v3491_v12  ;;  %v3596_v11 = vld [vmem:[#allocation7 + $0x124] ss:$8 sps:$4 sm:$0xff]   ;;  %v3552_v12 = vld [vmem:[#allocation7] ss:$8 sps:$4 sm:$0xff]  }
 0x11a   :  { %2002 = vmatprep.subr.bf16.mxu1 %v3494_v13  ;;  %v3594_v13 = vld [vmem:[#allocation7 + $0x120] ss:$8 sps:$4 sm:$0xff]  }
 0x11c   :  { %1962 = vmatpush2.bf16.msra.mxu0 %v3489_v14  ;;  %v3557_v14 = vld [vmem:[#allocation7 + $0xf4] ss:$8 sps:$4 sm:$0xff]  }
 0x11d   :  { %2003 = vmatpush2.bf16.msra.mxu1 %v3492_v15  ;;  %1963 = vmatprep.subr.bf16.mxu0 %v3497_v18  ;;  %v3599_v15 = vld [vmem:[#allocation7 + $0x114] ss:$8 sps:$4 sm:$0xff]   ;;  %v3555_v18 = vld [vmem:[#allocation7 + $0xf0] ss:$8 sps:$4 sm:$0xff]  }
 0x11e   :  { %2004 = vmatprep.subr.bf16.mxu1 %v3500_v19  ;;  %v3597_v19 = vld [vmem:[#allocation7 + $0x110] ss:$8 sps:$4 sm:$0xff]  }
 0x120   :  { %1964 = vmatpush2.bf16.msra.mxu0 %v3495_v20  ;;  %v3560_v20 = vld [vmem:[#allocation7 + $0xe4] ss:$8 sps:$4 sm:$0xff]  }
 0x121   :  { %2005 = vmatpush2.bf16.msra.mxu1 %v3498_v21  ;;  %1965 = vmatprep.subr.bf16.mxu0 %v3503_v22  ;;  %v3602_v21 = vld [vmem:[#allocation7 + $0x104] ss:$8 sps:$4 sm:$0xff]   ;;  %v3558_v22 = vld [vmem:[#allocation7 + $0xe0] ss:$8 sps:$4 sm:$0xff]  }
 0x122   :  { %2006 = vmatprep.subr.bf16.mxu1 %v3506_v23  ;;  %v3600_v23 = vld [vmem:[#allocation7 + $0x100] ss:$8 sps:$4 sm:$0xff]  }
 0x124   :  { %1966 = vmatpush2.bf16.msra.mxu0 %v3501_v24  ;;  %v3563_v24 = vld [vmem:[#allocation7 + $0xd4] ss:$8 sps:$4 sm:$0xff]  }
 0x125   :  { %2007 = vmatpush2.bf16.msra.mxu1 %v3504_v25  ;;  %1967 = vmatprep.subr.bf16.mxu0 %v3509_v26  ;;  %v3605_v25 = vld [vmem:[#allocation7 + $0x1f4] ss:$8 sps:$4 sm:$0xff]   ;;  %v3561_v26 = vld [vmem:[#allocation7 + $0xd0] ss:$8 sps:$4 sm:$0xff]  }
 0x126   :  { %2008 = vmatprep.subr.bf16.mxu1 %v3512_v27  ;;  %v3603_v27 = vld [vmem:[#allocation7 + $0x1f0] ss:$8 sps:$4 sm:$0xff]  }
 0x128   :  { %1968 = vmatpush2.bf16.msra.mxu0 %v3507_v28  ;;  %v3566_v28 = vld [vmem:[#allocation7 + $0xc4] ss:$8 sps:$4 sm:$0xff]  }
 0x129   :  { %2009 = vmatpush2.bf16.msra.mxu1 %v3510_v29  ;;  %1969 = vmatprep.subr.bf16.mxu0 %v3515_v30  ;;  %v3608_v29 = vld [vmem:[#allocation7 + $0x1e4] ss:$8 sps:$4 sm:$0xff]   ;;  %v3564_v30 = vld [vmem:[#allocation7 + $0xc0] ss:$8 sps:$4 sm:$0xff]  }
 0x12a   :  { %2010 = vmatprep.subr.bf16.mxu1 %v3518_v31  ;;  %v3606_v31 = vld [vmem:[#allocation7 + $0x1e0] ss:$8 sps:$4 sm:$0xff]  }
 0x12c   :  { %1970 = vmatpush2.bf16.msra.mxu0 %v3513_v34  ;;  %v3569_v34 = vld [vmem:[#allocation7 + $0xb4] ss:$8 sps:$4 sm:$0xff]  }
 0x12d   :  { %2011 = vmatpush2.bf16.msra.mxu1 %v3516_v35  ;;  %1971 = vmatprep.subr.bf16.mxu0 %v3521_v36  ;;  %v3611_v35 = vld [vmem:[#allocation7 + $0x1d4] ss:$8 sps:$4 sm:$0xff]   ;;  %v3567_v36 = vld [vmem:[#allocation7 + $0xb0] ss:$8 sps:$4 sm:$0xff]  }
 0x12e   :  { %2012 = vmatprep.subr.bf16.mxu1 %v3524_v37  ;;  %v3609_v37 = vld [vmem:[#allocation7 + $0x1d0] ss:$8 sps:$4 sm:$0xff]  }
 0x130   :  { %1972 = vmatpush2.bf16.msra.mxu0 %v3519_v38  ;;  %v3572_v38 = vld [vmem:[#allocation7 + $0xa4] ss:$8 sps:$4 sm:$0xff]  }
 0x131   :  { %2013 = vmatpush2.bf16.msra.mxu1 %v3522_v39  ;;  %1973 = vmatprep.subr.bf16.mxu0 %v3527_v40  ;;  %v3614_v39 = vld [vmem:[#allocation7 + $0x1c4] ss:$8 sps:$4 sm:$0xff]   ;;  %v3570_v40 = vld [vmem:[#allocation7 + $0xa0] ss:$8 sps:$4 sm:$0xff]  }
 0x132   :  { %2014 = vmatprep.subr.bf16.mxu1 %v3530_v41  ;;  %v3612_v41 = vld [vmem:[#allocation7 + $0x1c0] ss:$8 sps:$4 sm:$0xff]  }
 0x134   :  { %1974 = vmatpush2.bf16.msra.mxu0 %v3525_v42  ;;  %v3575_v42 = vld [vmem:[#allocation7 + $0x94] ss:$8 sps:$4 sm:$0xff]  }
 0x135   :  { %2015 = vmatpush2.bf16.msra.mxu1 %v3528_v44  ;;  %2452 = vmatprep.subr.bf16.mxu0 %v3533_v45  ;;  %v3617_v44 = vld [vmem:[#allocation7 + $0x1b4] ss:$8 sps:$4 sm:$0xff]   ;;  %v399_v45 = vsub.s32 0, %v3869_v43 }
 0x137   :  { %v3920_v48 = vpop.f32.mrf.mxu0  ;;  %1976 = vmatmul.mubr.bf16.vlgmr.msra.gmra.mxu0 %v3906_v32  ;;  %v3581_v32 = vld [vmem:[#allocation7 + $0x174] ss:$8 sps:$4 sm:$0xff]  }
 0x138   :  { %v3922_v50 = vpop.f32.mrf.mxu1  ;;  %2017 = vmatmul.mubr.bf16.vlgmr.msra.gmra.mxu1 %v3910_v33  ;;  %2453 = vmatpush1.bf16.msra.mxu0 %v3531_v46  ;;  %v3540_v33 = vld [vmem:[#allocation7 + $0x40] ss:$8 sps:$4 sm:$0xff]   ;;  %v3934_v46 = vld [vmem:[%s3989_s4] sm:$0xf] }
 0x139   :  { %v3926_v62 = vpop.f32.mrf.mxu0  ;;  %2454 = vmatprep.subr.bf16.mxu0 %v3536_v47  ;;  %2493 = vmatprep.subr.bf16.mxu1 %v3581_v32  ;;  %v403_v47 = vsub.s32 1, %v3869_v43 }
 0x13a   :  { %v3928_v3 = vpop.f32.mrf.mxu1  ;;  %2494 = vmatpush1.bf16.msra.mxu1 %v3579_v59  ;;  %v3620_v59 = vld [vmem:[#allocation7 + $0x1a4] ss:$8 sps:$4 sm:$0xff]  }
 0x13b   :  { %v1735_v16 = vpop.f32.mrf.mxu0  ;;  %2495 = vmatprep.subr.bf16.mxu1 %v3584_v60  ;;  %v3618_v60 = vld [vmem:[#allocation7 + $0x1a0] ss:$8 sps:$4 sm:$0xff]  }
 0x13c   :  { %v1776_v54 = vpop.f32.mrf.mxu1  ;;  %2455 = vmatpush1.bf16.msra.mxu0 %v3534_v51  ;;  %v3573_v51 = vld [vmem:[#allocation7 + $0x90] ss:$8 sps:$4 sm:$0xff]   ;;  %v3578_v16 = vld [vmem:[#allocation7 + $0x84] ss:$8 sps:$4 sm:$0xff]  }
 0x13d   :  { %v1736_v55 = vpop.f32.mrf.mxu0  ;;  %2456 = vmatprep.subr.bf16.mxu0 %v3539_v52  ;;  %v3615_v52 = vld [vmem:[#allocation7 + $0x1b0] ss:$8 sps:$4 sm:$0xff]   ;;  %v400_v54 = vrot.slane %v3934_v46, %v399_v45 }
 0x13e   :  { %v1777_v56 = vpop.f32.mrf.mxu1  ;;  %2496 = vmatpush1.bf16.msra.mxu1 %v3582_v53  ;;  %v3576_v55 = vld [vmem:[#allocation7 + $0x80] ss:$8 sps:$4 sm:$0xff]  }
 0x13f   :  { %2497 = vmatprep.subr.bf16.mxu1 %v3587_v61  ;;  %v1732_v56 = vadd.f32 %v3920_v48, %v400_v54  ;;  %v3621_v48 = vld [vmem:[#allocation7 + $0x190] ss:$8 sps:$4 sm:$0xff]  }
 0x140   :  { %2457 = vmatpush1.bf16.msra.mxu0 %v3537_v17  ;;  %v404_v17 = vrot.slane %v3934_v46, %v403_v47 }
 0x141   :  { %2458 = vmatprep.subr.bf16.mxu0 %v3542_v58  ;;  %v1773_v32 = vadd.f32 %v3922_v50, %v1732_v56 }
 0x142   :  { %2498 = vmatpush1.bf16.msra.mxu1 %v3585_v0  ;;  %v1734_v58 = vadd.f32 %v3926_v62, %v404_v17 }
 0x143   :  { %2499 = vmatprep.subr.bf16.mxu1 %v3590_v2 }
 0x144   :  { %2459 = vmatpush1.bf16.msra.mxu0 %v3540_v33 }
 0x145   :  { %2460 = vmatprep.subr.bf16.mxu0 %v3545_v57  ;;  %v1775_v57 = vadd.f32 %v3928_v3, %v1734_v58  ;;  %v3624_v3 = vld [vmem:[#allocation7 + $0x180] ss:$8 sps:$4 sm:$0xff]  }
 0x146   :  { %2500 = vmatpush1.bf16.msra.mxu1 %v3588_v5 }
 0x147   :  { %2501 = vmatprep.subr.bf16.mxu1 %v3593_v7 }
 0x148   :  { %2461 = vmatpush1.bf16.msra.mxu0 %v3543_v63 }
 0x149   :  { %2462 = vmatprep.subr.bf16.mxu0 %v3548_v1  ;;  %v3623_v1 = vld [vmem:[#allocation7 + $0x194] ss:$8 sps:$4 sm:$0xff]  }
 0x14a   :  { %2502 = vmatpush1.bf16.msra.mxu1 %v3591_v9  ;;  %v3626_v9 = vld [vmem:[#allocation7 + $0x184] ss:$8 sps:$4 sm:$0xff]  }
 0x14b   :  { %2503 = vmatprep.subr.bf16.mxu1 %v3596_v11 }
 0x14c   :  { %2463 = vmatpush1.bf16.msra.mxu0 %v3546_v4 }
 0x14d   :  { %2464 = vmatprep.subr.bf16.mxu0 %v3551_v6 }
 0x14e   :  { %2504 = vmatpush1.bf16.msra.mxu1 %v3594_v13 }
 0x14f   :  { %2505 = vmatprep.subr.bf16.mxu1 %v3599_v15 }
 0x150   :  { %2465 = vmatpush1.bf16.msra.mxu0 %v3549_v8 }
 0x151   :  { %2466 = vmatprep.subr.bf16.mxu0 %v3554_v10 }
 0x152   :  { %2506 = vmatpush1.bf16.msra.mxu1 %v3597_v19 }
 0x153   :  { %2507 = vmatprep.subr.bf16.mxu1 %v3602_v21 }
 0x154   :  { %2467 = vmatpush1.bf16.msra.mxu0 %v3552_v12 }
 0x155   :  { %2468 = vmatprep.subr.bf16.mxu0 %v3557_v14 }
 0x156   :  { %2508 = vmatpush1.bf16.msra.mxu1 %v3600_v23 }
 0x157   :  { %2509 = vmatprep.subr.bf16.mxu1 %v3605_v25  ;;  %v3628_v25 = vld [vmem:[#allocation8 + $0x38] sm:$0xff]  }
 0x158   :  { %2469 = vmatpush2.bf16.msra.mxu0 %v3555_v18 }
 0x159   :  { %2470 = vmatprep.subr.bf16.mxu0 %v3560_v20 }
 0x15a   :  { %2510 = vmatpush2.bf16.msra.mxu1 %v3603_v27  ;;  %v3630_v27 = vld [vmem:[#allocation8 + $0x30] sm:$0xff]  }
 0x15b   :  { %2511 = vmatprep.subr.bf16.mxu1 %v3608_v29  ;;  %v3632_v29 = vld [vmem:[#allocation8 + $0x28] sm:$0xff]  }
 0x15c   :  { %2471 = vmatpush2.bf16.msra.mxu0 %v3558_v22 }
 0x15d   :  { %2472 = vmatprep.subr.bf16.mxu0 %v3563_v24  ;;  %v3627_v24 = vld [vmem:[#allocation8 + $0x78] sm:$0xff]  }
 0x15e   :  { %2512 = vmatpush2.bf16.msra.mxu1 %v3606_v31  ;;  %v3634_v31 = vld [vmem:[#allocation8 + $0x20] sm:$0xff]  }
 0x15f   :  { %2513 = vmatprep.subr.bf16.mxu1 %v3611_v35  ;;  %v3636_v35 = vld [vmem:[#allocation8 + $0x18] sm:$0xff]  }
 0x160   :  { %2473 = vmatpush2.bf16.msra.mxu0 %v3561_v26  ;;  %v3629_v26 = vld [vmem:[#allocation8 + $0x70] sm:$0xff]  }
 0x161   :  { %2474 = vmatprep.subr.bf16.mxu0 %v3566_v28  ;;  %v3631_v28 = vld [vmem:[#allocation8 + $0x68] sm:$0xff]  }
 0x162   :  { %2514 = vmatpush2.bf16.msra.mxu1 %v3609_v37  ;;  %v3638_v37 = vld [vmem:[#allocation8 + $0x10] sm:$0xff]  }
 0x163   :  { %2515 = vmatprep.subr.bf16.mxu1 %v3614_v39  ;;  %v411_v39 = vsub.s32 3, %v3869_v43 }
 0x164   :  { %2475 = vmatpush2.bf16.msra.mxu0 %v3564_v30  ;;  %v3633_v30 = vld [vmem:[#allocation8 + $0x60] sm:$0xff]  }
 0x165   :  { %2476 = vmatprep.subr.bf16.mxu0 %v3569_v34  ;;  %v3635_v34 = vld [vmem:[#allocation8 + $0x58] sm:$0xff]  }
 0x166   :  { %2516 = vmatpush2.bf16.msra.mxu1 %v3612_v41  ;;  %v412_v41 = vrot.slane %v3934_v46, %v411_v39 }
 0x167   :  { %2517 = vmatprep.subr.bf16.mxu1 %v3617_v44 }
 0x168   :  { %2477 = vmatpush2.bf16.msra.mxu0 %v3567_v36  ;;  %v3637_v36 = vld [vmem:[#allocation8 + $0x50] sm:$0xff]  }
 0x169   :  { %2478 = vmatprep.subr.bf16.mxu0 %v3572_v38  ;;  %v407_v38 = vsub.s32 2, %v3869_v43 }
 0x16a   :  { %2518 = vmatpush2.bf16.msra.mxu1 %v3615_v52 }
 0x16b   :  { %2519 = vmatprep.subr.bf16.mxu1 %v3620_v59 }
 0x16c   :  { %2479 = vmatpush2.bf16.msra.mxu0 %v3570_v40  ;;  %v408_v40 = vrot.slane %v3934_v46, %v407_v38 }
 0x16d   :  { %2480 = vmatprep.subr.bf16.mxu0 %v3575_v42 }
 0x16e   :  { %2520 = vmatpush2.bf16.msra.mxu1 %v3618_v60 }
 0x16f   :  { %2521 = vmatprep.subr.bf16.mxu1 %v3623_v1 }
 0x170   :  { %2481 = vmatpush2.bf16.msra.mxu0 %v3573_v51 }
 0x171   :  { %2482 = vmatprep.subr.bf16.mxu0 %v3578_v16 }
 0x172   :  { %2522 = vmatpush2.bf16.msra.mxu1 %v3621_v48 }
 0x173   :  { %2523 = vmatprep.subr.bf16.mxu1 %v3626_v9  ;;  %v3641_v9 = vld [vmem:[#allocation8 + $0x40] sm:$0xff]  }
 0x174   :  { %2483 = vmatpush2.bf16.msra.mxu0 %v3576_v55 }
 0x175   :  { %3109 = vmatprep.subr.bf16.mxu0 %v3627_v24 }
 0x176   :  { %2524 = vmatpush2.bf16.msra.mxu1 %v3624_v3  ;;  %v3642_v3 = vld [vmem:[#allocation8] sm:$0xff]  }
 0x177   :  { %v1813_v33 = vpop.f32.mrf.mxu0 }
 0x178   :  { %v1854_v53 = vpop.f32.mrf.mxu1  ;;  %v1814_v61 = vadd.f32 %v1813_v33, %v1773_v32 }
 0x179   :  { %v1815_v63 = vpop.f32.mrf.mxu0 }
 0x17a   :  { %v1856_v0 = vpop.f32.mrf.mxu1  ;;  %v1855_v2 = vadd.f32 %v1854_v53, %v1814_v61  ;;  %v1816_v4 = vadd.f32 %v1815_v63, %v1775_v57 }
 0x17b   :  { %v1817_v5 = vpop.f32.mrf.mxu0 }
 0x17c   :  { %v1858_v62 = vpop.f32.mrf.mxu1  ;;  %v1857_v6 = vadd.f32 %v1856_v0, %v1816_v4  ;;  %v3947_v50 = vmax.f32 %v1855_v2, 0.0 }
 0x17d   :  { %v1818_v7 = vpop.f32.mrf.mxu0  ;;  %v3639_v62 = vld [vmem:[#allocation8 + $0x48] sm:$0xff]  }
 0x17e   :  { %v1859_v8 = vpop.f32.mrf.mxu1  ;;  %v3949_v10 = vmax.f32 %v1857_v6, 0.0  ;;  %v2052_v13 = vpack.c.bf16 %v3947_v50, %v3947_v50  ;;  %v3640_v6 = vld [vmem:[#allocation8 + $0x8] sm:$0xff]  }
 0x180   :  { %v2033_v11 = vcombine.low %v3947_v50, %v3949_v10  ;;  %v2053_v12 = vpack.c.bf16 %v3949_v10, %v3949_v10 }
 0x182   :  { %2484 = vmatprep.mubr.bf16.mxu0 %v2053_v12  ;;  %v2041_v2 = vrot.slane %v2033_v11, %v3872_v49 }
 0x183   :  { %2485 = vmatmul.mubr.bf16.vlgmr.msra.gmra.mxu0 %v2052_v13 }
 0x184   :  { %3110 = vmatpush3.bf16.msra.mxu0 %v3628_v25 }
 0x185   :  { %3111 = vmatprep.subr.bf16.mxu0 %v3629_v26 }
 0x188   :  { %3112 = vmatpush3.bf16.msra.mxu0 %v3630_v27 }
 0x189   :  { %3113 = vmatprep.subr.bf16.mxu0 %v3631_v28 }
 0x18c   :  { %3114 = vmatpush3.bf16.msra.mxu0 %v3632_v29 }
 0x18d   :  { %3115 = vmatprep.subr.bf16.mxu0 %v3633_v30 }
 0x190   :  { %3116 = vmatpush3.bf16.msra.mxu0 %v3634_v31 }
 0x191   :  { %3117 = vmatprep.subr.bf16.mxu0 %v3635_v34 }
 0x194   :  { %3118 = vmatpush3.bf16.msra.mxu0 %v3636_v35 }
 0x195   :  { %3119 = vmatprep.subr.bf16.mxu0 %v3637_v36 }
 0x198   :  { %3120 = vmatpush3.bf16.msra.mxu0 %v3638_v37 }
 0x199   :  { %3121 = vmatprep.subr.bf16.mxu0 %v3639_v62 }
 0x19c   :  { %3122 = vmatpush3.bf16.msra.mxu0 %v3640_v6 }
 0x19d   :  { %3123 = vmatprep.subr.bf16.mxu0 %v3641_v9 }
 0x1a0   :  { %3124 = vmatpush3.bf16.msra.mxu0 %v3642_v3 }
 0x1b7   :  { %v1895_v14 = vpop.f32.mrf.mxu0 }
 0x1b8   :  { %v1936_v15 = vpop.f32.mrf.mxu1  ;;  %v1896_v42 = vadd.f32 %v1895_v14, %v408_v40 }
 0x1b9   :  { %v1897_v18 = vpop.f32.mrf.mxu0 }
 0x1ba   :  { %v1938_v19 = vpop.f32.mrf.mxu1  ;;  %v1898_v44 = vadd.f32 %v1897_v18, %v412_v41  ;;  %v1937_v51 = vadd.f32 %v1936_v15, %v1896_v42 }
 0x1bb   :  { %v1899_v20 = vpop.f32.mrf.mxu0 }
 0x1bc   :  { %v1940_v21 = vpop.f32.mrf.mxu1  ;;  %v1939_v54 = vadd.f32 %v1938_v19, %v1898_v44 }
 0x1bd   :  { %v1900_v22 = vpop.f32.mrf.mxu0 }
 0x1be   :  { %v1941_v23 = vpop.f32.mrf.mxu1 }
 0x1f7   :  { %v1977_v52 = vpop.f32.mrf.mxu0 }
 0x1f8   :  { %v2018_v16 = vpop.f32.mrf.mxu1  ;;  %v1978_v17 = vadd.f32 %v1977_v52, %v1937_v51 }
 0x1f9   :  { %v1979_v55 = vpop.f32.mrf.mxu0 }
 0x1fa   :  { %v2020_v56 = vpop.f32.mrf.mxu1  ;;  %v2019_v58 = vadd.f32 %v2018_v16, %v1978_v17  ;;  %v1980_v59 = vadd.f32 %v1979_v55, %v1939_v54 }
 0x1fb   :  { %v1981_v32 = vpop.f32.mrf.mxu0 }
 0x1fc   :  { %v2022_v60 = vpop.f32.mrf.mxu1  ;;  %v2021_v33 = vadd.f32 %v2020_v56, %v1980_v59  ;;  %v2027_v53 = vmax.f32 %v2019_v58, 0.0 }
 0x1fd   :  { %v1982_v57 = vpop.f32.mrf.mxu0 }
 0x1fe   :  { %v2023_v61 = vpop.f32.mrf.mxu1  ;;  %v2028_v63 = vmax.f32 %v2021_v33, 0.0  ;;  %v2054_v1 = vpack.c.bf16 %v2027_v53, %v2027_v53 }
 0x200   :  { %v2034_v0 = vcombine.low %v2027_v53, %v2028_v63  ;;  %v2055_v46 = vpack.c.bf16 %v2028_v63, %v2028_v63 }
 0x202   :  { %v2048_v4 = vrot.slane %v2034_v0, %v3872_v49  ;;  %2525 = vmatprep.mubr.bf16.mxu1 %v2055_v46  ;;  %v2120_v49 = vld [vmem:[%s3990_s5] sm:$0x3]  ;;  %s3804_s5 = smov [#allocation11]  }
 0x203   :  { %2526 = vmatmul.mubr.bf16.vlgmr.msra.gmra.mxu1 %v2054_v1  ;;  %v2125_v50 = vrot.slane %v2120_v49, %v399_v45  ;;  %v2129_v10 = vrot.slane %v2120_v49, %v403_v47  ;;  %s2743_s13 = sshll.u32 %s3804_s5, 4  ;;  %s2744_s13 = int_to_ptr.vmem [resolvable:$true] %s2743_s13 }
 0x204   :  { %v2049_v48 = vcombine.low %v2041_v2, %v2048_v4  ;;  %s3723_s16 = scalar_lea.vmem %s2744_s13, 64  ;;  %p3728_p7 = scmp.lt.s32.totalorder %s2744_s13, %s2744_s13 }
 0x205   :  { %p3724_p6 = scmp.ne.s32.totalorder %s2744_s13, %s3723_s16  ;;  %p3729_p8 = scmp.lt.s32.totalorder %s3723_s16, %s3723_s16 }
 0x206   :  { %2051 = vst [vmem:[#allocation10] sm:$0xff] %v2049_v48 }
 0x207   :  { %p3730_p9 = por %p3729_p8, %p3728_p7 }
 0x209   :  { %p3731_p10 = pnand %p3730_p9, %p3724_p6 }
 0x243   :  { %v2486_v5 = vpop.f32.mrf.mxu0 }
 0x244   :  { %v2487_v11 = vadd.f32 %v2486_v5, %v2125_v50 }
 0x245   :  { %v2488_v7 = vpop.f32.mrf.mxu0 }
 0x246   :  { %v2489_v14 = vadd.f32 %v2488_v7, %v2129_v10 }
 0x247   :  { %v2490_v8 = vpop.f32.mrf.mxu0 }
 0x249   :  { %v2491_v12 = vpop.f32.mrf.mxu0 }
 0x2c3   :  { %v2527_v13 = vpop.f32.mrf.mxu1 }
 0x2c4   :  { %v2528_v15 = vadd.f32 %v2527_v13, %v2487_v11 }
 0x2c5   :  { %v2529_v18 = vpop.f32.mrf.mxu1 }
 0x2c6   :  { %v2530_v19 = vadd.f32 %v2529_v18, %v2489_v14  ;;  %v2534_v20 = vmax.f32 %v2528_v15, 0.0 }
 0x2c7   :  { %v2531_v21 = vpop.f32.mrf.mxu1 }
 0x2c8   :  { %v2535_v22 = vmax.f32 %v2530_v19, 0.0  ;;  %v2548_v26 = vpack.c.bf16 %v2534_v20, %v2534_v20 }
 0x2c9   :  { %v2532_v23 = vpop.f32.mrf.mxu1 }
 0x2ca   :  { %v2538_v24 = vcombine.low %v2534_v20, %v2535_v22  ;;  %v2549_v25 = vpack.c.bf16 %v2535_v22, %v2535_v22 }
 0x2cc   :  { %3091 = vst.sshfl [vmem:[#allocation11] sm:$0x33 pattern:$0x76325410] %v2538_v24  ;;  %2717 = vmatprep.mubr.bf16.mxu0 %v2549_v25 }
 0x2cd   :  { %2718 = vmatmul.mubr.bf16.vlgmr.msra.gmra.mxu0 %v2548_v26 }
 0x2ce   :  { %3734 = shalt.err (!%p3731_p10)
}
 0x2cf   :  { %2746 = dma.vmem_to_hbm [thread:$0]  %s2744_s13, 64, %s3993_s8, [#allocation12]  }
 0x2d0   :  { %s3743_s19 = scalar_lea.vmem %s2734_s15, 128  ;;  %p3748_p12 = scmp.lt.s32.totalorder %s2734_s15, %s2734_s15 }
 0x2d1   :  { %p3744_p11 = scmp.ne.s32.totalorder %s2734_s15, %s3743_s19  ;;  %p3749_p13 = scmp.lt.s32.totalorder %s3743_s19, %s3743_s19 }
 0x2d3   :  { %p3750_p0 = por %p3749_p13, %p3748_p12 }
 0x2d5   :  { %p3751_p1 = pnand %p3750_p0, %p3744_p11 }
 0x2d7   :  { %3754 = shalt.err (!%p3751_p1)
}
 0x2d8   :  { %2736 = dma.vmem_to_hbm [thread:$0]  %s2734_s15, 128, %s3992_s7, [#allocation4]   ;;  %v3092_v45 = vld [vmem:[%s3991_s6] ss:$0 sm:$0xff] }
 0x2d9   :  { %s3806_s8 = smov [#allocation13]  }
 0x2da   :  { %s2753_s1 = sshll.u32 %s3806_s8, 4  ;;  %s2754_s1 = int_to_ptr.vmem [resolvable:$true] %s2753_s1 }
 0x2db   :  { %s3763_s24 = scalar_lea.vmem %s2754_s1, 32  ;;  %p3768_p3 = scmp.lt.s32.totalorder %s2754_s1, %s2754_s1 }
 0x2dc   :  { %p3764_p2 = scmp.ne.s32.totalorder %s2754_s1, %s3763_s24  ;;  %p3769_p4 = scmp.lt.s32.totalorder %s3763_s24, %s3763_s24 }
 0x2de   :  { %p3770_p5 = por %p3769_p4, %p3768_p3 }
 0x2e0   :  { %p3771_p6 = pnand %p3770_p5, %p3764_p2 }
 0x38d   :  { %v3125_v43 = vpop.f32.mrf.mxu0 }
 0x38f   :  { %v3126_v47 = vpop.f32.mrf.mxu0 }
 0x390   :  { %v3127_v27 = vadd.f32 %v3126_v47, %v3125_v43 }
 0x391   :  { %v3128_v28 = vpop.f32.mrf.mxu0 }
 0x392   :  { %v2720_v29 = vadd.f32 %v3127_v27, %v3092_v45 }
 0x393   :  { %v3129_v30 = vpop.f32.mrf.mxu0 }
 0x394   :  { %v2725_v31 = vmax.f32 %v2720_v29, 0.0 }
 0x396   :  { %2726 = vst [vmem:[#allocation13] sm:$0x3] %v2725_v31 }
 0x397   :  { %3774 = shalt.err (!%p3771_p6)
}
 0x398   :  { %2756 = dma.vmem_to_hbm [thread:$0]  %s2754_s1, 32, %s3994_s9, [#allocation12]  }
 0x399   :  { %3789 = dma.done.wait [#allocation4], 128  }
 0x39a   :  { %3790 = vsyncadd [#allocation4], 4294967168 }
 0x39b   :  { %3791 = dma.done.wait [#allocation12], 96  }
 0x39c   :  { %3792 = vsyncadd [#allocation12], 4294967200 }
 0x39d   :  { %2766 = vsyncpa [#allocation3], 1 }
 0x39e   :  { %2767 = vsyncpa [#allocation6], 1 }
 0x39f   :  { %2768 = vsyncpa [#allocation9], 1 }
 0x3a0   :  { %2769 = vsyncpa [#allocation4], 1 }
 0x3a1   :  { %2770 = vsyncpa [#allocation12], 1 }

</bundles_post_ra>
